<compile_context>
chip_gen: v7x
topology: tpu7x:2x2x1
jax: 0.10.0
libtpu: 0.0.40
codegen_flags: <defaults>
</compile_context>

<pallas_src>
import functools
import math

import jax
import jax.numpy as jnp
from jax import lax
from jax.experimental import pallas as pl
from jax.experimental.pallas import tpu as pltpu

_LN_EPS = 1e-5          # nn.LayerNorm default
_NEG_INF = -1e30        # additive causal mask value
_MM_DTYPE = jnp.bfloat16  # matmul operand dtype (f32 accumulation on the MXU)


# ---------------------------------------------------------------------------
# In-kernel helpers (plain jnp on values, traced inside the kernel body)
# ---------------------------------------------------------------------------

def _layer_norm_f32(y, g, b, eps):
    mean = jnp.mean(y, axis=-1, keepdims=True)
    c = y - mean
    var = jnp.mean(c * c, axis=-1, keepdims=True)
    return c * lax.rsqrt(var + eps) * g + b


def _softmax_rows_f32(s):
    m = jnp.max(s, axis=-1, keepdims=True)
    e = jnp.exp(s - m)
    # EUP approx reciprocal: issues on the otherwise-idle EUP slot.
    return e * pl.reciprocal(jnp.sum(e, axis=-1, keepdims=True), approx=True)


def _qkt(q, k):
    # q @ k^T contracting the head dim, no materialized transpose.
    return lax.dot_general(q, k, (((1,), (1,)), ((), ())),
                           preferred_element_type=jnp.float32)


# ---------------------------------------------------------------------------
# Fused kernels (one grid step == one batch element)
# ---------------------------------------------------------------------------

def _masked_mha_block_kernel(x_ref, wqkv_ref, bqkv_ref, w0_ref, b0_ref,
                             g_ref, bt_ref, o_ref, *,
                             num_heads, head_dim, scale, eps):
    # x_ref: (1, S, D) f32; wqkv: (D, 3*H*Dh) bf16; w0: (H*Dh, D) bf16.
    x = x_ref[0, :, :]                               # (S, D) f32
    sq, d = x.shape

    # Stacked QKV projection: one wide matmul instead of three.
    qkv = jnp.dot(x.astype(_MM_DTYPE), wqkv_ref[...],
                  preferred_element_type=jnp.float32)
    qkv = qkv + bqkv_ref[...]                        # (S, 3*H*Dh) f32
    hd = num_heads * head_dim
    q, k, v = qkv[:, :hd], qkv[:, hd:2 * hd], qkv[:, 2 * hd:3 * hd]

    row = lax.broadcasted_iota(jnp.int32, (sq, sq), 0)
    col = lax.broadcasted_iota(jnp.int32, (sq, sq), 1)
    causal = col <= row

    # Per-head attention; W0 applied per head and summed (avoids a concat and
    # keeps the whole chain in VMEM/vregs).
    proj = jnp.zeros((sq, d), jnp.float32)
    for h in range(num_heads):
        sl = slice(h * head_dim, (h + 1) * head_dim)
        qh = q[:, sl].astype(_MM_DTYPE)
        kh = k[:, sl].astype(_MM_DTYPE)
        vh = v[:, sl].astype(_MM_DTYPE)
        s = _qkt(qh, kh) * scale                     # (S, S) f32
        # TODO(synk): the reference MultiHeadMaskedAttention calls head(x)
        # without the `mask` argument its heads require (would raise in
        # PyTorch); we use the standard causal mask a decoder implies.
        s = jnp.where(causal, s, _NEG_INF)
        p = _softmax_rows_f32(s)
        oh = jnp.dot(p.astype(_MM_DTYPE), vh,
                     preferred_element_type=jnp.float32)           # (S, Dh)
        proj = proj + jnp.dot(oh.astype(_MM_DTYPE), w0_ref[sl, :],
                              preferred_element_type=jnp.float32)  # (S, D)
    proj = proj + b0_ref[...]

    # Residual add + LayerNorm (f32 statistics), fused epilogue.
    y = x + proj
    o_ref[0, :, :] = _layer_norm_f32(y, g_ref[...], bt_ref[...],
                                     eps).astype(o_ref.dtype)


def _cross_mha_block_kernel(x_ref, enc_ref, wq_ref, bq_ref, wkv_ref, bkv_ref,
                            w0_ref, b0_ref, g_ref, bt_ref, o_ref, *,
                            num_heads, head_dim, scale, eps):
    # x_ref: (1, S, D); enc_ref: (1, Se, De); wkv: (De, 2*Hc*Dc) bf16.
    x = x_ref[0, :, :]                               # (S, D) f32
    enc = enc_ref[0, :, :]                           # (Se, De) f32
    sq, d = x.shape

    q = jnp.dot(x.astype(_MM_DTYPE), wq_ref[...],
                preferred_element_type=jnp.float32) + bq_ref[...]
    kv = jnp.dot(enc.astype(_MM_DTYPE), wkv_ref[...],
                 preferred_element_type=jnp.float32) + bkv_ref[...]
    hd = num_heads * head_dim
    k, v = kv[:, :hd], kv[:, hd:2 * hd]

    proj = jnp.zeros((sq, d), jnp.float32)
    for h in range(num_heads):
        sl = slice(h * head_dim, (h + 1) * head_dim)
        qh = q[:, sl].astype(_MM_DTYPE)
        kh = k[:, sl].astype(_MM_DTYPE)
        vh = v[:, sl].astype(_MM_DTYPE)
        s = _qkt(qh, kh) * scale                     # (S, Se) f32, no mask
        p = _softmax_rows_f32(s)
        oh = jnp.dot(p.astype(_MM_DTYPE), vh,
                     preferred_element_type=jnp.float32)
        proj = proj + jnp.dot(oh.astype(_MM_DTYPE), w0_ref[sl, :],
                              preferred_element_type=jnp.float32)
    proj = proj + b0_ref[...]

    y = x + proj
    o_ref[0, :, :] = _layer_norm_f32(y, g_ref[...], bt_ref[...],
                                     eps).astype(o_ref.dtype)


def _ffn_block_kernel(x_ref, w1_ref, b1_ref, w2_ref, b2_ref,
                      g_ref, bt_ref, o_ref, *, eps):
    # Linear -> ReLU -> Linear -> residual add -> LayerNorm; hidden activation
    # never leaves VMEM.
    x = x_ref[0, :, :]                               # (S, D) f32
    h = jnp.dot(x.astype(_MM_DTYPE), w1_ref[...],
                preferred_element_type=jnp.float32) + b1_ref[...]
    h = jnp.maximum(h, 0.0)
    ff = jnp.dot(h.astype(_MM_DTYPE), w2_ref[...],
                 preferred_element_type=jnp.float32) + b2_ref[...]
    y = x + ff
    o_ref[0, :, :] = _layer_norm_f32(y, g_ref[...], bt_ref[...],
                                     eps).astype(o_ref.dtype)


# ---------------------------------------------------------------------------
# Pallas wrappers
# ---------------------------------------------------------------------------

def _compiler_params():
    # Batch grid axis is "parallel" so v7x megacore can shard it across both
    # TensorCores; explicit (conservative) VMEM budget works on v5e/v6e/v7x.
    return pltpu.CompilerParams(
        dimension_semantics=("parallel",),
        vmem_limit_bytes=32 * 1024 * 1024,
    )


def _full_spec(shape):
    # Whole-array (constant index) block: weights / biases / gamma / beta.
    n = len(shape)
    return pl.BlockSpec(shape, lambda i, _n=n: (0,) * _n)


def _batch_spec(s, d):
    return pl.BlockSpec((1, s, d), lambda i: (i, 0, 0))


def pallas_masked_mha_block(x, wqkv, bqkv, w0, b0, gamma, beta, *,
                            num_heads, head_dim):
    b, s, d = x.shape
    kernel = functools.partial(_masked_mha_block_kernel,
                               num_heads=num_heads, head_dim=head_dim,
                               scale=1.0 / math.sqrt(head_dim), eps=_LN_EPS)
    return pl.pallas_call(
        kernel,
        out_shape=jax.ShapeDtypeStruct((b, s, d), x.dtype),
        grid_spec=pltpu.PrefetchScalarGridSpec(
            num_scalar_prefetch=0,
            grid=(b,),
            in_specs=[
                _batch_spec(s, d),
                _full_spec(wqkv.shape), _full_spec(bqkv.shape),
                _full_spec(w0.shape), _full_spec(b0.shape),
                _full_spec(gamma.shape), _full_spec(beta.shape),
            ],
            out_specs=_batch_spec(s, d),
        ),
        compiler_params=_compiler_params(),
    )(x, wqkv, bqkv, w0, b0, gamma, beta)


def pallas_cross_mha_block(x, enc, wq, bq, wkv, bkv, w0, b0, gamma, beta, *,
                           num_heads, head_dim):
    b, s, d = x.shape
    _, se, de = enc.shape
    kernel = functools.partial(_cross_mha_block_kernel,
                               num_heads=num_heads, head_dim=head_dim,
                               scale=1.0 / math.sqrt(head_dim), eps=_LN_EPS)
    return pl.pallas_call(
        kernel,
        out_shape=jax.ShapeDtypeStruct((b, s, d), x.dtype),
        grid_spec=pltpu.PrefetchScalarGridSpec(
            num_scalar_prefetch=0,
            grid=(b,),
            in_specs=[
                _batch_spec(s, d),
                _batch_spec(se, de),
                _full_spec(wq.shape), _full_spec(bq.shape),
                _full_spec(wkv.shape), _full_spec(bkv.shape),
                _full_spec(w0.shape), _full_spec(b0.shape),
                _full_spec(gamma.shape), _full_spec(beta.shape),
            ],
            out_specs=_batch_spec(s, d),
        ),
        compiler_params=_compiler_params(),
    )(x, enc, wq, bq, wkv, bkv, w0, b0, gamma, beta)


def pallas_ffn_block(x, w1, b1, w2, b2, gamma, beta):
    b, s, d = x.shape
    kernel = functools.partial(_ffn_block_kernel, eps=_LN_EPS)
    return pl.pallas_call(
        kernel,
        out_shape=jax.ShapeDtypeStruct((b, s, d), x.dtype),
        grid_spec=pltpu.PrefetchScalarGridSpec(
            num_scalar_prefetch=0,
            grid=(b,),
            in_specs=[
                _batch_spec(s, d),
                _full_spec(w1.shape), _full_spec(b1.shape),
                _full_spec(w2.shape), _full_spec(b2.shape),
                _full_spec(gamma.shape), _full_spec(beta.shape),
            ],
            out_specs=_batch_spec(s, d),
        ),
        compiler_params=_compiler_params(),
    )(x, w1, b1, w2, b2, gamma, beta)


# ---------------------------------------------------------------------------
# Decoder forward (Pallas) — 3 kernel dispatches per block, no host-side
# transposes or reshapes between kernels.
# ---------------------------------------------------------------------------

def decoder_block_forward(kp, x, enc, *, num_masked_heads, masked_head_dim,
                          num_cross_heads, cross_head_dim):
    h1 = pallas_masked_mha_block(
        x, kp["self_qkv_w"], kp["self_qkv_b"], kp["self_w0_w"], kp["self_w0_b"],
        kp["ln_g"], kp["ln_b"],
        num_heads=num_masked_heads, head_dim=masked_head_dim)
    h2 = pallas_cross_mha_block(
        h1, enc, kp["cross_q_w"], kp["cross_q_b"], kp["cross_kv_w"],
        kp["cross_kv_b"], kp["cross_w0_w"], kp["cross_w0_b"],
        kp["ln_g"], kp["ln_b"],
        num_heads=num_cross_heads, head_dim=cross_head_dim)
    h3 = pallas_ffn_block(
        h2, kp["ffn1_w"], kp["ffn1_b"], kp["ffn2_w"], kp["ffn2_b"],
        kp["ln_g"], kp["ln_b"])
    return h3


def decoder_forward(kparams, x, enc, *, num_masked_heads, masked_head_dim,
                    num_cross_heads, cross_head_dim):
    for kp in kparams["blocks"]:
        x = decoder_block_forward(kp, x, enc,
                                  num_masked_heads=num_masked_heads,
                                  masked_head_dim=masked_head_dim,
                                  num_cross_heads=num_cross_heads,
                                  cross_head_dim=cross_head_dim)
    return x


# ---------------------------------------------------------------------------
# Parameter init (matches nn.Linear / nn.LayerNorm defaults) + kernel params
# ---------------------------------------------------------------------------

def _init_linear(key, fan_in, fan_out, dtype):
    kw, kb = jax.random.split(key)
    bound = 1.0 / math.sqrt(fan_in)
    # Stored pre-transposed as [D_in, D_out] so no transpose is ever needed.
    return {"w": jax.random.uniform(kw, (fan_in, fan_out), dtype, -bound, bound),
            "b": jax.random.uniform(kb, (1, fan_out), dtype, -bound, bound)}


def init_decoder_params(key, *, masked_input_dim, masked_output_dim,
                        num_masked_heads, encoder_output_dim,
                        cross_attention_output_dim, num_cross_attention_heads,
                        feed_forward_dim, num_blocks, dtype=jnp.float32):
    blocks = []
    for _ in range(num_blocks):
        key, *ks = jax.random.split(key, 11)
        blocks.append({
            "self_q": _init_linear(ks[0], masked_input_dim,
                                   masked_output_dim * num_masked_heads, dtype),
            "self_k": _init_linear(ks[1], masked_input_dim,
                                   masked_output_dim * num_masked_heads, dtype),
            "self_v": _init_linear(ks[2], masked_input_dim,
                                   masked_output_dim * num_masked_heads, dtype),
            "self_w0": _init_linear(ks[3], masked_output_dim * num_masked_heads,
                                    masked_input_dim, dtype),
            "cross_q": _init_linear(ks[4], masked_input_dim,
                                    cross_attention_output_dim * num_cross_attention_heads, dtype),
            "cross_k": _init_linear(ks[5], encoder_output_dim,
                                    cross_attention_output_dim * num_cross_attention_heads, dtype),
            "cross_v": _init_linear(ks[6], encoder_output_dim,
                                    cross_attention_output_dim * num_cross_attention_heads, dtype),
            "cross_w0": _init_linear(ks[7],
                                     cross_attention_output_dim * num_cross_attention_heads,
                                     masked_input_dim, dtype),
            "ffn1": _init_linear(ks[8], masked_input_dim, feed_forward_dim, dtype),
            "ffn2": _init_linear(ks[9], feed_forward_dim, masked_input_dim, dtype),
            # One LayerNorm per block, reused for all three Add&Norm steps
            # (exactly as the PyTorch DecoderBlock does).
            "ln": {"gamma": jnp.ones((1, masked_input_dim), dtype),
                   "beta": jnp.zeros((1, masked_input_dim), dtype)},
        })
    return {"blocks": blocks}


def prepare_kernel_params(params):
    """Fuse QKV / KV weights (done once, at init) and pre-cast weights to bf16.

    Biases / gamma / beta stay f32 (added on the f32 MXU accumulator /
    epilogue path).
    """
    def w(p): return p["w"].astype(_MM_DTYPE)
    blocks = []
    for p in params["blocks"]:
        blocks.append({
            "self_qkv_w": jnp.concatenate(
                [p["self_q"]["w"], p["self_k"]["w"], p["self_v"]["w"]],
                axis=1).astype(_MM_DTYPE),
            "self_qkv_b": jnp.concatenate(
                [p["self_q"]["b"], p["self_k"]["b"], p["self_v"]["b"]], axis=1),
            "self_w0_w": w(p["self_w0"]), "self_w0_b": p["self_w0"]["b"],
            "cross_q_w": w(p["cross_q"]), "cross_q_b": p["cross_q"]["b"],
            "cross_kv_w": jnp.concatenate(
                [p["cross_k"]["w"], p["cross_v"]["w"]], axis=1).astype(_MM_DTYPE),
            "cross_kv_b": jnp.concatenate(
                [p["cross_k"]["b"], p["cross_v"]["b"]], axis=1),
            "cross_w0_w": w(p["cross_w0"]), "cross_w0_b": p["cross_w0"]["b"],
            "ffn1_w": w(p["ffn1"]), "ffn1_b": p["ffn1"]["b"],
            "ffn2_w": w(p["ffn2"]), "ffn2_b": p["ffn2"]["b"],
            "ln_g": p["ln"]["gamma"], "ln_b": p["ln"]["beta"],
        })
    return {"blocks": blocks}


# ---------------------------------------------------------------------------
# Pure-JAX reference (f32, HIGHEST matmul precision)
# ---------------------------------------------------------------------------

_P = lax.Precision.HIGHEST


def _ref_linear(x, p):
    return jnp.dot(x, p["w"], precision=_P) + p["b"]


def _ref_mha(q, k, v, num_heads, head_dim, causal):
    sq, sk = q.shape[1], k.shape[1]
    outs = []
    for h in range(num_heads):
        sl = slice(h * head_dim, (h + 1) * head_dim)
        s = jnp.einsum("bqd,bkd->bqk", q[..., sl], k[..., sl],
                       precision=_P) / math.sqrt(head_dim)
        if causal:
            s = jnp.where(jnp.tril(jnp.ones((sq, sk), bool)), s, _NEG_INF)
        p = jax.nn.softmax(s, axis=-1)
        outs.append(jnp.einsum("bqk,bkd->bqd", p, v[..., sl], precision=_P))
    return jnp.concatenate(outs, axis=-1)


def _ref_add_norm(prev, new, ln, eps=_LN_EPS):
    y = prev + new
    mu = y.mean(-1, keepdims=True)
    var = ((y - mu) ** 2).mean(-1, keepdims=True)
    return (y - mu) / jnp.sqrt(var + eps) * ln["gamma"] + ln["beta"]


def decoder_reference(params, x, enc, num_masked_heads, masked_head_dim,
                      num_cross_heads, cross_head_dim):
    for p in params["blocks"]:
        a = _ref_mha(_ref_linear(x, p["self_q"]), _ref_linear(x, p["self_k"]),
                     _ref_linear(x, p["self_v"]),
                     num_masked_heads, masked_head_dim, True)
        h1 = _ref_add_norm(x, _ref_linear(a, p["self_w0"]), p["ln"])
        c = _ref_mha(_ref_linear(h1, p["cross_q"]), _ref_linear(enc, p["cross_k"]),
                     _ref_linear(enc, p["cross_v"]),
                     num_cross_heads, cross_head_dim, False)
        h2 = _ref_add_norm(h1, _ref_linear(c, p["cross_w0"]), p["ln"])
        ff = _ref_linear(jnp.maximum(_ref_linear(h2, p["ffn1"]), 0.0), p["ffn2"])
        x = _ref_add_norm(h2, ff, p["ln"])
    return x


# ---------------------------------------------------------------------------
# Main
# ---------------------------------------------------------------------------

if __name__ == "__main__":
    key = jax.random.PRNGKey(0)
    k_x, k_enc, k_p = jax.random.split(key, 3)

    batch, seq, enc_seq = 2, 8, 16
    masked_input_dim = 32
    masked_output_dim = 16          # per-head dim for self attention
    num_masked_heads = 2
    encoder_output_dim = 48
    cross_attention_output_dim = 16  # per-head dim for cross attention
    num_cross_attention_heads = 2
    feed_forward_dim = 64
    num_blocks = 2

    x = jax.random.normal(k_x, (batch, seq, masked_input_dim), jnp.float32)
    enc = jax.random.normal(k_enc, (batch, enc_seq, encoder_output_dim),
                            jnp.float32)

    params = init_decoder_params(
        k_p,
        masked_input_dim=masked_input_dim,
        masked_output_dim=masked_output_dim,
        num_masked_heads=num_masked_heads,
        encoder_output_dim=encoder_output_dim,
        cross_attention_output_dim=cross_attention_output_dim,
        num_cross_attention_heads=num_cross_attention_heads,
        feed_forward_dim=feed_forward_dim,
        num_blocks=num_blocks,
    )
    kparams = prepare_kernel_params(params)

    fwd = jax.jit(functools.partial(
        decoder_forward,
        num_masked_heads=num_masked_heads,
        masked_head_dim=masked_output_dim,
        num_cross_heads=num_cross_attention_heads,
        cross_head_dim=cross_attention_output_dim))
    out = jax.block_until_ready(fwd(kparams, x, enc))

    ref = decoder_reference(params, x, enc,
                            num_masked_heads, masked_output_dim,
                            num_cross_attention_heads,
                            cross_attention_output_dim)

    assert out.shape == (batch, seq, masked_input_dim)
    assert bool(jnp.all(jnp.isfinite(out)))
    # bf16 matmul operands + EUP approx reciprocal vs f32/HIGHEST reference.
    max_err = float(jnp.max(jnp.abs(out - ref)))
    assert max_err < 8e-2, f"max abs error {max_err}"

    print("KERNEL_OK")
</pallas_src>

<mosaic_0001>
module attributes {stable_mosaic.version = 11 : i64} {
  func.func @_cross_mha_block_kernel(%arg0: i32, %arg1: memref<1x8x32xf32, #tpu.memory_space<vmem>>, %arg2: memref<1x16x48xf32, #tpu.memory_space<vmem>>, %arg3: memref<32x32xbf16, #tpu.memory_space<vmem>>, %arg4: memref<1x32xf32, #tpu.memory_space<vmem>>, %arg5: memref<48x64xbf16, #tpu.memory_space<vmem>>, %arg6: memref<1x64xf32, #tpu.memory_space<vmem>>, %arg7: memref<32x32xbf16, #tpu.memory_space<vmem>>, %arg8: memref<1x32xf32, #tpu.memory_space<vmem>>, %arg9: memref<1x32xf32, #tpu.memory_space<vmem>>, %arg10: memref<1x32xf32, #tpu.memory_space<vmem>>, %arg11: memref<1x8x32xf32, #tpu.memory_space<vmem>>) attributes {dimension_semantics = [#tpu.dimension_semantics<parallel>], iteration_bounds = array<i64: 2>, scalar_prefetch = 0 : i64, scratch_operands = 0 : i64, tpu.core_type = #tpu.core_type<tc>, window_params = [{transform_indices = @transform_0, window_bounds = array<i64: 1, 8, 32>}, {transform_indices = @transform_1, window_bounds = array<i64: 1, 16, 48>}, {pipeline_mode = #tpu.pipeline_mode<synchronous>, transform_indices = @transform_2, window_bounds = array<i64: 32, 32>}, {pipeline_mode = #tpu.pipeline_mode<synchronous>, transform_indices = @transform_3, window_bounds = array<i64: 1, 32>}, {pipeline_mode = #tpu.pipeline_mode<synchronous>, transform_indices = @transform_4, window_bounds = array<i64: 48, 64>}, {pipeline_mode = #tpu.pipeline_mode<synchronous>, transform_indices = @transform_5, window_bounds = array<i64: 1, 64>}, {pipeline_mode = #tpu.pipeline_mode<synchronous>, transform_indices = @transform_6, window_bounds = array<i64: 32, 32>}, {pipeline_mode = #tpu.pipeline_mode<synchronous>, transform_indices = @transform_7, window_bounds = array<i64: 1, 32>}, {pipeline_mode = #tpu.pipeline_mode<synchronous>, transform_indices = @transform_8, window_bounds = array<i64: 1, 32>}, {pipeline_mode = #tpu.pipeline_mode<synchronous>, transform_indices = @transform_9, window_bounds = array<i64: 1, 32>}, {transform_indices = @transform_10, window_bounds = array<i64: 1, 8, 32>}]} {
    %c0 = arith.constant 0 : index
    %c0_0 = arith.constant 0 : index
    %c0_1 = arith.constant 0 : index
    %0 = vector.load %arg1[%c0, %c0_0, %c0_1] : memref<1x8x32xf32, #tpu.memory_space<vmem>>, vector<1x8x32xf32>
    %1 = vector.shape_cast %0 : vector<1x8x32xf32> to vector<8x32xf32>
    %c0_2 = arith.constant 0 : index
    %c0_3 = arith.constant 0 : index
    %c0_4 = arith.constant 0 : index
    %2 = vector.load %arg2[%c0_2, %c0_3, %c0_4] : memref<1x16x48xf32, #tpu.memory_space<vmem>>, vector<1x16x48xf32>
    %3 = vector.shape_cast %2 : vector<1x16x48xf32> to vector<16x48xf32>
    %4 = arith.truncf %1 : vector<8x32xf32> to vector<8x32xbf16>
    %c0_5 = arith.constant 0 : index
    %c0_6 = arith.constant 0 : index
    %5 = vector.load %arg3[%c0_5, %c0_6] : memref<32x32xbf16, #tpu.memory_space<vmem>>, vector<32x32xbf16>
    %cst = arith.constant dense<0.000000e+00> : vector<8x32xf32>
    %6 = tpu.matmul %4, %5, %cst {dimension_numbers = #tpu.dot_dimension_numbers<[1], [0], [0], [1], [0, 0, 1, 1], [], []>} : vector<8x32xbf16>, vector<32x32xbf16>, vector<8x32xf32> -> vector<8x32xf32>
    %c0_7 = arith.constant 0 : index
    %c0_8 = arith.constant 0 : index
    %7 = vector.load %arg4[%c0_7, %c0_8] : memref<1x32xf32, #tpu.memory_space<vmem>>, vector<1x32xf32>
    %8 = vector.broadcast %7 : vector<1x32xf32> to vector<8x32xf32>
    %9 = arith.addf %6, %8 : vector<8x32xf32>
    %10 = arith.truncf %3 : vector<16x48xf32> to vector<16x48xbf16>
    %c0_9 = arith.constant 0 : index
    %c0_10 = arith.constant 0 : index
    %11 = vector.load %arg5[%c0_9, %c0_10] : memref<48x64xbf16, #tpu.memory_space<vmem>>, vector<48x64xbf16>
    %cst_11 = arith.constant dense<0.000000e+00> : vector<16x64xf32>
    %12 = tpu.matmul %10, %11, %cst_11 {dimension_numbers = #tpu.dot_dimension_numbers<[1], [0], [0], [1], [0, 0, 1, 1], [], []>} : vector<16x48xbf16>, vector<48x64xbf16>, vector<16x64xf32> -> vector<16x64xf32>
    %c0_12 = arith.constant 0 : index
    %c0_13 = arith.constant 0 : index
    %13 = vector.load %arg6[%c0_12, %c0_13] : memref<1x64xf32, #tpu.memory_space<vmem>>, vector<1x64xf32>
    %14 = vector.broadcast %13 : vector<1x64xf32> to vector<16x64xf32>
    %15 = arith.addf %12, %14 : vector<16x64xf32>
    %16 = vector.extract_strided_slice %15 {offsets = [0, 0], sizes = [16, 32], strides = [1, 1]} : vector<16x64xf32> to vector<16x32xf32>
    %17 = vector.extract_strided_slice %15 {offsets = [0, 32], sizes = [16, 32], strides = [1, 1]} : vector<16x64xf32> to vector<16x32xf32>
    %cst_14 = arith.constant 0.000000e+00 : f32
    %18 = vector.broadcast %cst_14 : f32 to vector<8x32xf32>
    %19 = vector.extract_strided_slice %9 {offsets = [0, 0], sizes = [8, 16], strides = [1, 1]} : vector<8x32xf32> to vector<8x16xf32>
    %20 = arith.truncf %19 : vector<8x16xf32> to vector<8x16xbf16>
    %21 = vector.extract_strided_slice %16 {offsets = [0, 0], sizes = [16, 16], strides = [1, 1]} : vector<16x32xf32> to vector<16x16xf32>
    %22 = arith.truncf %21 : vector<16x16xf32> to vector<16x16xbf16>
    %23 = vector.extract_strided_slice %17 {offsets = [0, 0], sizes = [16, 16], strides = [1, 1]} : vector<16x32xf32> to vector<16x16xf32>
    %24 = arith.truncf %23 : vector<16x16xf32> to vector<16x16xbf16>
    %cst_15 = arith.constant dense<0.000000e+00> : vector<8x16xf32>
    %25 = tpu.matmul %20, %22, %cst_15 {dimension_numbers = #tpu.dot_dimension_numbers<[1], [1], [0], [0], [0, 0, 1, 0], [], []>} : vector<8x16xbf16>, vector<16x16xbf16>, vector<8x16xf32> -> vector<8x16xf32>
    %cst_16 = arith.constant 2.500000e-01 : f32
    %26 = vector.broadcast %cst_16 : f32 to vector<8x16xf32>
    %27 = arith.mulf %25, %26 : vector<8x16xf32>
    %cst_17 = arith.constant dense<0xFF800000> : vector<8xf32>
    %28 = vector.multi_reduction <maximumf>, %27, %cst_17 [1] : vector<8x16xf32> to vector<8xf32>
    %29 = vector.shape_cast %28 : vector<8xf32> to vector<8x1xf32>
    %30 = vector.broadcast %29 : vector<8x1xf32> to vector<8x16xf32>
    %31 = arith.subf %27, %30 : vector<8x16xf32>
    %32 = math.exp %31 : vector<8x16xf32>
    %cst_18 = arith.constant dense<0.000000e+00> : vector<8xf32>
    %33 = vector.multi_reduction <add>, %32, %cst_18 [1] : vector<8x16xf32> to vector<8xf32>
    %34 = vector.shape_cast %33 : vector<8xf32> to vector<8x1xf32>
    %35 = tpu.reciprocal %34 {approx = true} : vector<8x1xf32> -> vector<8x1xf32>
    %36 = vector.broadcast %35 : vector<8x1xf32> to vector<8x16xf32>
    %37 = arith.mulf %32, %36 : vector<8x16xf32>
    %38 = arith.truncf %37 : vector<8x16xf32> to vector<8x16xbf16>
    %cst_19 = arith.constant dense<0.000000e+00> : vector<8x16xf32>
    %39 = tpu.matmul %38, %24, %cst_19 {dimension_numbers = #tpu.dot_dimension_numbers<[1], [0], [0], [1], [0, 0, 1, 1], [], []>} : vector<8x16xbf16>, vector<16x16xbf16>, vector<8x16xf32> -> vector<8x16xf32>
    %40 = arith.truncf %39 : vector<8x16xf32> to vector<8x16xbf16>
    %c0_20 = arith.constant 0 : index
    %c0_21 = arith.constant 0 : index
    %41 = vector.load %arg7[%c0_20, %c0_21] : memref<32x32xbf16, #tpu.memory_space<vmem>>, vector<16x32xbf16>
    %cst_22 = arith.constant dense<0.000000e+00> : vector<8x32xf32>
    %42 = tpu.matmul %40, %41, %cst_22 {dimension_numbers = #tpu.dot_dimension_numbers<[1], [0], [0], [1], [0, 0, 1, 1], [], []>} : vector<8x16xbf16>, vector<16x32xbf16>, vector<8x32xf32> -> vector<8x32xf32>
    %43 = arith.addf %18, %42 : vector<8x32xf32>
    %44 = vector.extract_strided_slice %9 {offsets = [0, 16], sizes = [8, 16], strides = [1, 1]} : vector<8x32xf32> to vector<8x16xf32>
    %45 = arith.truncf %44 : vector<8x16xf32> to vector<8x16xbf16>
    %46 = vector.extract_strided_slice %16 {offsets = [0, 16], sizes = [16, 16], strides = [1, 1]} : vector<16x32xf32> to vector<16x16xf32>
    %47 = arith.truncf %46 : vector<16x16xf32> to vector<16x16xbf16>
    %48 = vector.extract_strided_slice %17 {offsets = [0, 16], sizes = [16, 16], strides = [1, 1]} : vector<16x32xf32> to vector<16x16xf32>
    %49 = arith.truncf %48 : vector<16x16xf32> to vector<16x16xbf16>
    %cst_23 = arith.constant dense<0.000000e+00> : vector<8x16xf32>
    %50 = tpu.matmul %45, %47, %cst_23 {dimension_numbers = #tpu.dot_dimension_numbers<[1], [1], [0], [0], [0, 0, 1, 0], [], []>} : vector<8x16xbf16>, vector<16x16xbf16>, vector<8x16xf32> -> vector<8x16xf32>
    %cst_24 = arith.constant 2.500000e-01 : f32
    %51 = vector.broadcast %cst_24 : f32 to vector<8x16xf32>
    %52 = arith.mulf %50, %51 : vector<8x16xf32>
    %cst_25 = arith.constant dense<0xFF800000> : vector<8xf32>
    %53 = vector.multi_reduction <maximumf>, %52, %cst_25 [1] : vector<8x16xf32> to vector<8xf32>
    %54 = vector.shape_cast %53 : vector<8xf32> to vector<8x1xf32>
    %55 = vector.broadcast %54 : vector<8x1xf32> to vector<8x16xf32>
    %56 = arith.subf %52, %55 : vector<8x16xf32>
    %57 = math.exp %56 : vector<8x16xf32>
    %cst_26 = arith.constant dense<0.000000e+00> : vector<8xf32>
    %58 = vector.multi_reduction <add>, %57, %cst_26 [1] : vector<8x16xf32> to vector<8xf32>
    %59 = vector.shape_cast %58 : vector<8xf32> to vector<8x1xf32>
    %60 = tpu.reciprocal %59 {approx = true} : vector<8x1xf32> -> vector<8x1xf32>
    %61 = vector.broadcast %60 : vector<8x1xf32> to vector<8x16xf32>
    %62 = arith.mulf %57, %61 : vector<8x16xf32>
    %63 = arith.truncf %62 : vector<8x16xf32> to vector<8x16xbf16>
    %cst_27 = arith.constant dense<0.000000e+00> : vector<8x16xf32>
    %64 = tpu.matmul %63, %49, %cst_27 {dimension_numbers = #tpu.dot_dimension_numbers<[1], [0], [0], [1], [0, 0, 1, 1], [], []>} : vector<8x16xbf16>, vector<16x16xbf16>, vector<8x16xf32> -> vector<8x16xf32>
    %65 = arith.truncf %64 : vector<8x16xf32> to vector<8x16xbf16>
    %c16 = arith.constant 16 : index
    %c0_28 = arith.constant 0 : index
    %66 = vector.load %arg7[%c16, %c0_28] : memref<32x32xbf16, #tpu.memory_space<vmem>>, vector<16x32xbf16>
    %cst_29 = arith.constant dense<0.000000e+00> : vector<8x32xf32>
    %67 = tpu.matmul %65, %66, %cst_29 {dimension_numbers = #tpu.dot_dimension_numbers<[1], [0], [0], [1], [0, 0, 1, 1], [], []>} : vector<8x16xbf16>, vector<16x32xbf16>, vector<8x32xf32> -> vector<8x32xf32>
    %68 = arith.addf %43, %67 : vector<8x32xf32>
    %c0_30 = arith.constant 0 : index
    %c0_31 = arith.constant 0 : index
    %69 = vector.load %arg8[%c0_30, %c0_31] : memref<1x32xf32, #tpu.memory_space<vmem>>, vector<1x32xf32>
    %70 = vector.broadcast %69 : vector<1x32xf32> to vector<8x32xf32>
    %71 = arith.addf %68, %70 : vector<8x32xf32>
    %72 = arith.addf %1, %71 : vector<8x32xf32>
    %c0_32 = arith.constant 0 : index
    %c0_33 = arith.constant 0 : index
    %73 = vector.load %arg9[%c0_32, %c0_33] : memref<1x32xf32, #tpu.memory_space<vmem>>, vector<1x32xf32>
    %c0_34 = arith.constant 0 : index
    %c0_35 = arith.constant 0 : index
    %74 = vector.load %arg10[%c0_34, %c0_35] : memref<1x32xf32, #tpu.memory_space<vmem>>, vector<1x32xf32>
    %cst_36 = arith.constant dense<0.000000e+00> : vector<8xf32>
    %75 = vector.multi_reduction <add>, %72, %cst_36 [1] : vector<8x32xf32> to vector<8xf32>
    %76 = vector.shape_cast %75 : vector<8xf32> to vector<8x1xf32>
    %cst_37 = arith.constant 3.200000e+01 : f32
    %77 = vector.broadcast %cst_37 : f32 to vector<8x1xf32>
    %78 = arith.divf %76, %77 : vector<8x1xf32>
    %79 = vector.broadcast %78 : vector<8x1xf32> to vector<8x32xf32>
    %80 = arith.subf %72, %79 : vector<8x32xf32>
    %81 = arith.mulf %80, %80 : vector<8x32xf32>
    %cst_38 = arith.constant dense<0.000000e+00> : vector<8xf32>
    %82 = vector.multi_reduction <add>, %81, %cst_38 [1] : vector<8x32xf32> to vector<8xf32>
    %83 = vector.shape_cast %82 : vector<8xf32> to vector<8x1xf32>
    %cst_39 = arith.constant 3.200000e+01 : f32
    %84 = vector.broadcast %cst_39 : f32 to vector<8x1xf32>
    %85 = arith.divf %83, %84 : vector<8x1xf32>
    %cst_40 = arith.constant 9.99999974E-6 : f32
    %86 = vector.broadcast %cst_40 : f32 to vector<8x1xf32>
    %87 = arith.addf %85, %86 : vector<8x1xf32>
    %88 = math.rsqrt %87 : vector<8x1xf32>
    %89 = vector.broadcast %88 : vector<8x1xf32> to vector<8x32xf32>
    %90 = arith.mulf %80, %89 : vector<8x32xf32>
    %91 = vector.broadcast %73 : vector<1x32xf32> to vector<8x32xf32>
    %92 = arith.mulf %90, %91 : vector<8x32xf32>
    %93 = vector.broadcast %74 : vector<1x32xf32> to vector<8x32xf32>
    %94 = arith.addf %92, %93 : vector<8x32xf32>
    %c0_41 = arith.constant 0 : index
    %c0_42 = arith.constant 0 : index
    %c0_43 = arith.constant 0 : index
    %95 = vector.load %arg11[%c0_41, %c0_42, %c0_43] : memref<1x8x32xf32, #tpu.memory_space<vmem>>, vector<1x8x32xf32>
    %96 = vector.shape_cast %95 : vector<1x8x32xf32> to vector<8x32xf32>
    %97 = vector.shape_cast %94 : vector<8x32xf32> to vector<1x8x32xf32>
    tpu.vector_store %arg11[%c0_41, %c0_42, %c0_43], %97 {strides = array<i32>} : memref<1x8x32xf32, #tpu.memory_space<vmem>>, vector<1x8x32xf32>,
    return
  }
  func.func @transform_0(%arg0: i32) -> (i32, i32, i32) {
    %c0_i32 = arith.constant 0 : i32
    %c0_i32_0 = arith.constant 0 : i32
    %c0_i32_1 = arith.constant 0 : i32
    return %arg0, %c0_i32, %c0_i32_0 : i32, i32, i32
  }
  func.func @transform_1(%arg0: i32) -> (i32, i32, i32) {
    %c0_i32 = arith.constant 0 : i32
    %c0_i32_0 = arith.constant 0 : i32
    %c0_i32_1 = arith.constant 0 : i32
    return %arg0, %c0_i32, %c0_i32_0 : i32, i32, i32
  }
  func.func @transform_2(%arg0: i32) -> (i32, i32) {
    %c0_i32 = arith.constant 0 : i32
    %c0_i32_0 = arith.constant 0 : i32
    %c0_i32_1 = arith.constant 0 : i32
    return %c0_i32, %c0_i32_0 : i32, i32
  }
  func.func @transform_3(%arg0: i32) -> (i32, i32) {
    %c0_i32 = arith.constant 0 : i32
    %c0_i32_0 = arith.constant 0 : i32
    %c0_i32_1 = arith.constant 0 : i32
    return %c0_i32, %c0_i32_0 : i32, i32
  }
  func.func @transform_4(%arg0: i32) -> (i32, i32) {
    %c0_i32 = arith.constant 0 : i32
    %c0_i32_0 = arith.constant 0 : i32
    %c0_i32_1 = arith.constant 0 : i32
    return %c0_i32, %c0_i32_0 : i32, i32
  }
  func.func @transform_5(%arg0: i32) -> (i32, i32) {
    %c0_i32 = arith.constant 0 : i32
    %c0_i32_0 = arith.constant 0 : i32
    %c0_i32_1 = arith.constant 0 : i32
    return %c0_i32, %c0_i32_0 : i32, i32
  }
  func.func @transform_6(%arg0: i32) -> (i32, i32) {
    %c0_i32 = arith.constant 0 : i32
    %c0_i32_0 = arith.constant 0 : i32
    %c0_i32_1 = arith.constant 0 : i32
    return %c0_i32, %c0_i32_0 : i32, i32
  }
  func.func @transform_7(%arg0: i32) -> (i32, i32) {
    %c0_i32 = arith.constant 0 : i32
    %c0_i32_0 = arith.constant 0 : i32
    %c0_i32_1 = arith.constant 0 : i32
    return %c0_i32, %c0_i32_0 : i32, i32
  }
  func.func @transform_8(%arg0: i32) -> (i32, i32) {
    %c0_i32 = arith.constant 0 : i32
    %c0_i32_0 = arith.constant 0 : i32
    %c0_i32_1 = arith.constant 0 : i32
    return %c0_i32, %c0_i32_0 : i32, i32
  }
  func.func @transform_9(%arg0: i32) -> (i32, i32) {
    %c0_i32 = arith.constant 0 : i32
    %c0_i32_0 = arith.constant 0 : i32
    %c0_i32_1 = arith.constant 0 : i32
    return %c0_i32, %c0_i32_0 : i32, i32
  }
  func.func @transform_10(%arg0: i32) -> (i32, i32, i32) {
    %c0_i32 = arith.constant 0 : i32
    %c0_i32_0 = arith.constant 0 : i32
    %c0_i32_1 = arith.constant 0 : i32
    return %arg0, %c0_i32, %c0_i32_0 : i32, i32, i32
  }
}

module attributes {stable_mosaic.version = 11 : i64} {
  func.func @_ffn_block_kernel(%arg0: i32, %arg1: memref<1x8x32xf32, #tpu.memory_space<vmem>>, %arg2: memref<32x64xbf16, #tpu.memory_space<vmem>>, %arg3: memref<1x64xf32, #tpu.memory_space<vmem>>, %arg4: memref<64x32xbf16, #tpu.memory_space<vmem>>, %arg5: memref<1x32xf32, #tpu.memory_space<vmem>>, %arg6: memref<1x32xf32, #tpu.memory_space<vmem>>, %arg7: memref<1x32xf32, #tpu.memory_space<vmem>>, %arg8: memref<1x8x32xf32, #tpu.memory_space<vmem>>) attributes {dimension_semantics = [#tpu.dimension_semantics<parallel>], iteration_bounds = array<i64: 2>, scalar_prefetch = 0 : i64, scratch_operands = 0 : i64, tpu.core_type = #tpu.core_type<tc>, window_params = [{transform_indices = @transform_0, window_bounds = array<i64: 1, 8, 32>}, {pipeline_mode = #tpu.pipeline_mode<synchronous>, transform_indices = @transform_1, window_bounds = array<i64: 32, 64>}, {pipeline_mode = #tpu.pipeline_mode<synchronous>, transform_indices = @transform_2, window_bounds = array<i64: 1, 64>}, {pipeline_mode = #tpu.pipeline_mode<synchronous>, transform_indices = @transform_3, window_bounds = array<i64: 64, 32>}, {pipeline_mode = #tpu.pipeline_mode<synchronous>, transform_indices = @transform_4, window_bounds = array<i64: 1, 32>}, {pipeline_mode = #tpu.pipeline_mode<synchronous>, transform_indices = @transform_5, window_bounds = array<i64: 1, 32>}, {pipeline_mode = #tpu.pipeline_mode<synchronous>, transform_indices = @transform_6, window_bounds = array<i64: 1, 32>}, {transform_indices = @transform_7, window_bounds = array<i64: 1, 8, 32>}]} {
    %c0 = arith.constant 0 : index
    %c0_0 = arith.constant 0 : index
    %c0_1 = arith.constant 0 : index
    %0 = vector.load %arg1[%c0, %c0_0, %c0_1] : memref<1x8x32xf32, #tpu.memory_space<vmem>>, vector<1x8x32xf32>
    %1 = vector.shape_cast %0 : vector<1x8x32xf32> to vector<8x32xf32>
    %2 = arith.truncf %1 : vector<8x32xf32> to vector<8x32xbf16>
    %c0_2 = arith.constant 0 : index
    %c0_3 = arith.constant 0 : index
    %3 = vector.load %arg2[%c0_2, %c0_3] : memref<32x64xbf16, #tpu.memory_space<vmem>>, vector<32x64xbf16>
    %cst = arith.constant dense<0.000000e+00> : vector<8x64xf32>
    %4 = tpu.matmul %2, %3, %cst {dimension_numbers = #tpu.dot_dimension_numbers<[1], [0], [0], [1], [0, 0, 1, 1], [], []>} : vector<8x32xbf16>, vector<32x64xbf16>, vector<8x64xf32> -> vector<8x64xf32>
    %c0_4 = arith.constant 0 : index
    %c0_5 = arith.constant 0 : index
    %5 = vector.load %arg3[%c0_4, %c0_5] : memref<1x64xf32, #tpu.memory_space<vmem>>, vector<1x64xf32>
    %6 = vector.broadcast %5 : vector<1x64xf32> to vector<8x64xf32>
    %7 = arith.addf %4, %6 : vector<8x64xf32>
    %cst_6 = arith.constant 0.000000e+00 : f32
    %8 = vector.broadcast %cst_6 : f32 to vector<8x64xf32>
    %9 = arith.maximumf %7, %8 : vector<8x64xf32>
    %10 = arith.truncf %9 : vector<8x64xf32> to vector<8x64xbf16>
    %c0_7 = arith.constant 0 : index
    %c0_8 = arith.constant 0 : index
    %11 = vector.load %arg4[%c0_7, %c0_8] : memref<64x32xbf16, #tpu.memory_space<vmem>>, vector<64x32xbf16>
    %cst_9 = arith.constant dense<0.000000e+00> : vector<8x32xf32>
    %12 = tpu.matmul %10, %11, %cst_9 {dimension_numbers = #tpu.dot_dimension_numbers<[1], [0], [0], [1], [0, 0, 1, 1], [], []>} : vector<8x64xbf16>, vector<64x32xbf16>, vector<8x32xf32> -> vector<8x32xf32>
    %c0_10 = arith.constant 0 : index
    %c0_11 = arith.constant 0 : index
    %13 = vector.load %arg5[%c0_10, %c0_11] : memref<1x32xf32, #tpu.memory_space<vmem>>, vector<1x32xf32>
    %14 = vector.broadcast %13 : vector<1x32xf32> to vector<8x32xf32>
    %15 = arith.addf %12, %14 : vector<8x32xf32>
    %16 = arith.addf %1, %15 : vector<8x32xf32>
    %c0_12 = arith.constant 0 : index
    %c0_13 = arith.constant 0 : index
    %17 = vector.load %arg6[%c0_12, %c0_13] : memref<1x32xf32, #tpu.memory_space<vmem>>, vector<1x32xf32>
    %c0_14 = arith.constant 0 : index
    %c0_15 = arith.constant 0 : index
    %18 = vector.load %arg7[%c0_14, %c0_15] : memref<1x32xf32, #tpu.memory_space<vmem>>, vector<1x32xf32>
    %cst_16 = arith.constant dense<0.000000e+00> : vector<8xf32>
    %19 = vector.multi_reduction <add>, %16, %cst_16 [1] : vector<8x32xf32> to vector<8xf32>
    %20 = vector.shape_cast %19 : vector<8xf32> to vector<8x1xf32>
    %cst_17 = arith.constant 3.200000e+01 : f32
    %21 = vector.broadcast %cst_17 : f32 to vector<8x1xf32>
    %22 = arith.divf %20, %21 : vector<8x1xf32>
    %23 = vector.broadcast %22 : vector<8x1xf32> to vector<8x32xf32>
    %24 = arith.subf %16, %23 : vector<8x32xf32>
    %25 = arith.mulf %24, %24 : vector<8x32xf32>
    %cst_18 = arith.constant dense<0.000000e+00> : vector<8xf32>
    %26 = vector.multi_reduction <add>, %25, %cst_18 [1] : vector<8x32xf32> to vector<8xf32>
    %27 = vector.shape_cast %26 : vector<8xf32> to vector<8x1xf32>
    %cst_19 = arith.constant 3.200000e+01 : f32
    %28 = vector.broadcast %cst_19 : f32 to vector<8x1xf32>
    %29 = arith.divf %27, %28 : vector<8x1xf32>
    %cst_20 = arith.constant 9.99999974E-6 : f32
    %30 = vector.broadcast %cst_20 : f32 to vector<8x1xf32>
    %31 = arith.addf %29, %30 : vector<8x1xf32>
    %32 = math.rsqrt %31 : vector<8x1xf32>
    %33 = vector.broadcast %32 : vector<8x1xf32> to vector<8x32xf32>
    %34 = arith.mulf %24, %33 : vector<8x32xf32>
    %35 = vector.broadcast %17 : vector<1x32xf32> to vector<8x32xf32>
    %36 = arith.mulf %34, %35 : vector<8x32xf32>
    %37 = vector.broadcast %18 : vector<1x32xf32> to vector<8x32xf32>
    %38 = arith.addf %36, %37 : vector<8x32xf32>
    %c0_21 = arith.constant 0 : index
    %c0_22 = arith.constant 0 : index
    %c0_23 = arith.constant 0 : index
    %39 = vector.load %arg8[%c0_21, %c0_22, %c0_23] : memref<1x8x32xf32, #tpu.memory_space<vmem>>, vector<1x8x32xf32>
    %40 = vector.shape_cast %39 : vector<1x8x32xf32> to vector<8x32xf32>
    %41 = vector.shape_cast %38 : vector<8x32xf32> to vector<1x8x32xf32>
    tpu.vector_store %arg8[%c0_21, %c0_22, %c0_23], %41 {strides = array<i32>} : memref<1x8x32xf32, #tpu.memory_space<vmem>>, vector<1x8x32xf32>,
    return
  }
  func.func @transform_0(%arg0: i32) -> (i32, i32, i32) {
    %c0_i32 = arith.constant 0 : i32
    %c0_i32_0 = arith.constant 0 : i32
    %c0_i32_1 = arith.constant 0 : i32
    return %arg0, %c0_i32, %c0_i32_0 : i32, i32, i32
  }
  func.func @transform_1(%arg0: i32) -> (i32, i32) {
    %c0_i32 = arith.constant 0 : i32
    %c0_i32_0 = arith.constant 0 : i32
    %c0_i32_1 = arith.constant 0 : i32
    return %c0_i32, %c0_i32_0 : i32, i32
  }
  func.func @transform_2(%arg0: i32) -> (i32, i32) {
    %c0_i32 = arith.constant 0 : i32
    %c0_i32_0 = arith.constant 0 : i32
    %c0_i32_1 = arith.constant 0 : i32
    return %c0_i32, %c0_i32_0 : i32, i32
  }
  func.func @transform_3(%arg0: i32) -> (i32, i32) {
    %c0_i32 = arith.constant 0 : i32
    %c0_i32_0 = arith.constant 0 : i32
    %c0_i32_1 = arith.constant 0 : i32
    return %c0_i32, %c0_i32_0 : i32, i32
  }
  func.func @transform_4(%arg0: i32) -> (i32, i32) {
    %c0_i32 = arith.constant 0 : i32
    %c0_i32_0 = arith.constant 0 : i32
    %c0_i32_1 = arith.constant 0 : i32
    return %c0_i32, %c0_i32_0 : i32, i32
  }
  func.func @transform_5(%arg0: i32) -> (i32, i32) {
    %c0_i32 = arith.constant 0 : i32
    %c0_i32_0 = arith.constant 0 : i32
    %c0_i32_1 = arith.constant 0 : i32
    return %c0_i32, %c0_i32_0 : i32, i32
  }
  func.func @transform_6(%arg0: i32) -> (i32, i32) {
    %c0_i32 = arith.constant 0 : i32
    %c0_i32_0 = arith.constant 0 : i32
    %c0_i32_1 = arith.constant 0 : i32
    return %c0_i32, %c0_i32_0 : i32, i32
  }
  func.func @transform_7(%arg0: i32) -> (i32, i32, i32) {
    %c0_i32 = arith.constant 0 : i32
    %c0_i32_0 = arith.constant 0 : i32
    %c0_i32_1 = arith.constant 0 : i32
    return %arg0, %c0_i32, %c0_i32_0 : i32, i32, i32
  }
}

module attributes {stable_mosaic.version = 11 : i64} {
  func.func @_masked_mha_block_kernel(%arg0: i32, %arg1: memref<1x8x32xf32, #tpu.memory_space<vmem>>, %arg2: memref<32x96xbf16, #tpu.memory_space<vmem>>, %arg3: memref<1x96xf32, #tpu.memory_space<vmem>>, %arg4: memref<32x32xbf16, #tpu.memory_space<vmem>>, %arg5: memref<1x32xf32, #tpu.memory_space<vmem>>, %arg6: memref<1x32xf32, #tpu.memory_space<vmem>>, %arg7: memref<1x32xf32, #tpu.memory_space<vmem>>, %arg8: memref<1x8x32xf32, #tpu.memory_space<vmem>>) attributes {dimension_semantics = [#tpu.dimension_semantics<parallel>], iteration_bounds = array<i64: 2>, scalar_prefetch = 0 : i64, scratch_operands = 0 : i64, tpu.core_type = #tpu.core_type<tc>, window_params = [{transform_indices = @transform_0, window_bounds = array<i64: 1, 8, 32>}, {pipeline_mode = #tpu.pipeline_mode<synchronous>, transform_indices = @transform_1, window_bounds = array<i64: 32, 96>}, {pipeline_mode = #tpu.pipeline_mode<synchronous>, transform_indices = @transform_2, window_bounds = array<i64: 1, 96>}, {pipeline_mode = #tpu.pipeline_mode<synchronous>, transform_indices = @transform_3, window_bounds = array<i64: 32, 32>}, {pipeline_mode = #tpu.pipeline_mode<synchronous>, transform_indices = @transform_4, window_bounds = array<i64: 1, 32>}, {pipeline_mode = #tpu.pipeline_mode<synchronous>, transform_indices = @transform_5, window_bounds = array<i64: 1, 32>}, {pipeline_mode = #tpu.pipeline_mode<synchronous>, transform_indices = @transform_6, window_bounds = array<i64: 1, 32>}, {transform_indices = @transform_7, window_bounds = array<i64: 1, 8, 32>}]} {
    %c0 = arith.constant 0 : index
    %c0_0 = arith.constant 0 : index
    %c0_1 = arith.constant 0 : index
    %0 = vector.load %arg1[%c0, %c0_0, %c0_1] : memref<1x8x32xf32, #tpu.memory_space<vmem>>, vector<1x8x32xf32>
    %1 = vector.shape_cast %0 : vector<1x8x32xf32> to vector<8x32xf32>
    %2 = arith.truncf %1 : vector<8x32xf32> to vector<8x32xbf16>
    %c0_2 = arith.constant 0 : index
    %c0_3 = arith.constant 0 : index
    %3 = vector.load %arg2[%c0_2, %c0_3] : memref<32x96xbf16, #tpu.memory_space<vmem>>, vector<32x96xbf16>
    %cst = arith.constant dense<0.000000e+00> : vector<8x96xf32>
    %4 = tpu.matmul %2, %3, %cst {dimension_numbers = #tpu.dot_dimension_numbers<[1], [0], [0], [1], [0, 0, 1, 1], [], []>} : vector<8x32xbf16>, vector<32x96xbf16>, vector<8x96xf32> -> vector<8x96xf32>
    %c0_4 = arith.constant 0 : index
    %c0_5 = arith.constant 0 : index
    %5 = vector.load %arg3[%c0_4, %c0_5] : memref<1x96xf32, #tpu.memory_space<vmem>>, vector<1x96xf32>
    %6 = vector.broadcast %5 : vector<1x96xf32> to vector<8x96xf32>
    %7 = arith.addf %4, %6 : vector<8x96xf32>
    %8 = vector.extract_strided_slice %7 {offsets = [0, 0], sizes = [8, 32], strides = [1, 1]} : vector<8x96xf32> to vector<8x32xf32>
    %9 = vector.extract_strided_slice %7 {offsets = [0, 32], sizes = [8, 32], strides = [1, 1]} : vector<8x96xf32> to vector<8x32xf32>
    %10 = vector.extract_strided_slice %7 {offsets = [0, 64], sizes = [8, 32], strides = [1, 1]} : vector<8x96xf32> to vector<8x32xf32>
    %11 = tpu.iota {dimensions = array<i32: 0>} : vector<8x8xi32>
    %12 = tpu.iota {dimensions = array<i32: 1>} : vector<8x8xi32>
    %13 = arith.cmpi sle, %12, %11 : vector<8x8xi32>
    %cst_6 = arith.constant 0.000000e+00 : f32
    %14 = vector.broadcast %cst_6 : f32 to vector<8x32xf32>
    %15 = vector.extract_strided_slice %8 {offsets = [0, 0], sizes = [8, 16], strides = [1, 1]} : vector<8x32xf32> to vector<8x16xf32>
    %16 = arith.truncf %15 : vector<8x16xf32> to vector<8x16xbf16>
    %17 = vector.extract_strided_slice %9 {offsets = [0, 0], sizes = [8, 16], strides = [1, 1]} : vector<8x32xf32> to vector<8x16xf32>
    %18 = arith.truncf %17 : vector<8x16xf32> to vector<8x16xbf16>
    %19 = vector.extract_strided_slice %10 {offsets = [0, 0], sizes = [8, 16], strides = [1, 1]} : vector<8x32xf32> to vector<8x16xf32>
    %20 = arith.truncf %19 : vector<8x16xf32> to vector<8x16xbf16>
    %cst_7 = arith.constant dense<0.000000e+00> : vector<8x8xf32>
    %21 = tpu.matmul %16, %18, %cst_7 {dimension_numbers = #tpu.dot_dimension_numbers<[1], [1], [0], [0], [0, 0, 1, 0], [], []>} : vector<8x16xbf16>, vector<8x16xbf16>, vector<8x8xf32> -> vector<8x8xf32>
    %cst_8 = arith.constant 2.500000e-01 : f32
    %22 = vector.broadcast %cst_8 : f32 to vector<8x8xf32>
    %23 = arith.mulf %21, %22 : vector<8x8xf32>
    %cst_9 = arith.constant -1.000000e+30 : f32
    %24 = vector.broadcast %cst_9 : f32 to vector<8x8xf32>
    %25 = arith.select %13, %23, %24 : vector<8x8xi1>, vector<8x8xf32>
    %cst_10 = arith.constant dense<0xFF800000> : vector<8xf32>
    %26 = vector.multi_reduction <maximumf>, %25, %cst_10 [1] : vector<8x8xf32> to vector<8xf32>
    %27 = vector.shape_cast %26 : vector<8xf32> to vector<8x1xf32>
    %28 = vector.broadcast %27 : vector<8x1xf32> to vector<8x8xf32>
    %29 = arith.subf %25, %28 : vector<8x8xf32>
    %30 = math.exp %29 : vector<8x8xf32>
    %cst_11 = arith.constant dense<0.000000e+00> : vector<8xf32>
    %31 = vector.multi_reduction <add>, %30, %cst_11 [1] : vector<8x8xf32> to vector<8xf32>
    %32 = vector.shape_cast %31 : vector<8xf32> to vector<8x1xf32>
    %33 = tpu.reciprocal %32 {approx = true} : vector<8x1xf32> -> vector<8x1xf32>
    %34 = vector.broadcast %33 : vector<8x1xf32> to vector<8x8xf32>
    %35 = arith.mulf %30, %34 : vector<8x8xf32>
    %36 = arith.truncf %35 : vector<8x8xf32> to vector<8x8xbf16>
    %cst_12 = arith.constant dense<0.000000e+00> : vector<8x16xf32>
    %37 = tpu.matmul %36, %20, %cst_12 {dimension_numbers = #tpu.dot_dimension_numbers<[1], [0], [0], [1], [0, 0, 1, 1], [], []>} : vector<8x8xbf16>, vector<8x16xbf16>, vector<8x16xf32> -> vector<8x16xf32>
    %38 = arith.truncf %37 : vector<8x16xf32> to vector<8x16xbf16>
    %c0_13 = arith.constant 0 : index
    %c0_14 = arith.constant 0 : index
    %39 = vector.load %arg4[%c0_13, %c0_14] : memref<32x32xbf16, #tpu.memory_space<vmem>>, vector<16x32xbf16>
    %cst_15 = arith.constant dense<0.000000e+00> : vector<8x32xf32>
    %40 = tpu.matmul %38, %39, %cst_15 {dimension_numbers = #tpu.dot_dimension_numbers<[1], [0], [0], [1], [0, 0, 1, 1], [], []>} : vector<8x16xbf16>, vector<16x32xbf16>, vector<8x32xf32> -> vector<8x32xf32>
    %41 = arith.addf %14, %40 : vector<8x32xf32>
    %42 = vector.extract_strided_slice %8 {offsets = [0, 16], sizes = [8, 16], strides = [1, 1]} : vector<8x32xf32> to vector<8x16xf32>
    %43 = arith.truncf %42 : vector<8x16xf32> to vector<8x16xbf16>
    %44 = vector.extract_strided_slice %9 {offsets = [0, 16], sizes = [8, 16], strides = [1, 1]} : vector<8x32xf32> to vector<8x16xf32>
    %45 = arith.truncf %44 : vector<8x16xf32> to vector<8x16xbf16>
    %46 = vector.extract_strided_slice %10 {offsets = [0, 16], sizes = [8, 16], strides = [1, 1]} : vector<8x32xf32> to vector<8x16xf32>
    %47 = arith.truncf %46 : vector<8x16xf32> to vector<8x16xbf16>
    %cst_16 = arith.constant dense<0.000000e+00> : vector<8x8xf32>
    %48 = tpu.matmul %43, %45, %cst_16 {dimension_numbers = #tpu.dot_dimension_numbers<[1], [1], [0], [0], [0, 0, 1, 0], [], []>} : vector<8x16xbf16>, vector<8x16xbf16>, vector<8x8xf32> -> vector<8x8xf32>
    %cst_17 = arith.constant 2.500000e-01 : f32
    %49 = vector.broadcast %cst_17 : f32 to vector<8x8xf32>
    %50 = arith.mulf %48, %49 : vector<8x8xf32>
    %cst_18 = arith.constant -1.000000e+30 : f32
    %51 = vector.broadcast %cst_18 : f32 to vector<8x8xf32>
    %52 = arith.select %13, %50, %51 : vector<8x8xi1>, vector<8x8xf32>
    %cst_19 = arith.constant dense<0xFF800000> : vector<8xf32>
    %53 = vector.multi_reduction <maximumf>, %52, %cst_19 [1] : vector<8x8xf32> to vector<8xf32>
    %54 = vector.shape_cast %53 : vector<8xf32> to vector<8x1xf32>
    %55 = vector.broadcast %54 : vector<8x1xf32> to vector<8x8xf32>
    %56 = arith.subf %52, %55 : vector<8x8xf32>
    %57 = math.exp %56 : vector<8x8xf32>
    %cst_20 = arith.constant dense<0.000000e+00> : vector<8xf32>
    %58 = vector.multi_reduction <add>, %57, %cst_20 [1] : vector<8x8xf32> to vector<8xf32>
    %59 = vector.shape_cast %58 : vector<8xf32> to vector<8x1xf32>
    %60 = tpu.reciprocal %59 {approx = true} : vector<8x1xf32> -> vector<8x1xf32>
    %61 = vector.broadcast %60 : vector<8x1xf32> to vector<8x8xf32>
    %62 = arith.mulf %57, %61 : vector<8x8xf32>
    %63 = arith.truncf %62 : vector<8x8xf32> to vector<8x8xbf16>
    %cst_21 = arith.constant dense<0.000000e+00> : vector<8x16xf32>
    %64 = tpu.matmul %63, %47, %cst_21 {dimension_numbers = #tpu.dot_dimension_numbers<[1], [0], [0], [1], [0, 0, 1, 1], [], []>} : vector<8x8xbf16>, vector<8x16xbf16>, vector<8x16xf32> -> vector<8x16xf32>
    %65 = arith.truncf %64 : vector<8x16xf32> to vector<8x16xbf16>
    %c16 = arith.constant 16 : index
    %c0_22 = arith.constant 0 : index
    %66 = vector.load %arg4[%c16, %c0_22] : memref<32x32xbf16, #tpu.memory_space<vmem>>, vector<16x32xbf16>
    %cst_23 = arith.constant dense<0.000000e+00> : vector<8x32xf32>
    %67 = tpu.matmul %65, %66, %cst_23 {dimension_numbers = #tpu.dot_dimension_numbers<[1], [0], [0], [1], [0, 0, 1, 1], [], []>} : vector<8x16xbf16>, vector<16x32xbf16>, vector<8x32xf32> -> vector<8x32xf32>
    %68 = arith.addf %41, %67 : vector<8x32xf32>
    %c0_24 = arith.constant 0 : index
    %c0_25 = arith.constant 0 : index
    %69 = vector.load %arg5[%c0_24, %c0_25] : memref<1x32xf32, #tpu.memory_space<vmem>>, vector<1x32xf32>
    %70 = vector.broadcast %69 : vector<1x32xf32> to vector<8x32xf32>
    %71 = arith.addf %68, %70 : vector<8x32xf32>
    %72 = arith.addf %1, %71 : vector<8x32xf32>
    %c0_26 = arith.constant 0 : index
    %c0_27 = arith.constant 0 : index
    %73 = vector.load %arg6[%c0_26, %c0_27] : memref<1x32xf32, #tpu.memory_space<vmem>>, vector<1x32xf32>
    %c0_28 = arith.constant 0 : index
    %c0_29 = arith.constant 0 : index
    %74 = vector.load %arg7[%c0_28, %c0_29] : memref<1x32xf32, #tpu.memory_space<vmem>>, vector<1x32xf32>
    %cst_30 = arith.constant dense<0.000000e+00> : vector<8xf32>
    %75 = vector.multi_reduction <add>, %72, %cst_30 [1] : vector<8x32xf32> to vector<8xf32>
    %76 = vector.shape_cast %75 : vector<8xf32> to vector<8x1xf32>
    %cst_31 = arith.constant 3.200000e+01 : f32
    %77 = vector.broadcast %cst_31 : f32 to vector<8x1xf32>
    %78 = arith.divf %76, %77 : vector<8x1xf32>
    %79 = vector.broadcast %78 : vector<8x1xf32> to vector<8x32xf32>
    %80 = arith.subf %72, %79 : vector<8x32xf32>
    %81 = arith.mulf %80, %80 : vector<8x32xf32>
    %cst_32 = arith.constant dense<0.000000e+00> : vector<8xf32>
    %82 = vector.multi_reduction <add>, %81, %cst_32 [1] : vector<8x32xf32> to vector<8xf32>
    %83 = vector.shape_cast %82 : vector<8xf32> to vector<8x1xf32>
    %cst_33 = arith.constant 3.200000e+01 : f32
    %84 = vector.broadcast %cst_33 : f32 to vector<8x1xf32>
    %85 = arith.divf %83, %84 : vector<8x1xf32>
    %cst_34 = arith.constant 9.99999974E-6 : f32
    %86 = vector.broadcast %cst_34 : f32 to vector<8x1xf32>
    %87 = arith.addf %85, %86 : vector<8x1xf32>
    %88 = math.rsqrt %87 : vector<8x1xf32>
    %89 = vector.broadcast %88 : vector<8x1xf32> to vector<8x32xf32>
    %90 = arith.mulf %80, %89 : vector<8x32xf32>
    %91 = vector.broadcast %73 : vector<1x32xf32> to vector<8x32xf32>
    %92 = arith.mulf %90, %91 : vector<8x32xf32>
    %93 = vector.broadcast %74 : vector<1x32xf32> to vector<8x32xf32>
    %94 = arith.addf %92, %93 : vector<8x32xf32>
    %c0_35 = arith.constant 0 : index
    %c0_36 = arith.constant 0 : index
    %c0_37 = arith.constant 0 : index
    %95 = vector.load %arg8[%c0_35, %c0_36, %c0_37] : memref<1x8x32xf32, #tpu.memory_space<vmem>>, vector<1x8x32xf32>
    %96 = vector.shape_cast %95 : vector<1x8x32xf32> to vector<8x32xf32>
    %97 = vector.shape_cast %94 : vector<8x32xf32> to vector<1x8x32xf32>
    tpu.vector_store %arg8[%c0_35, %c0_36, %c0_37], %97 {strides = array<i32>} : memref<1x8x32xf32, #tpu.memory_space<vmem>>, vector<1x8x32xf32>,
    return
  }
  func.func @transform_0(%arg0: i32) -> (i32, i32, i32) {
    %c0_i32 = arith.constant 0 : i32
    %c0_i32_0 = arith.constant 0 : i32
    %c0_i32_1 = arith.constant 0 : i32
    return %arg0, %c0_i32, %c0_i32_0 : i32, i32, i32
  }
  func.func @transform_1(%arg0: i32) -> (i32, i32) {
    %c0_i32 = arith.constant 0 : i32
    %c0_i32_0 = arith.constant 0 : i32
    %c0_i32_1 = arith.constant 0 : i32
    return %c0_i32, %c0_i32_0 : i32, i32
  }
  func.func @transform_2(%arg0: i32) -> (i32, i32) {
    %c0_i32 = arith.constant 0 : i32
    %c0_i32_0 = arith.constant 0 : i32
    %c0_i32_1 = arith.constant 0 : i32
    return %c0_i32, %c0_i32_0 : i32, i32
  }
  func.func @transform_3(%arg0: i32) -> (i32, i32) {
    %c0_i32 = arith.constant 0 : i32
    %c0_i32_0 = arith.constant 0 : i32
    %c0_i32_1 = arith.constant 0 : i32
    return %c0_i32, %c0_i32_0 : i32, i32
  }
  func.func @transform_4(%arg0: i32) -> (i32, i32) {
    %c0_i32 = arith.constant 0 : i32
    %c0_i32_0 = arith.constant 0 : i32
    %c0_i32_1 = arith.constant 0 : i32
    return %c0_i32, %c0_i32_0 : i32, i32
  }
  func.func @transform_5(%arg0: i32) -> (i32, i32) {
    %c0_i32 = arith.constant 0 : i32
    %c0_i32_0 = arith.constant 0 : i32
    %c0_i32_1 = arith.constant 0 : i32
    return %c0_i32, %c0_i32_0 : i32, i32
  }
  func.func @transform_6(%arg0: i32) -> (i32, i32) {
    %c0_i32 = arith.constant 0 : i32
    %c0_i32_0 = arith.constant 0 : i32
    %c0_i32_1 = arith.constant 0 : i32
    return %c0_i32, %c0_i32_0 : i32, i32
  }
  func.func @transform_7(%arg0: i32) -> (i32, i32, i32) {
    %c0_i32 = arith.constant 0 : i32
    %c0_i32_0 = arith.constant 0 : i32
    %c0_i32_1 = arith.constant 0 : i32
    return %arg0, %c0_i32, %c0_i32_0 : i32, i32, i32
  }
}

module attributes {stable_mosaic.version = 11 : i64} {
  func.func @_masked_mha_block_kernel(%arg0: i32, %arg1: memref<1x8x32xf32, #tpu.memory_space<vmem>>, %arg2: memref<32x96xbf16, #tpu.memory_space<vmem>>, %arg3: memref<1x96xf32, #tpu.memory_space<vmem>>, %arg4: memref<32x32xbf16, #tpu.memory_space<vmem>>, %arg5: memref<1x32xf32, #tpu.memory_space<vmem>>, %arg6: memref<1x32xf32, #tpu.memory_space<vmem>>, %arg7: memref<1x32xf32, #tpu.memory_space<vmem>>, %arg8: memref<1x8x32xf32, #tpu.memory_space<vmem>>) attributes {dimension_semantics = [#tpu.dimension_semantics<parallel>], iteration_bounds = array<i64: 2>, scalar_prefetch = 0 : i64, scratch_operands = 0 : i64, tpu.core_type = #tpu.core_type<tc>, window_params = [{transform_indices = @transform_0, window_bounds = array<i64: 1, 8, 32>}, {pipeline_mode = #tpu.pipeline_mode<synchronous>, transform_indices = @transform_1, window_bounds = array<i64: 32, 96>}, {pipeline_mode = #tpu.pipeline_mode<synchronous>, transform_indices = @transform_2, window_bounds = array<i64: 1, 96>}, {pipeline_mode = #tpu.pipeline_mode<synchronous>, transform_indices = @transform_3, window_bounds = array<i64: 32, 32>}, {pipeline_mode = #tpu.pipeline_mode<synchronous>, transform_indices = @transform_4, window_bounds = array<i64: 1, 32>}, {pipeline_mode = #tpu.pipeline_mode<synchronous>, transform_indices = @transform_5, window_bounds = array<i64: 1, 32>}, {pipeline_mode = #tpu.pipeline_mode<synchronous>, transform_indices = @transform_6, window_bounds = array<i64: 1, 32>}, {transform_indices = @transform_7, window_bounds = array<i64: 1, 8, 32>}]} {
    %c0 = arith.constant 0 : index
    %c0_0 = arith.constant 0 : index
    %c0_1 = arith.constant 0 : index
    %0 = vector.load %arg1[%c0, %c0_0, %c0_1] : memref<1x8x32xf32, #tpu.memory_space<vmem>>, vector<1x8x32xf32>
    %1 = vector.shape_cast %0 : vector<1x8x32xf32> to vector<8x32xf32>
    %2 = arith.truncf %1 : vector<8x32xf32> to vector<8x32xbf16>
    %c0_2 = arith.constant 0 : index
    %c0_3 = arith.constant 0 : index
    %3 = vector.load %arg2[%c0_2, %c0_3] : memref<32x96xbf16, #tpu.memory_space<vmem>>, vector<32x96xbf16>
    %cst = arith.constant dense<0.000000e+00> : vector<8x96xf32>
    %4 = tpu.matmul %2, %3, %cst {dimension_numbers = #tpu.dot_dimension_numbers<[1], [0], [0], [1], [0, 0, 1, 1], [], []>} : vector<8x32xbf16>, vector<32x96xbf16>, vector<8x96xf32> -> vector<8x96xf32>
    %c0_4 = arith.constant 0 : index
    %c0_5 = arith.constant 0 : index
    %5 = vector.load %arg3[%c0_4, %c0_5] : memref<1x96xf32, #tpu.memory_space<vmem>>, vector<1x96xf32>
    %6 = vector.broadcast %5 : vector<1x96xf32> to vector<8x96xf32>
    %7 = arith.addf %4, %6 : vector<8x96xf32>
    %8 = vector.extract_strided_slice %7 {offsets = [0, 0], sizes = [8, 32], strides = [1, 1]} : vector<8x96xf32> to vector<8x32xf32>
    %9 = vector.extract_strided_slice %7 {offsets = [0, 32], sizes = [8, 32], strides = [1, 1]} : vector<8x96xf32> to vector<8x32xf32>
    %10 = vector.extract_strided_slice %7 {offsets = [0, 64], sizes = [8, 32], strides = [1, 1]} : vector<8x96xf32> to vector<8x32xf32>
    %11 = tpu.iota {dimensions = array<i32: 0>} : vector<8x8xi32>
    %12 = tpu.iota {dimensions = array<i32: 1>} : vector<8x8xi32>
    %13 = arith.cmpi sle, %12, %11 : vector<8x8xi32>
    %cst_6 = arith.constant 0.000000e+00 : f32
    %14 = vector.broadcast %cst_6 : f32 to vector<8x32xf32>
    %15 = vector.extract_strided_slice %8 {offsets = [0, 0], sizes = [8, 16], strides = [1, 1]} : vector<8x32xf32> to vector<8x16xf32>
    %16 = arith.truncf %15 : vector<8x16xf32> to vector<8x16xbf16>
    %17 = vector.extract_strided_slice %9 {offsets = [0, 0], sizes = [8, 16], strides = [1, 1]} : vector<8x32xf32> to vector<8x16xf32>
    %18 = arith.truncf %17 : vector<8x16xf32> to vector<8x16xbf16>
    %19 = vector.extract_strided_slice %10 {offsets = [0, 0], sizes = [8, 16], strides = [1, 1]} : vector<8x32xf32> to vector<8x16xf32>
    %20 = arith.truncf %19 : vector<8x16xf32> to vector<8x16xbf16>
    %cst_7 = arith.constant dense<0.000000e+00> : vector<8x8xf32>
    %21 = tpu.matmul %16, %18, %cst_7 {dimension_numbers = #tpu.dot_dimension_numbers<[1], [1], [0], [0], [0, 0, 1, 0], [], []>} : vector<8x16xbf16>, vector<8x16xbf16>, vector<8x8xf32> -> vector<8x8xf32>
    %cst_8 = arith.constant 2.500000e-01 : f32
    %22 = vector.broadcast %cst_8 : f32 to vector<8x8xf32>
    %23 = arith.mulf %21, %22 : vector<8x8xf32>
    %cst_9 = arith.constant -1.000000e+30 : f32
    %24 = vector.broadcast %cst_9 : f32 to vector<8x8xf32>
    %25 = arith.select %13, %23, %24 : vector<8x8xi1>, vector<8x8xf32>
    %cst_10 = arith.constant dense<0xFF800000> : vector<8xf32>
    %26 = vector.multi_reduction <maximumf>, %25, %cst_10 [1] : vector<8x8xf32> to vector<8xf32>
    %27 = vector.shape_cast %26 : vector<8xf32> to vector<8x1xf32>
    %28 = vector.broadcast %27 : vector<8x1xf32> to vector<8x8xf32>
    %29 = arith.subf %25, %28 : vector<8x8xf32>
    %30 = math.exp %29 : vector<8x8xf32>
    %cst_11 = arith.constant dense<0.000000e+00> : vector<8xf32>
    %31 = vector.multi_reduction <add>, %30, %cst_11 [1] : vector<8x8xf32> to vector<8xf32>
    %32 = vector.shape_cast %31 : vector<8xf32> to vector<8x1xf32>
    %33 = tpu.reciprocal %32 {approx = true} : vector<8x1xf32> -> vector<8x1xf32>
    %34 = vector.broadcast %33 : vector<8x1xf32> to vector<8x8xf32>
    %35 = arith.mulf %30, %34 : vector<8x8xf32>
    %36 = arith.truncf %35 : vector<8x8xf32> to vector<8x8xbf16>
    %cst_12 = arith.constant dense<0.000000e+00> : vector<8x16xf32>
    %37 = tpu.matmul %36, %20, %cst_12 {dimension_numbers = #tpu.dot_dimension_numbers<[1], [0], [0], [1], [0, 0, 1, 1], [], []>} : vector<8x8xbf16>, vector<8x16xbf16>, vector<8x16xf32> -> vector<8x16xf32>
    %38 = arith.truncf %37 : vector<8x16xf32> to vector<8x16xbf16>
    %c0_13 = arith.constant 0 : index
    %c0_14 = arith.constant 0 : index
    %39 = vector.load %arg4[%c0_13, %c0_14] : memref<32x32xbf16, #tpu.memory_space<vmem>>, vector<16x32xbf16>
    %cst_15 = arith.constant dense<0.000000e+00> : vector<8x32xf32>
    %40 = tpu.matmul %38, %39, %cst_15 {dimension_numbers = #tpu.dot_dimension_numbers<[1], [0], [0], [1], [0, 0, 1, 1], [], []>} : vector<8x16xbf16>, vector<16x32xbf16>, vector<8x32xf32> -> vector<8x32xf32>
    %41 = arith.addf %14, %40 : vector<8x32xf32>
    %42 = vector.extract_strided_slice %8 {offsets = [0, 16], sizes = [8, 16], strides = [1, 1]} : vector<8x32xf32> to vector<8x16xf32>
    %43 = arith.truncf %42 : vector<8x16xf32> to vector<8x16xbf16>
    %44 = vector.extract_strided_slice %9 {offsets = [0, 16], sizes = [8, 16], strides = [1, 1]} : vector<8x32xf32> to vector<8x16xf32>
    %45 = arith.truncf %44 : vector<8x16xf32> to vector<8x16xbf16>
    %46 = vector.extract_strided_slice %10 {offsets = [0, 16], sizes = [8, 16], strides = [1, 1]} : vector<8x32xf32> to vector<8x16xf32>
    %47 = arith.truncf %46 : vector<8x16xf32> to vector<8x16xbf16>
    %cst_16 = arith.constant dense<0.000000e+00> : vector<8x8xf32>
    %48 = tpu.matmul %43, %45, %cst_16 {dimension_numbers = #tpu.dot_dimension_numbers<[1], [1], [0], [0], [0, 0, 1, 0], [], []>} : vector<8x16xbf16>, vector<8x16xbf16>, vector<8x8xf32> -> vector<8x8xf32>
    %cst_17 = arith.constant 2.500000e-01 : f32
    %49 = vector.broadcast %cst_17 : f32 to vector<8x8xf32>
    %50 = arith.mulf %48, %49 : vector<8x8xf32>
    %cst_18 = arith.constant -1.000000e+30 : f32
    %51 = vector.broadcast %cst_18 : f32 to vector<8x8xf32>
    %52 = arith.select %13, %50, %51 : vector<8x8xi1>, vector<8x8xf32>
    %cst_19 = arith.constant dense<0xFF800000> : vector<8xf32>
    %53 = vector.multi_reduction <maximumf>, %52, %cst_19 [1] : vector<8x8xf32> to vector<8xf32>
    %54 = vector.shape_cast %53 : vector<8xf32> to vector<8x1xf32>
    %55 = vector.broadcast %54 : vector<8x1xf32> to vector<8x8xf32>
    %56 = arith.subf %52, %55 : vector<8x8xf32>
    %57 = math.exp %56 : vector<8x8xf32>
    %cst_20 = arith.constant dense<0.000000e+00> : vector<8xf32>
    %58 = vector.multi_reduction <add>, %57, %cst_20 [1] : vector<8x8xf32> to vector<8xf32>
    %59 = vector.shape_cast %58 : vector<8xf32> to vector<8x1xf32>
    %60 = tpu.reciprocal %59 {approx = true} : vector<8x1xf32> -> vector<8x1xf32>
    %61 = vector.broadcast %60 : vector<8x1xf32> to vector<8x8xf32>
    %62 = arith.mulf %57, %61 : vector<8x8xf32>
    %63 = arith.truncf %62 : vector<8x8xf32> to vector<8x8xbf16>
    %cst_21 = arith.constant dense<0.000000e+00> : vector<8x16xf32>
    %64 = tpu.matmul %63, %47, %cst_21 {dimension_numbers = #tpu.dot_dimension_numbers<[1], [0], [0], [1], [0, 0, 1, 1], [], []>} : vector<8x8xbf16>, vector<8x16xbf16>, vector<8x16xf32> -> vector<8x16xf32>
    %65 = arith.truncf %64 : vector<8x16xf32> to vector<8x16xbf16>
    %c16 = arith.constant 16 : index
    %c0_22 = arith.constant 0 : index
    %66 = vector.load %arg4[%c16, %c0_22] : memref<32x32xbf16, #tpu.memory_space<vmem>>, vector<16x32xbf16>
    %cst_23 = arith.constant dense<0.000000e+00> : vector<8x32xf32>
    %67 = tpu.matmul %65, %66, %cst_23 {dimension_numbers = #tpu.dot_dimension_numbers<[1], [0], [0], [1], [0, 0, 1, 1], [], []>} : vector<8x16xbf16>, vector<16x32xbf16>, vector<8x32xf32> -> vector<8x32xf32>
    %68 = arith.addf %41, %67 : vector<8x32xf32>
    %c0_24 = arith.constant 0 : index
    %c0_25 = arith.constant 0 : index
    %69 = vector.load %arg5[%c0_24, %c0_25] : memref<1x32xf32, #tpu.memory_space<vmem>>, vector<1x32xf32>
    %70 = vector.broadcast %69 : vector<1x32xf32> to vector<8x32xf32>
    %71 = arith.addf %68, %70 : vector<8x32xf32>
    %72 = arith.addf %1, %71 : vector<8x32xf32>
    %c0_26 = arith.constant 0 : index
    %c0_27 = arith.constant 0 : index
    %73 = vector.load %arg6[%c0_26, %c0_27] : memref<1x32xf32, #tpu.memory_space<vmem>>, vector<1x32xf32>
    %c0_28 = arith.constant 0 : index
    %c0_29 = arith.constant 0 : index
    %74 = vector.load %arg7[%c0_28, %c0_29] : memref<1x32xf32, #tpu.memory_space<vmem>>, vector<1x32xf32>
    %cst_30 = arith.constant dense<0.000000e+00> : vector<8xf32>
    %75 = vector.multi_reduction <add>, %72, %cst_30 [1] : vector<8x32xf32> to vector<8xf32>
    %76 = vector.shape_cast %75 : vector<8xf32> to vector<8x1xf32>
    %cst_31 = arith.constant 3.200000e+01 : f32
    %77 = vector.broadcast %cst_31 : f32 to vector<8x1xf32>
    %78 = arith.divf %76, %77 : vector<8x1xf32>
    %79 = vector.broadcast %78 : vector<8x1xf32> to vector<8x32xf32>
    %80 = arith.subf %72, %79 : vector<8x32xf32>
    %81 = arith.mulf %80, %80 : vector<8x32xf32>
    %cst_32 = arith.constant dense<0.000000e+00> : vector<8xf32>
    %82 = vector.multi_reduction <add>, %81, %cst_32 [1] : vector<8x32xf32> to vector<8xf32>
    %83 = vector.shape_cast %82 : vector<8xf32> to vector<8x1xf32>
    %cst_33 = arith.constant 3.200000e+01 : f32
    %84 = vector.broadcast %cst_33 : f32 to vector<8x1xf32>
    %85 = arith.divf %83, %84 : vector<8x1xf32>
    %cst_34 = arith.constant 9.99999974E-6 : f32
    %86 = vector.broadcast %cst_34 : f32 to vector<8x1xf32>
    %87 = arith.addf %85, %86 : vector<8x1xf32>
    %88 = math.rsqrt %87 : vector<8x1xf32>
    %89 = vector.broadcast %88 : vector<8x1xf32> to vector<8x32xf32>
    %90 = arith.mulf %80, %89 : vector<8x32xf32>
    %91 = vector.broadcast %73 : vector<1x32xf32> to vector<8x32xf32>
    %92 = arith.mulf %90, %91 : vector<8x32xf32>
    %93 = vector.broadcast %74 : vector<1x32xf32> to vector<8x32xf32>
    %94 = arith.addf %92, %93 : vector<8x32xf32>
    %c0_35 = arith.constant 0 : index
    %c0_36 = arith.constant 0 : index
    %c0_37 = arith.constant 0 : index
    %95 = vector.load %arg8[%c0_35, %c0_36, %c0_37] : memref<1x8x32xf32, #tpu.memory_space<vmem>>, vector<1x8x32xf32>
    %96 = vector.shape_cast %95 : vector<1x8x32xf32> to vector<8x32xf32>
    %97 = vector.shape_cast %94 : vector<8x32xf32> to vector<1x8x32xf32>
    tpu.vector_store %arg8[%c0_35, %c0_36, %c0_37], %97 {strides = array<i32>} : memref<1x8x32xf32, #tpu.memory_space<vmem>>, vector<1x8x32xf32>,
    return
  }
  func.func @transform_0(%arg0: i32) -> (i32, i32, i32) {
    %c0_i32 = arith.constant 0 : i32
    %c0_i32_0 = arith.constant 0 : i32
    %c0_i32_1 = arith.constant 0 : i32
    return %arg0, %c0_i32, %c0_i32_0 : i32, i32, i32
  }
  func.func @transform_1(%arg0: i32) -> (i32, i32) {
    %c0_i32 = arith.constant 0 : i32
    %c0_i32_0 = arith.constant 0 : i32
    %c0_i32_1 = arith.constant 0 : i32
    return %c0_i32, %c0_i32_0 : i32, i32
  }
  func.func @transform_2(%arg0: i32) -> (i32, i32) {
    %c0_i32 = arith.constant 0 : i32
    %c0_i32_0 = arith.constant 0 : i32
    %c0_i32_1 = arith.constant 0 : i32
    return %c0_i32, %c0_i32_0 : i32, i32
  }
  func.func @transform_3(%arg0: i32) -> (i32, i32) {
    %c0_i32 = arith.constant 0 : i32
    %c0_i32_0 = arith.constant 0 : i32
    %c0_i32_1 = arith.constant 0 : i32
    return %c0_i32, %c0_i32_0 : i32, i32
  }
  func.func @transform_4(%arg0: i32) -> (i32, i32) {
    %c0_i32 = arith.constant 0 : i32
    %c0_i32_0 = arith.constant 0 : i32
    %c0_i32_1 = arith.constant 0 : i32
    return %c0_i32, %c0_i32_0 : i32, i32
  }
  func.func @transform_5(%arg0: i32) -> (i32, i32) {
    %c0_i32 = arith.constant 0 : i32
    %c0_i32_0 = arith.constant 0 : i32
    %c0_i32_1 = arith.constant 0 : i32
    return %c0_i32, %c0_i32_0 : i32, i32
  }
  func.func @transform_6(%arg0: i32) -> (i32, i32) {
    %c0_i32 = arith.constant 0 : i32
    %c0_i32_0 = arith.constant 0 : i32
    %c0_i32_1 = arith.constant 0 : i32
    return %c0_i32, %c0_i32_0 : i32, i32
  }
  func.func @transform_7(%arg0: i32) -> (i32, i32, i32) {
    %c0_i32 = arith.constant 0 : i32
    %c0_i32_0 = arith.constant 0 : i32
    %c0_i32_1 = arith.constant 0 : i32
    return %arg0, %c0_i32, %c0_i32_0 : i32, i32, i32
  }
}

module attributes {stable_mosaic.version = 11 : i64} {
  func.func @_cross_mha_block_kernel(%arg0: i32, %arg1: memref<1x8x32xf32, #tpu.memory_space<vmem>>, %arg2: memref<1x16x48xf32, #tpu.memory_space<vmem>>, %arg3: memref<32x32xbf16, #tpu.memory_space<vmem>>, %arg4: memref<1x32xf32, #tpu.memory_space<vmem>>, %arg5: memref<48x64xbf16, #tpu.memory_space<vmem>>, %arg6: memref<1x64xf32, #tpu.memory_space<vmem>>, %arg7: memref<32x32xbf16, #tpu.memory_space<vmem>>, %arg8: memref<1x32xf32, #tpu.memory_space<vmem>>, %arg9: memref<1x32xf32, #tpu.memory_space<vmem>>, %arg10: memref<1x32xf32, #tpu.memory_space<vmem>>, %arg11: memref<1x8x32xf32, #tpu.memory_space<vmem>>) attributes {dimension_semantics = [#tpu.dimension_semantics<parallel>], iteration_bounds = array<i64: 2>, scalar_prefetch = 0 : i64, scratch_operands = 0 : i64, tpu.core_type = #tpu.core_type<tc>, window_params = [{transform_indices = @transform_0, window_bounds = array<i64: 1, 8, 32>}, {transform_indices = @transform_1, window_bounds = array<i64: 1, 16, 48>}, {pipeline_mode = #tpu.pipeline_mode<synchronous>, transform_indices = @transform_2, window_bounds = array<i64: 32, 32>}, {pipeline_mode = #tpu.pipeline_mode<synchronous>, transform_indices = @transform_3, window_bounds = array<i64: 1, 32>}, {pipeline_mode = #tpu.pipeline_mode<synchronous>, transform_indices = @transform_4, window_bounds = array<i64: 48, 64>}, {pipeline_mode = #tpu.pipeline_mode<synchronous>, transform_indices = @transform_5, window_bounds = array<i64: 1, 64>}, {pipeline_mode = #tpu.pipeline_mode<synchronous>, transform_indices = @transform_6, window_bounds = array<i64: 32, 32>}, {pipeline_mode = #tpu.pipeline_mode<synchronous>, transform_indices = @transform_7, window_bounds = array<i64: 1, 32>}, {pipeline_mode = #tpu.pipeline_mode<synchronous>, transform_indices = @transform_8, window_bounds = array<i64: 1, 32>}, {pipeline_mode = #tpu.pipeline_mode<synchronous>, transform_indices = @transform_9, window_bounds = array<i64: 1, 32>}, {transform_indices = @transform_10, window_bounds = array<i64: 1, 8, 32>}]} {
    %c0 = arith.constant 0 : index
    %c0_0 = arith.constant 0 : index
    %c0_1 = arith.constant 0 : index
    %0 = vector.load %arg1[%c0, %c0_0, %c0_1] : memref<1x8x32xf32, #tpu.memory_space<vmem>>, vector<1x8x32xf32>
    %1 = vector.shape_cast %0 : vector<1x8x32xf32> to vector<8x32xf32>
    %c0_2 = arith.constant 0 : index
    %c0_3 = arith.constant 0 : index
    %c0_4 = arith.constant 0 : index
    %2 = vector.load %arg2[%c0_2, %c0_3, %c0_4] : memref<1x16x48xf32, #tpu.memory_space<vmem>>, vector<1x16x48xf32>
    %3 = vector.shape_cast %2 : vector<1x16x48xf32> to vector<16x48xf32>
    %4 = arith.truncf %1 : vector<8x32xf32> to vector<8x32xbf16>
    %c0_5 = arith.constant 0 : index
    %c0_6 = arith.constant 0 : index
    %5 = vector.load %arg3[%c0_5, %c0_6] : memref<32x32xbf16, #tpu.memory_space<vmem>>, vector<32x32xbf16>
    %cst = arith.constant dense<0.000000e+00> : vector<8x32xf32>
    %6 = tpu.matmul %4, %5, %cst {dimension_numbers = #tpu.dot_dimension_numbers<[1], [0], [0], [1], [0, 0, 1, 1], [], []>} : vector<8x32xbf16>, vector<32x32xbf16>, vector<8x32xf32> -> vector<8x32xf32>
    %c0_7 = arith.constant 0 : index
    %c0_8 = arith.constant 0 : index
    %7 = vector.load %arg4[%c0_7, %c0_8] : memref<1x32xf32, #tpu.memory_space<vmem>>, vector<1x32xf32>
    %8 = vector.broadcast %7 : vector<1x32xf32> to vector<8x32xf32>
    %9 = arith.addf %6, %8 : vector<8x32xf32>
    %10 = arith.truncf %3 : vector<16x48xf32> to vector<16x48xbf16>
    %c0_9 = arith.constant 0 : index
    %c0_10 = arith.constant 0 : index
    %11 = vector.load %arg5[%c0_9, %c0_10] : memref<48x64xbf16, #tpu.memory_space<vmem>>, vector<48x64xbf16>
    %cst_11 = arith.constant dense<0.000000e+00> : vector<16x64xf32>
    %12 = tpu.matmul %10, %11, %cst_11 {dimension_numbers = #tpu.dot_dimension_numbers<[1], [0], [0], [1], [0, 0, 1, 1], [], []>} : vector<16x48xbf16>, vector<48x64xbf16>, vector<16x64xf32> -> vector<16x64xf32>
    %c0_12 = arith.constant 0 : index
    %c0_13 = arith.constant 0 : index
    %13 = vector.load %arg6[%c0_12, %c0_13] : memref<1x64xf32, #tpu.memory_space<vmem>>, vector<1x64xf32>
    %14 = vector.broadcast %13 : vector<1x64xf32> to vector<16x64xf32>
    %15 = arith.addf %12, %14 : vector<16x64xf32>
    %16 = vector.extract_strided_slice %15 {offsets = [0, 0], sizes = [16, 32], strides = [1, 1]} : vector<16x64xf32> to vector<16x32xf32>
    %17 = vector.extract_strided_slice %15 {offsets = [0, 32], sizes = [16, 32], strides = [1, 1]} : vector<16x64xf32> to vector<16x32xf32>
    %cst_14 = arith.constant 0.000000e+00 : f32
    %18 = vector.broadcast %cst_14 : f32 to vector<8x32xf32>
    %19 = vector.extract_strided_slice %9 {offsets = [0, 0], sizes = [8, 16], strides = [1, 1]} : vector<8x32xf32> to vector<8x16xf32>
    %20 = arith.truncf %19 : vector<8x16xf32> to vector<8x16xbf16>
    %21 = vector.extract_strided_slice %16 {offsets = [0, 0], sizes = [16, 16], strides = [1, 1]} : vector<16x32xf32> to vector<16x16xf32>
    %22 = arith.truncf %21 : vector<16x16xf32> to vector<16x16xbf16>
    %23 = vector.extract_strided_slice %17 {offsets = [0, 0], sizes = [16, 16], strides = [1, 1]} : vector<16x32xf32> to vector<16x16xf32>
    %24 = arith.truncf %23 : vector<16x16xf32> to vector<16x16xbf16>
    %cst_15 = arith.constant dense<0.000000e+00> : vector<8x16xf32>
    %25 = tpu.matmul %20, %22, %cst_15 {dimension_numbers = #tpu.dot_dimension_numbers<[1], [1], [0], [0], [0, 0, 1, 0], [], []>} : vector<8x16xbf16>, vector<16x16xbf16>, vector<8x16xf32> -> vector<8x16xf32>
    %cst_16 = arith.constant 2.500000e-01 : f32
    %26 = vector.broadcast %cst_16 : f32 to vector<8x16xf32>
    %27 = arith.mulf %25, %26 : vector<8x16xf32>
    %cst_17 = arith.constant dense<0xFF800000> : vector<8xf32>
    %28 = vector.multi_reduction <maximumf>, %27, %cst_17 [1] : vector<8x16xf32> to vector<8xf32>
    %29 = vector.shape_cast %28 : vector<8xf32> to vector<8x1xf32>
    %30 = vector.broadcast %29 : vector<8x1xf32> to vector<8x16xf32>
    %31 = arith.subf %27, %30 : vector<8x16xf32>
    %32 = math.exp %31 : vector<8x16xf32>
    %cst_18 = arith.constant dense<0.000000e+00> : vector<8xf32>
    %33 = vector.multi_reduction <add>, %32, %cst_18 [1] : vector<8x16xf32> to vector<8xf32>
    %34 = vector.shape_cast %33 : vector<8xf32> to vector<8x1xf32>
    %35 = tpu.reciprocal %34 {approx = true} : vector<8x1xf32> -> vector<8x1xf32>
    %36 = vector.broadcast %35 : vector<8x1xf32> to vector<8x16xf32>
    %37 = arith.mulf %32, %36 : vector<8x16xf32>
    %38 = arith.truncf %37 : vector<8x16xf32> to vector<8x16xbf16>
    %cst_19 = arith.constant dense<0.000000e+00> : vector<8x16xf32>
    %39 = tpu.matmul %38, %24, %cst_19 {dimension_numbers = #tpu.dot_dimension_numbers<[1], [0], [0], [1], [0, 0, 1, 1], [], []>} : vector<8x16xbf16>, vector<16x16xbf16>, vector<8x16xf32> -> vector<8x16xf32>
    %40 = arith.truncf %39 : vector<8x16xf32> to vector<8x16xbf16>
    %c0_20 = arith.constant 0 : index
    %c0_21 = arith.constant 0 : index
    %41 = vector.load %arg7[%c0_20, %c0_21] : memref<32x32xbf16, #tpu.memory_space<vmem>>, vector<16x32xbf16>
    %cst_22 = arith.constant dense<0.000000e+00> : vector<8x32xf32>
    %42 = tpu.matmul %40, %41, %cst_22 {dimension_numbers = #tpu.dot_dimension_numbers<[1], [0], [0], [1], [0, 0, 1, 1], [], []>} : vector<8x16xbf16>, vector<16x32xbf16>, vector<8x32xf32> -> vector<8x32xf32>
    %43 = arith.addf %18, %42 : vector<8x32xf32>
    %44 = vector.extract_strided_slice %9 {offsets = [0, 16], sizes = [8, 16], strides = [1, 1]} : vector<8x32xf32> to vector<8x16xf32>
    %45 = arith.truncf %44 : vector<8x16xf32> to vector<8x16xbf16>
    %46 = vector.extract_strided_slice %16 {offsets = [0, 16], sizes = [16, 16], strides = [1, 1]} : vector<16x32xf32> to vector<16x16xf32>
    %47 = arith.truncf %46 : vector<16x16xf32> to vector<16x16xbf16>
    %48 = vector.extract_strided_slice %17 {offsets = [0, 16], sizes = [16, 16], strides = [1, 1]} : vector<16x32xf32> to vector<16x16xf32>
    %49 = arith.truncf %48 : vector<16x16xf32> to vector<16x16xbf16>
    %cst_23 = arith.constant dense<0.000000e+00> : vector<8x16xf32>
    %50 = tpu.matmul %45, %47, %cst_23 {dimension_numbers = #tpu.dot_dimension_numbers<[1], [1], [0], [0], [0, 0, 1, 0], [], []>} : vector<8x16xbf16>, vector<16x16xbf16>, vector<8x16xf32> -> vector<8x16xf32>
    %cst_24 = arith.constant 2.500000e-01 : f32
    %51 = vector.broadcast %cst_24 : f32 to vector<8x16xf32>
    %52 = arith.mulf %50, %51 : vector<8x16xf32>
    %cst_25 = arith.constant dense<0xFF800000> : vector<8xf32>
    %53 = vector.multi_reduction <maximumf>, %52, %cst_25 [1] : vector<8x16xf32> to vector<8xf32>
    %54 = vector.shape_cast %53 : vector<8xf32> to vector<8x1xf32>
    %55 = vector.broadcast %54 : vector<8x1xf32> to vector<8x16xf32>
    %56 = arith.subf %52, %55 : vector<8x16xf32>
    %57 = math.exp %56 : vector<8x16xf32>
    %cst_26 = arith.constant dense<0.000000e+00> : vector<8xf32>
    %58 = vector.multi_reduction <add>, %57, %cst_26 [1] : vector<8x16xf32> to vector<8xf32>
    %59 = vector.shape_cast %58 : vector<8xf32> to vector<8x1xf32>
    %60 = tpu.reciprocal %59 {approx = true} : vector<8x1xf32> -> vector<8x1xf32>
    %61 = vector.broadcast %60 : vector<8x1xf32> to vector<8x16xf32>
    %62 = arith.mulf %57, %61 : vector<8x16xf32>
    %63 = arith.truncf %62 : vector<8x16xf32> to vector<8x16xbf16>
    %cst_27 = arith.constant dense<0.000000e+00> : vector<8x16xf32>
    %64 = tpu.matmul %63, %49, %cst_27 {dimension_numbers = #tpu.dot_dimension_numbers<[1], [0], [0], [1], [0, 0, 1, 1], [], []>} : vector<8x16xbf16>, vector<16x16xbf16>, vector<8x16xf32> -> vector<8x16xf32>
    %65 = arith.truncf %64 : vector<8x16xf32> to vector<8x16xbf16>
    %c16 = arith.constant 16 : index
    %c0_28 = arith.constant 0 : index
    %66 = vector.load %arg7[%c16, %c0_28] : memref<32x32xbf16, #tpu.memory_space<vmem>>, vector<16x32xbf16>
    %cst_29 = arith.constant dense<0.000000e+00> : vector<8x32xf32>
    %67 = tpu.matmul %65, %66, %cst_29 {dimension_numbers = #tpu.dot_dimension_numbers<[1], [0], [0], [1], [0, 0, 1, 1], [], []>} : vector<8x16xbf16>, vector<16x32xbf16>, vector<8x32xf32> -> vector<8x32xf32>
    %68 = arith.addf %43, %67 : vector<8x32xf32>
    %c0_30 = arith.constant 0 : index
    %c0_31 = arith.constant 0 : index
    %69 = vector.load %arg8[%c0_30, %c0_31] : memref<1x32xf32, #tpu.memory_space<vmem>>, vector<1x32xf32>
    %70 = vector.broadcast %69 : vector<1x32xf32> to vector<8x32xf32>
    %71 = arith.addf %68, %70 : vector<8x32xf32>
    %72 = arith.addf %1, %71 : vector<8x32xf32>
    %c0_32 = arith.constant 0 : index
    %c0_33 = arith.constant 0 : index
    %73 = vector.load %arg9[%c0_32, %c0_33] : memref<1x32xf32, #tpu.memory_space<vmem>>, vector<1x32xf32>
    %c0_34 = arith.constant 0 : index
    %c0_35 = arith.constant 0 : index
    %74 = vector.load %arg10[%c0_34, %c0_35] : memref<1x32xf32, #tpu.memory_space<vmem>>, vector<1x32xf32>
    %cst_36 = arith.constant dense<0.000000e+00> : vector<8xf32>
    %75 = vector.multi_reduction <add>, %72, %cst_36 [1] : vector<8x32xf32> to vector<8xf32>
    %76 = vector.shape_cast %75 : vector<8xf32> to vector<8x1xf32>
    %cst_37 = arith.constant 3.200000e+01 : f32
    %77 = vector.broadcast %cst_37 : f32 to vector<8x1xf32>
    %78 = arith.divf %76, %77 : vector<8x1xf32>
    %79 = vector.broadcast %78 : vector<8x1xf32> to vector<8x32xf32>
    %80 = arith.subf %72, %79 : vector<8x32xf32>
    %81 = arith.mulf %80, %80 : vector<8x32xf32>
    %cst_38 = arith.constant dense<0.000000e+00> : vector<8xf32>
    %82 = vector.multi_reduction <add>, %81, %cst_38 [1] : vector<8x32xf32> to vector<8xf32>
    %83 = vector.shape_cast %82 : vector<8xf32> to vector<8x1xf32>
    %cst_39 = arith.constant 3.200000e+01 : f32
    %84 = vector.broadcast %cst_39 : f32 to vector<8x1xf32>
    %85 = arith.divf %83, %84 : vector<8x1xf32>
    %cst_40 = arith.constant 9.99999974E-6 : f32
    %86 = vector.broadcast %cst_40 : f32 to vector<8x1xf32>
    %87 = arith.addf %85, %86 : vector<8x1xf32>
    %88 = math.rsqrt %87 : vector<8x1xf32>
    %89 = vector.broadcast %88 : vector<8x1xf32> to vector<8x32xf32>
    %90 = arith.mulf %80, %89 : vector<8x32xf32>
    %91 = vector.broadcast %73 : vector<1x32xf32> to vector<8x32xf32>
    %92 = arith.mulf %90, %91 : vector<8x32xf32>
    %93 = vector.broadcast %74 : vector<1x32xf32> to vector<8x32xf32>
    %94 = arith.addf %92, %93 : vector<8x32xf32>
    %c0_41 = arith.constant 0 : index
    %c0_42 = arith.constant 0 : index
    %c0_43 = arith.constant 0 : index
    %95 = vector.load %arg11[%c0_41, %c0_42, %c0_43] : memref<1x8x32xf32, #tpu.memory_space<vmem>>, vector<1x8x32xf32>
    %96 = vector.shape_cast %95 : vector<1x8x32xf32> to vector<8x32xf32>
    %97 = vector.shape_cast %94 : vector<8x32xf32> to vector<1x8x32xf32>
    tpu.vector_store %arg11[%c0_41, %c0_42, %c0_43], %97 {strides = array<i32>} : memref<1x8x32xf32, #tpu.memory_space<vmem>>, vector<1x8x32xf32>,
    return
  }
  func.func @transform_0(%arg0: i32) -> (i32, i32, i32) {
    %c0_i32 = arith.constant 0 : i32
    %c0_i32_0 = arith.constant 0 : i32
    %c0_i32_1 = arith.constant 0 : i32
    return %arg0, %c0_i32, %c0_i32_0 : i32, i32, i32
  }
  func.func @transform_1(%arg0: i32) -> (i32, i32, i32) {
    %c0_i32 = arith.constant 0 : i32
    %c0_i32_0 = arith.constant 0 : i32
    %c0_i32_1 = arith.constant 0 : i32
    return %arg0, %c0_i32, %c0_i32_0 : i32, i32, i32
  }
  func.func @transform_2(%arg0: i32) -> (i32, i32) {
    %c0_i32 = arith.constant 0 : i32
    %c0_i32_0 = arith.constant 0 : i32
    %c0_i32_1 = arith.constant 0 : i32
    return %c0_i32, %c0_i32_0 : i32, i32
  }
  func.func @transform_3(%arg0: i32) -> (i32, i32) {
    %c0_i32 = arith.constant 0 : i32
    %c0_i32_0 = arith.constant 0 : i32
    %c0_i32_1 = arith.constant 0 : i32
    return %c0_i32, %c0_i32_0 : i32, i32
  }
  func.func @transform_4(%arg0: i32) -> (i32, i32) {
    %c0_i32 = arith.constant 0 : i32
    %c0_i32_0 = arith.constant 0 : i32
    %c0_i32_1 = arith.constant 0 : i32
    return %c0_i32, %c0_i32_0 : i32, i32
  }
  func.func @transform_5(%arg0: i32) -> (i32, i32) {
    %c0_i32 = arith.constant 0 : i32
    %c0_i32_0 = arith.constant 0 : i32
    %c0_i32_1 = arith.constant 0 : i32
    return %c0_i32, %c0_i32_0 : i32, i32
  }
  func.func @transform_6(%arg0: i32) -> (i32, i32) {
    %c0_i32 = arith.constant 0 : i32
    %c0_i32_0 = arith.constant 0 : i32
    %c0_i32_1 = arith.constant 0 : i32
    return %c0_i32, %c0_i32_0 : i32, i32
  }
  func.func @transform_7(%arg0: i32) -> (i32, i32) {
    %c0_i32 = arith.constant 0 : i32
    %c0_i32_0 = arith.constant 0 : i32
    %c0_i32_1 = arith.constant 0 : i32
    return %c0_i32, %c0_i32_0 : i32, i32
  }
  func.func @transform_8(%arg0: i32) -> (i32, i32) {
    %c0_i32 = arith.constant 0 : i32
    %c0_i32_0 = arith.constant 0 : i32
    %c0_i32_1 = arith.constant 0 : i32
    return %c0_i32, %c0_i32_0 : i32, i32
  }
  func.func @transform_9(%arg0: i32) -> (i32, i32) {
    %c0_i32 = arith.constant 0 : i32
    %c0_i32_0 = arith.constant 0 : i32
    %c0_i32_1 = arith.constant 0 : i32
    return %c0_i32, %c0_i32_0 : i32, i32
  }
  func.func @transform_10(%arg0: i32) -> (i32, i32, i32) {
    %c0_i32 = arith.constant 0 : i32
    %c0_i32_0 = arith.constant 0 : i32
    %c0_i32_1 = arith.constant 0 : i32
    return %arg0, %c0_i32, %c0_i32_0 : i32, i32, i32
  }
}

module attributes {stable_mosaic.version = 11 : i64} {
  func.func @_ffn_block_kernel(%arg0: i32, %arg1: memref<1x8x32xf32, #tpu.memory_space<vmem>>, %arg2: memref<32x64xbf16, #tpu.memory_space<vmem>>, %arg3: memref<1x64xf32, #tpu.memory_space<vmem>>, %arg4: memref<64x32xbf16, #tpu.memory_space<vmem>>, %arg5: memref<1x32xf32, #tpu.memory_space<vmem>>, %arg6: memref<1x32xf32, #tpu.memory_space<vmem>>, %arg7: memref<1x32xf32, #tpu.memory_space<vmem>>, %arg8: memref<1x8x32xf32, #tpu.memory_space<vmem>>) attributes {dimension_semantics = [#tpu.dimension_semantics<parallel>], iteration_bounds = array<i64: 2>, scalar_prefetch = 0 : i64, scratch_operands = 0 : i64, tpu.core_type = #tpu.core_type<tc>, window_params = [{transform_indices = @transform_0, window_bounds = array<i64: 1, 8, 32>}, {pipeline_mode = #tpu.pipeline_mode<synchronous>, transform_indices = @transform_1, window_bounds = array<i64: 32, 64>}, {pipeline_mode = #tpu.pipeline_mode<synchronous>, transform_indices = @transform_2, window_bounds = array<i64: 1, 64>}, {pipeline_mode = #tpu.pipeline_mode<synchronous>, transform_indices = @transform_3, window_bounds = array<i64: 64, 32>}, {pipeline_mode = #tpu.pipeline_mode<synchronous>, transform_indices = @transform_4, window_bounds = array<i64: 1, 32>}, {pipeline_mode = #tpu.pipeline_mode<synchronous>, transform_indices = @transform_5, window_bounds = array<i64: 1, 32>}, {pipeline_mode = #tpu.pipeline_mode<synchronous>, transform_indices = @transform_6, window_bounds = array<i64: 1, 32>}, {transform_indices = @transform_7, window_bounds = array<i64: 1, 8, 32>}]} {
    %c0 = arith.constant 0 : index
    %c0_0 = arith.constant 0 : index
    %c0_1 = arith.constant 0 : index
    %0 = vector.load %arg1[%c0, %c0_0, %c0_1] : memref<1x8x32xf32, #tpu.memory_space<vmem>>, vector<1x8x32xf32>
    %1 = vector.shape_cast %0 : vector<1x8x32xf32> to vector<8x32xf32>
    %2 = arith.truncf %1 : vector<8x32xf32> to vector<8x32xbf16>
    %c0_2 = arith.constant 0 : index
    %c0_3 = arith.constant 0 : index
    %3 = vector.load %arg2[%c0_2, %c0_3] : memref<32x64xbf16, #tpu.memory_space<vmem>>, vector<32x64xbf16>
    %cst = arith.constant dense<0.000000e+00> : vector<8x64xf32>
    %4 = tpu.matmul %2, %3, %cst {dimension_numbers = #tpu.dot_dimension_numbers<[1], [0], [0], [1], [0, 0, 1, 1], [], []>} : vector<8x32xbf16>, vector<32x64xbf16>, vector<8x64xf32> -> vector<8x64xf32>
    %c0_4 = arith.constant 0 : index
    %c0_5 = arith.constant 0 : index
    %5 = vector.load %arg3[%c0_4, %c0_5] : memref<1x64xf32, #tpu.memory_space<vmem>>, vector<1x64xf32>
    %6 = vector.broadcast %5 : vector<1x64xf32> to vector<8x64xf32>
    %7 = arith.addf %4, %6 : vector<8x64xf32>
    %cst_6 = arith.constant 0.000000e+00 : f32
    %8 = vector.broadcast %cst_6 : f32 to vector<8x64xf32>
    %9 = arith.maximumf %7, %8 : vector<8x64xf32>
    %10 = arith.truncf %9 : vector<8x64xf32> to vector<8x64xbf16>
    %c0_7 = arith.constant 0 : index
    %c0_8 = arith.constant 0 : index
    %11 = vector.load %arg4[%c0_7, %c0_8] : memref<64x32xbf16, #tpu.memory_space<vmem>>, vector<64x32xbf16>
    %cst_9 = arith.constant dense<0.000000e+00> : vector<8x32xf32>
    %12 = tpu.matmul %10, %11, %cst_9 {dimension_numbers = #tpu.dot_dimension_numbers<[1], [0], [0], [1], [0, 0, 1, 1], [], []>} : vector<8x64xbf16>, vector<64x32xbf16>, vector<8x32xf32> -> vector<8x32xf32>
    %c0_10 = arith.constant 0 : index
    %c0_11 = arith.constant 0 : index
    %13 = vector.load %arg5[%c0_10, %c0_11] : memref<1x32xf32, #tpu.memory_space<vmem>>, vector<1x32xf32>
    %14 = vector.broadcast %13 : vector<1x32xf32> to vector<8x32xf32>
    %15 = arith.addf %12, %14 : vector<8x32xf32>
    %16 = arith.addf %1, %15 : vector<8x32xf32>
    %c0_12 = arith.constant 0 : index
    %c0_13 = arith.constant 0 : index
    %17 = vector.load %arg6[%c0_12, %c0_13] : memref<1x32xf32, #tpu.memory_space<vmem>>, vector<1x32xf32>
    %c0_14 = arith.constant 0 : index
    %c0_15 = arith.constant 0 : index
    %18 = vector.load %arg7[%c0_14, %c0_15] : memref<1x32xf32, #tpu.memory_space<vmem>>, vector<1x32xf32>
    %cst_16 = arith.constant dense<0.000000e+00> : vector<8xf32>
    %19 = vector.multi_reduction <add>, %16, %cst_16 [1] : vector<8x32xf32> to vector<8xf32>
    %20 = vector.shape_cast %19 : vector<8xf32> to vector<8x1xf32>
    %cst_17 = arith.constant 3.200000e+01 : f32
    %21 = vector.broadcast %cst_17 : f32 to vector<8x1xf32>
    %22 = arith.divf %20, %21 : vector<8x1xf32>
    %23 = vector.broadcast %22 : vector<8x1xf32> to vector<8x32xf32>
    %24 = arith.subf %16, %23 : vector<8x32xf32>
    %25 = arith.mulf %24, %24 : vector<8x32xf32>
    %cst_18 = arith.constant dense<0.000000e+00> : vector<8xf32>
    %26 = vector.multi_reduction <add>, %25, %cst_18 [1] : vector<8x32xf32> to vector<8xf32>
    %27 = vector.shape_cast %26 : vector<8xf32> to vector<8x1xf32>
    %cst_19 = arith.constant 3.200000e+01 : f32
    %28 = vector.broadcast %cst_19 : f32 to vector<8x1xf32>
    %29 = arith.divf %27, %28 : vector<8x1xf32>
    %cst_20 = arith.constant 9.99999974E-6 : f32
    %30 = vector.broadcast %cst_20 : f32 to vector<8x1xf32>
    %31 = arith.addf %29, %30 : vector<8x1xf32>
    %32 = math.rsqrt %31 : vector<8x1xf32>
    %33 = vector.broadcast %32 : vector<8x1xf32> to vector<8x32xf32>
    %34 = arith.mulf %24, %33 : vector<8x32xf32>
    %35 = vector.broadcast %17 : vector<1x32xf32> to vector<8x32xf32>
    %36 = arith.mulf %34, %35 : vector<8x32xf32>
    %37 = vector.broadcast %18 : vector<1x32xf32> to vector<8x32xf32>
    %38 = arith.addf %36, %37 : vector<8x32xf32>
    %c0_21 = arith.constant 0 : index
    %c0_22 = arith.constant 0 : index
    %c0_23 = arith.constant 0 : index
    %39 = vector.load %arg8[%c0_21, %c0_22, %c0_23] : memref<1x8x32xf32, #tpu.memory_space<vmem>>, vector<1x8x32xf32>
    %40 = vector.shape_cast %39 : vector<1x8x32xf32> to vector<8x32xf32>
    %41 = vector.shape_cast %38 : vector<8x32xf32> to vector<1x8x32xf32>
    tpu.vector_store %arg8[%c0_21, %c0_22, %c0_23], %41 {strides = array<i32>} : memref<1x8x32xf32, #tpu.memory_space<vmem>>, vector<1x8x32xf32>,
    return
  }
  func.func @transform_0(%arg0: i32) -> (i32, i32, i32) {
    %c0_i32 = arith.constant 0 : i32
    %c0_i32_0 = arith.constant 0 : i32
    %c0_i32_1 = arith.constant 0 : i32
    return %arg0, %c0_i32, %c0_i32_0 : i32, i32, i32
  }
  func.func @transform_1(%arg0: i32) -> (i32, i32) {
    %c0_i32 = arith.constant 0 : i32
    %c0_i32_0 = arith.constant 0 : i32
    %c0_i32_1 = arith.constant 0 : i32
    return %c0_i32, %c0_i32_0 : i32, i32
  }
  func.func @transform_2(%arg0: i32) -> (i32, i32) {
    %c0_i32 = arith.constant 0 : i32
    %c0_i32_0 = arith.constant 0 : i32
    %c0_i32_1 = arith.constant 0 : i32
    return %c0_i32, %c0_i32_0 : i32, i32
  }
  func.func @transform_3(%arg0: i32) -> (i32, i32) {
    %c0_i32 = arith.constant 0 : i32
    %c0_i32_0 = arith.constant 0 : i32
    %c0_i32_1 = arith.constant 0 : i32
    return %c0_i32, %c0_i32_0 : i32, i32
  }
  func.func @transform_4(%arg0: i32) -> (i32, i32) {
    %c0_i32 = arith.constant 0 : i32
    %c0_i32_0 = arith.constant 0 : i32
    %c0_i32_1 = arith.constant 0 : i32
    return %c0_i32, %c0_i32_0 : i32, i32
  }
  func.func @transform_5(%arg0: i32) -> (i32, i32) {
    %c0_i32 = arith.constant 0 : i32
    %c0_i32_0 = arith.constant 0 : i32
    %c0_i32_1 = arith.constant 0 : i32
    return %c0_i32, %c0_i32_0 : i32, i32
  }
  func.func @transform_6(%arg0: i32) -> (i32, i32) {
    %c0_i32 = arith.constant 0 : i32
    %c0_i32_0 = arith.constant 0 : i32
    %c0_i32_1 = arith.constant 0 : i32
    return %c0_i32, %c0_i32_0 : i32, i32
  }
  func.func @transform_7(%arg0: i32) -> (i32, i32, i32) {
    %c0_i32 = arith.constant 0 : i32
    %c0_i32_0 = arith.constant 0 : i32
    %c0_i32_1 = arith.constant 0 : i32
    return %arg0, %c0_i32, %c0_i32_0 : i32, i32, i32
  }
}

</mosaic_0001>

<bundles_post_ra>
// kernel: decoder_forward.8
= control target key start
LH: loop header
LB: loop body
LE: loop exit
PB: predicated region body
PF: predicated region fallthrough
CT: control target
= control target key end

     0   :  { %s631_s24 = smov 0   ;;  %s689_s0 = inlined_call_operand.vmem [shape: f32[2,8,32], index: 0, kind: input, shape index: {}]   ;;  %s690_s1 = inlined_call_operand.vmem [shape: bf16[32,64], index: 1, kind: input, shape index: {}]   ;;  %s691_s2 = inlined_call_operand.vmem [shape: f32[1,64], index: 2, kind: input, shape index: {}]   ;;  %s692_s3 = inlined_call_operand.vmem [shape: bf16[64,32], index: 3, kind: input, shape index: {}]   ;;  %s693_s4 = inlined_call_operand.vmem [shape: f32[1,32], index: 4, kind: input, shape index: {}]   ;;  %s694_s5 = inlined_call_operand.vmem [shape: f32[1,32], index: 5, kind: input, shape index: {}]   ;;  %s695_s6 = inlined_call_operand.vmem [shape: f32[1,32], index: 6, kind: input, shape index: {}]   ;;  %s696_s7 = inlined_call_operand.vmem [shape: f32[2,8,32], index: 7, kind: output, shape index: {}]  }
   0x1 LB: > { %s514_s25 = sadd.s32 4294967295, %s587_s24   ;;  %p518_p0 = scmp.ge.s32.totalorder %s587_s24, 1  ;;  %s587_s24 = sphi %s631_s24, %s17_s24  }
   0x2   : > { %p236_p1 = scmp.lt.s32.totalorder %s587_s24, 3 }
   0x4   : > { %p237_p2 = pnand %p518_p0, %p236_p1 }
   0x5   : > { %v573_v0 = vld [vmem:[%s690_s1] sm:$0xff] (!%p237_p2)   ;;  %v589_v1 = vmov (!%p237_p2), 0.0   ;;  %v574_v2 = vld [vmem:[%s690_s1 + $0x8] sm:$0xff] (!%p237_p2)   ;;  %vm590_vm0 = vmmov (!%p237_p2), 0   ;;  %p266_p3 = scmp.lt.s32.totalorder (!%p237_p2), %s514_s25, 1  ;;  %vm300_vm1 = vcmask (!%p237_p2), 261120  }
   0x6   : > { %240 = sbr.rel (%p237_p2) target bundleno = 767 (0x2ff), region = 48  ;;  %543 = vmatprep.subr.bf16.mxu0 (!%p237_p2), %v589_v1  ;;  %551 = vmatprep.subr.bf16.mxu1 (!%p237_p2), %v589_v1  ;;  %v575_v3 = vld [vmem:[%s692_s3] sm:$0xff] (!%p237_p2)   ;;  %v576_v4 = vld [vmem:[%s692_s3 + $0x8] sm:$0xff] (!%p237_p2)   ;;  %v577_v7 = vld [vmem:[%s692_s3 + $0x10] sm:$0xff] (!%p237_p2)   ;;  %vm385_vm2 = vcmask (!%p237_p2), 523264  }
   0x7   : > { %544 = vmatpush3.bf16.msra.mxu0 (!%p237_p2), %v573_v0  ;;  %547 = vmatprep.mubr.msk.bf16.mxu0 (!%p237_p2), %vm590_vm0, %v589_v1  ;;  %v578_v8 = vld [vmem:[%s692_s3 + $0x18] sm:$0xff] (!%p237_p2)   ;;  %v521_v9 = vld [vmem:[%s691_s2] ss:$0 sm:$0xff] (!%p237_p2) }
   0x8   : > { %545 = vmatprep.subr.bf16.mxu0 (!%p237_p2), %v589_v1  ;;  %559 = vmatprep.mubr.msk.bf16.mxu1 (!%p237_p2), %vm590_vm0, %v589_v1  ;;  %v525_v17 = vld [vmem:[%s693_s4] ss:$0 sm:$0xff] (!%p237_p2) }
   0x9   : > { %552 = vmatpush3.bf16.msra.mxu1 (!%p237_p2), %v575_v3  ;;  %v531_v34 = vld [vmem:[%s694_s5] ss:$0 sm:$0xff] (!%p237_p2) }
   0xa   : > { %553 = vmatprep.subr.bf16.mxu1 (!%p237_p2), %v589_v1  ;;  %v532_v36 = vld [vmem:[%s695_s6] ss:$0 sm:$0xff] (!%p237_p2) }
   0xb   : > { %546 = vmatpush3.bf16.msra.mxu0 (!%p237_p2), %v574_v2 }
   0xd   : > { %s698_s25 = smov (!%p266_p3, %s514_s25), 1  ;;  %554 = vmatpush3.bf16.msra.mxu1 %v576_v4 }
   0xe   : > { %s519_s11 = sshll.u32 %s698_s25, 3  ;;  %555 = vmatprep.subr.bf16.mxu1 %v589_v1 }
   0xf   : > { %s269_s14 = scalar_lea.vmem %s689_s0, %s519_s11  ;;  %s273_s8 = scalar_lea.vmem %s696_s7, %s519_s11 }
  0x10   : > { %v275_v5 = vld [vmem:[%s269_s14] sm:$0xff] }
  0x11   : > { %v276_v6 = vpack.c.bf16 %v275_v5, %v275_v5  ;;  %556 = vmatpush3.bf16.msra.mxu1 %v577_v7 }
  0x12   : > { %557 = vmatprep.subr.bf16.mxu1 %v589_v1 }
  0x13   : > { %548 = vmatmul.mubr.msk.bf16.vlgmr.msra.gmra.mrb[0].mxu0 %vm300_vm1, %v276_v6 }
  0x15   : > { %558 = vmatpush3.bf16.msra.mxu1 %v578_v8 }
  0xe6   : > { %v338_v10 = vpop.f32.mrb[0].mxu0 }
  0xe7   : > { %v339_v11 = vadd.f32 %v521_v9, %v338_v10  ;;  %v549_v12 = vpop.f32.mrb[1].mxu0 }
  0xe8   : > { %v341_v13 = vpop.f32.mrb[2].mxu0 }
  0xe9   : > { %v344_v14 = vmax.f32 %v339_v11, 0.0  ;;  %v550_v15 = vpop.f32.mrb[3].mxu0 }
  0xeb   : > { %v345_v16 = vpack.c.bf16 %v344_v14, %v344_v14 }
  0xed   : > { %560 = vmatmul.mubr.msk.bf16.vlgmr.msra.gmra.mrb[0].mxu1 %vm385_vm2, %v345_v16 }
 0x1c0   : > { %v423_v18 = vpop.f32.mrb[0].mxu1 }
 0x1c1   : > { %v424_v19 = vadd.f32 %v525_v17, %v423_v18  ;;  %v561_v20 = vpop.f32.mrb[1].mxu1 }
 0x1c2   : > { %v426_v21 = vpop.f32.mrb[2].mxu1 }
 0x1c3   : > { %v562_v22 = vpop.f32.mrb[3].mxu1  ;;  %v429_v23 = vadd.f32 %v424_v19, %v275_v5 }
 0x1c5   : > { %v432_v24 = vsel %vm300_vm1, %v429_v23, 0.0 }
 0x1c6   : > { %433 = vadd.xlane.f32.xlu0 %v432_v24 }
 0x253   : > { %v434_v25 = vpop.xlane.xlu0 %433 }
 0x254   : > { %v436_v26 = vmul.f32 0.03125, %v434_v25 }
 0x256   : > { %v437_v27 = vsub.f32 %v429_v23, %v436_v26 }
 0x258   : > { %v438_v28 = vmul.f32 %v437_v27, %v437_v27 }
 0x25a   : > { %v439_v29 = vsel %vm300_vm1, %v438_v28, 0.0 }
 0x25b   : > { %440 = vadd.xlane.f32.xlu0 %v439_v29 }
 0x2e8   : > { %v441_v30 = vpop.xlane.xlu0 %440 }
 0x2e9   : > { %v442_v31 = vmul.f32 0.03125, %v441_v30 }
 0x2eb   : > { %v443_v32 = vadd.f32 1e-05, %v442_v31 }
 0x2ed   : > { %579 = vrsqrt.f32 %v443_v32 }
 0x2f7   : > { %v580_v33 = vpop.eup %579 }
 0x2f8   : > { %v445_v35 = vmul.f32 %v580_v33, %v437_v27 }
 0x2fa   : > { %v452_v37 = vmul.f32 %v531_v34, %v445_v35 }
 0x2fc   : > { %v459_v38 = vadd.f32 %v532_v36, %v452_v37 }
 0x2fe   : > { %460 = vst.msk [vmem:[%s273_s8] sm:$0xff] %vm300_vm1, %v459_v38 }
 0x2ff PF: > { %s17_s24 = sadd.s32 1, %s587_s24  }
 0x300   : > { %p14_p4 = scmp.ge.s32.totalorder %s17_s24, 4  }
 0x302   :  { %16 = sbr.rel (!%p14_p4) target bundleno = 1 (0x1), region = 78 }

// kernel: decoder_forward.7
= control target key start
LH: loop header
LB: loop body
LE: loop exit
PB: predicated region body
PF: predicated region fallthrough
CT: control target
= control target key end

     0   :  { %15 = vsyncpa [#allocation3], 0  ;;  %s1478_s0 = inlined_call_operand.vmem [shape: f32[2,8,32], index: 0, kind: input, shape index: {}]   ;;  %s1479_s1 = inlined_call_operand.vmem [shape: f32[2,16,48], index: 1, kind: input, shape index: {}]   ;;  %s1480_s2 = inlined_call_operand.hbm [shape: bf16[32,32], index: 2, kind: input, shape index: {}]   ;;  %s1481_s3 = inlined_call_operand.vmem [shape: f32[1,32], index: 3, kind: input, shape index: {}]   ;;  %s1482_s4 = inlined_call_operand.vmem [shape: bf16[48,64], index: 4, kind: input, shape index: {}]   ;;  %s1483_s5 = inlined_call_operand.vmem [shape: f32[1,64], index: 5, kind: input, shape index: {}]   ;;  %s1484_s6 = inlined_call_operand.hbm [shape: bf16[32,32], index: 6, kind: input, shape index: {}]   ;;  %s1485_s7 = inlined_call_operand.vmem [shape: f32[1,32], index: 7, kind: input, shape index: {}]   ;;  %s1486_s8 = inlined_call_operand.vmem [shape: f32[1,32], index: 8, kind: input, shape index: {}]   ;;  %s1487_s9 = inlined_call_operand.vmem [shape: f32[1,32], index: 9, kind: input, shape index: {}]   ;;  %s1488_s10 = inlined_call_operand.vmem [shape: f32[2,8,32], index: 10, kind: output, shape index: {}]  }
   0x1   :  { %16 = vsyncpa [#allocation5], 0  ;;  %s1302_s13 = smov 0  }
   0x2 LB: > { %s1308_s14 = sadd.s32 4294967295, %s1236_s13   ;;  %p1006_p0 = scmp.ge.s32.totalorder %s1236_s13, 1  ;;  %s1236_s13 = sphi %s1302_s13, %s22_s13  }
   0x3   : > { %p273_p1 = scmp.lt.s32.totalorder %s1236_s13, 3  ;;  %s1238_s15 = smov [#allocation2]  }
   0x4   : > { %s285_s16 = sshll.u32 %s1238_s15, 4  ;;  %p1489_p3 = scmp.eq.s32.totalorder %s1308_s14, 0  ;;  %s286_s16 = int_to_ptr.vmem [resolvable:$true] %s285_s16 }
   0x5   : > { %p1312_p2 = pnand %p1006_p0, %p273_p1  ;;  %s1239_s18 = smov [#allocation4]  }
   0x6   : > { %s307_s19 = sshll.u32 %s1239_s18, 4  ;;  %s1166_s23 = scalar_lea.hbm %s1480_s2, 256  ;;  %s1325_s19 = int_to_ptr.vmem [resolvable:$true] %s307_s19 }
   0x7   : > { %s1491_s17 = scalar_select %p1312_p2, 1, 0 }
   0x8   : > { %p1121_p4 = pneg %p1312_p2  ;;  %p1167_p6 = scmp.ne.s32.totalorder %s1480_s2, %s1166_s23 }
   0x9   : > { %p1173_p10 = scmp.lt.u32.totalorder %s1166_s23, %s1480_s2 }
   0xa   : > { %p1321_p5 = pnand %p1489_p3, %p1121_p4 }
   0xc   : > { %p1168_p7 = pneg %p1321_p5 }
   0xe   : > { %p1169_p8 = pnand %p1168_p7, %p1167_p6 }
  0x10   : > { %p1170_p9 = pneg %p1169_p8 }
  0x12   : > { %p1175_p11 = pnand %p1173_p10, %p1170_p9 }
  0x14   : > { %1178 = shalt.err (!%p1175_p11)
}
  0x15   : > { %s1179_s28 = scalar_lea.vmem %s286_s16, 256  ;;  %p1187_p1 = scmp.lt.s32.totalorder %s286_s16, %s286_s16 }
  0x16   : > { %p1180_p12 = scmp.ne.s32.totalorder %s286_s16, %s1179_s28  ;;  %p1188_p4 = scmp.lt.s32.totalorder %s1179_s28, %s1179_s28 }
  0x18   : > { %p1182_p13 = pnand %p1180_p12, %p1168_p7  ;;  %p1189_p3 = por %p1188_p4, %p1187_p1 }
  0x1a   : > { %p1183_p0 = pneg %p1182_p13 }
  0x1c   : > { %p1190_p2 = pnand %p1189_p3, %p1183_p0 }
  0x1e   : > { %1193 = shalt.err (!%p1190_p2)
}
  0x1f   : > { %s1240_s29 = smov 64   ;;  %s1241_s30 = smov 4  }
  0x20   : > { %1124 = dma.hbm_to_vmem [thread:$0]  (!%p1321_p5), %s1480_s2, 256, %s286_s16, [#allocation3], %s1240_s29, %s1240_s29, %s1241_s30  }
  0x21   : > { %s1194_s21 = scalar_lea.hbm %s1484_s6, 256 }
  0x22   : > { %p1195_p6 = scmp.ne.s32.totalorder %s1484_s6, %s1194_s21  ;;  %p1201_p8 = scmp.lt.u32.totalorder %s1194_s21, %s1484_s6 }
  0x24   : > { %p1197_p2 = pnand %p1195_p6, %p1168_p7 }
  0x26   : > { %p1198_p3 = pneg %p1197_p2 }
  0x28   : > { %p1203_p9 = pnand %p1201_p8, %p1198_p3 }
  0x2a   : > { %1206 = shalt.err (!%p1203_p9)
}
  0x2b   : > { %s1207_s16 = scalar_lea.vmem %s1325_s19, 256  ;;  %p1215_p13 = scmp.lt.s32.totalorder %s1325_s19, %s1325_s19 }
  0x2c   : > { %p1208_p10 = scmp.ne.s32.totalorder %s1325_s19, %s1207_s16  ;;  %p1216_p0 = scmp.lt.s32.totalorder %s1207_s16, %s1207_s16 }
  0x2e   : > { %p1210_p11 = pnand %p1208_p10, %p1168_p7  ;;  %p1217_p1 = por %p1216_p0, %p1215_p13 }
  0x30   : > { %p1211_p12 = pneg %p1210_p11 }
  0x32   : > { %p1218_p4 = pnand %p1217_p1, %p1211_p12 }
  0x34   : > { %1221 = shalt.err (!%p1218_p4)
}
  0x35   : > { %1127 = dma.hbm_to_vmem [thread:$0]  (!%p1321_p5), %s1484_s6, 256, %s1325_s19, [#allocation5], %s1240_s29, %s1240_s29, %s1241_s30  }
  0x36   : > { %p1493_p6 = scmp.ne.s32.totalorder %s1491_s17, 0 }
  0x37   : > { %p1494_p2 = scmp.eq.s32.totalorder (!%p1493_p6), %s1308_s14, 0 }
  0x38   : > { %347 = sbr.rel (%p1493_p6) target bundleno = 1698 (0x6a2), region = 60 }
  0x3f   : > { %1227 = dma.done.wait (%p1494_p2), [#allocation3], 256   ;;  %p1495_p7 = pmov %p1494_p2 }
  0x40   : > { %p1496_p3 = pmov %p1494_p2 }
  0x41   : > { %1229 = vsyncadd (%p1495_p7), [#allocation3], 4294967040 }
  0x42   : > { %1231 = dma.done.wait (%p1496_p3), [#allocation5], 256   ;;  %p1497_p8 = pmov %p1494_p2 }
  0x43   : > { %p392_p9 = scmp.lt.s32.totalorder %s1308_s14, 1  ;;  %v1242_v0 = vmov 0.0   ;;  %vm1243_vm0 = vmmov 0   ;;  %v1149_v1 = vld [vmem:[%s1482_s4] sm:$0xff]   ;;  %v1150_v2 = vld [vmem:[%s1482_s4 + $0x8] sm:$0xff]   ;;  %v1151_v3 = vld [vmem:[%s1482_s4 + $0x10] sm:$0xff]  }
  0x44   : > { %1233 = vsyncadd (%p1497_p8), [#allocation5], 4294967040  ;;  %1067 = vmatprep.subr.bf16.mxu1 %v1242_v0  ;;  %1073 = vmatprep.mubr.msk.bf16.mxu1 %vm1243_vm0, %v1242_v0  ;;  %v1152_v5 = vld [vmem:[#allocation2] sm:$0xff]   ;;  %v1153_v7 = vld [vmem:[#allocation2 + $0x8] sm:$0xff]   ;;  %vm509_vm1 = vcmask 392192   ;;  %vm433_vm2 = vcmask 261120  }
  0x45   : > { %1059 = vmatprep.subr.bf16.mxu0 %v1242_v0  ;;  %s1499_s14 = smov (!%p392_p9, %s1308_s14), 1  ;;  %1063 = vmatprep.mubr.msk.bf16.mxu0 %vm1243_vm0, %v1242_v0  ;;  %v1021_v11 = vld [vmem:[%s1483_s5] ss:$0 sm:$0xff]  ;;  %vm556_vm3 = vcmask 130048   ;;  %s1245_s19 = smov 96   ;;  %v1155_v57 = vld [vmem:[#allocation4 + $0x8] sm:$0xff]  }
  0x46   : > { %s1039_s17 = sshll.u32 %s1499_s14, 4  ;;  %s1013_s28 = sshll.u32 %s1499_s14, 3  ;;  %1068 = vmatpush3.bf16.msra.mxu1 %v1149_v1  ;;  %1060 = vmatpush3.bf16.msra.mxu0 %v1152_v5  ;;  %v1017_v13 = vld [vmem:[%s1481_s3] ss:$0 sm:$0xff]  ;;  %v1154_v62 = vld [vmem:[#allocation4] sm:$0xff]  }
  0x47   : > { %s400_s11 = scalar_lea.vmem %s1479_s1, %s1039_s17  ;;  %1069 = vmatprep.subr.bf16.mxu1 %v1242_v0  ;;  %s395_s22 = scalar_lea.vmem %s1478_s0, %s1013_s28  ;;  %1061 = vmatprep.subr.bf16.mxu0 %v1242_v0 }
  0x48   : > { %v407_v4 = vld [vmem:[%s400_s11] sm:$0xff]  ;;  %v408_v6 = vld [vmem:[%s400_s11 + $0x8] sm:$0xff]  ;;  %s1244_s17 = smov 112   ;;  %s1246_s20 = smov 80  }
  0x49   : > { %v1414_v8 = vld [vmem:[%s395_s22] sm:$0xff]  ;;  %v477_v9 = vpack.c.bf16 %v408_v6, %v407_v4  ;;  %s404_s23 = scalar_lea.vmem %s1488_s10, %s1013_s28 }
  0x4a   : > { %1070 = vmatpush3.bf16.msra.mxu1 %v1150_v2  ;;  %v409_v10 = vpack.c.bf16 %v1414_v8, %v1414_v8  ;;  %1062 = vmatpush3.bf16.msra.mxu0 %v1153_v7 }
  0x4b   : > { %1071 = vmatprep.subr.bf16.mxu1 %v1242_v0  ;;  %1077 = vmatprep.subr.bf16.mxu0 %v1242_v0 }
  0x4d   : > { %1064 = vmatmul.mubr.msk.bf16.vlgmr.msra.gmra.mrb[0].mxu0 %vm433_vm2, %v409_v10 }
  0x4e   : > { %1072 = vmatpush3.bf16.msra.mxu1 %v1151_v3  ;;  %1079 = vmatprep.mubr.msk.bf16.mxu0 %vm1243_vm0, %v1242_v0 }
  0x4f   : > { %1083 = vmatprep.subr.bf16.mxu1 %v1242_v0 }
  0x51   : > { %1074 = vmatmul.mubr.msk.bf16.vlgmr.msra.gmra.mrb[0].mxu1 %vm509_vm1, %v477_v9 }
  0x52   : > { %1085 = vmatprep.mubr.msk.bf16.mxu1 %vm1243_vm0, %v1242_v0 }
 0x120   : > { %v471_v14 = vpop.f32.mrb[0].mxu0 }
 0x121   : > { %v1065_v16 = vpop.f32.mrb[1].mxu0  ;;  %v472_v22 = vadd.f32 %v1017_v13, %v471_v14 }
 0x122   : > { %v474_v18 = vpop.f32.mrb[2].mxu0 }
 0x123   : > { %v1066_v23 = vpop.f32.mrb[3].mxu0  ;;  %v554_v25 = vpack.c.bf16 %v472_v22, %v472_v22 }
 0x124   : > { %v547_v12 = vpop.f32.mrb[0].mxu1 }
 0x125   : > { %v1075_v15 = vpop.f32.mrb[1].mxu1  ;;  %v548_v19 = vadd.f32 %v1021_v11, %v547_v12 }
 0x126   : > { %v550_v17 = vpop.f32.mrb[2].mxu1 }
 0x127   : > { %v551_v20 = vadd.f32 %v1021_v11, %v550_v17  ;;  %v1076_v21 = vpop.f32.mrb[3].mxu1 }
 0x129   : > { %v555_v24 = vpack.c.bf16 %v551_v20, %v548_v19 }
 0x12b   : > { %669 = vrot.lane.b32.xlu0 %v555_v24, %s1244_s17  ;;  %v561_v26 = vsel %vm556_vm3, %v555_v24, 0 }
 0x12c   : > { %1078 = vmatpush3.bf16.xpose.msra.mxu0 %v561_v26 }
 0x12d   : > { %1089 = vmatprep.subr.bf16.mxu0 %v1242_v0 }
 0x12f   : > { %667 = vrot.lane.b32.xlu0 %v554_v25, %s1244_s17 }
 0x133   : > { %1080 = vmatmul.mubr.msk.bf16.vlgmr.msra.gmra.mrb[4].mxu0 %vm556_vm3, %v554_v25 }
 0x134   : > { %1091 = vmatprep.mubr.msk.bf16.mxu0 %vm1243_vm0, %v1242_v0 }
 0x19d   : > { %v670_v27 = vpop.permute.xlu0 %669 }
 0x19e   : > { %v675_v28 = vsel %vm556_vm3, %v670_v27, 0 }
 0x19f   : > { %1090 = vmatpush3.bf16.xpose.msra.mxu0 %v675_v28 }
 0x1a0   : > { %1101 = vmatprep.subr.bf16.mxu0 %v1242_v0 }
 0x1a1   : > { %v668_v29 = vpop.permute.xlu0 %667 }
 0x1a6   : > { %1092 = vmatmul.mubr.msk.bf16.vlgmr.msra.gmra.mrb[8].mxu0 %vm556_vm3, %v668_v29 }
 0x1a7   : > { %1103 = vmatprep.mubr.msk.bf16.mxu0 %vm1243_vm0, %v1242_v0  ;;  %1102 = vmatpush3.bf16.msra.mxu0 %v1155_v57 }
 0x206   : > { %v597_v30 = vpop.f32.mrb[4].mxu0 }
 0x207   : > { %v603_v31 = vmul.f32 0.25, %v597_v30  ;;  %v1081_v32 = vpop.f32.mrb[5].mxu0 }
 0x208   : > { %v600_v33 = vpop.f32.mrb[6].mxu0 }
 0x209   : > { %v1082_v34 = vpop.f32.mrb[7].mxu0  ;;  %v604_v35 = vsel %vm556_vm3, %v603_v31, -inf }
 0x20a   : > { %605 = vmax.xlane.f32.xlu1 %v604_v35  ;;  %v1036_v34 = vld [vmem:[%s1487_s9] ss:$0 sm:$0xff] }
 0x279   : > { %v711_v36 = vpop.f32.mrb[8].mxu0 }
 0x27a   : > { %v717_v37 = vmul.f32 0.25, %v711_v36  ;;  %v1093_v38 = vpop.f32.mrb[9].mxu0 }
 0x27b   : > { %v714_v39 = vpop.f32.mrb[10].mxu0 }
 0x27c   : > { %v1094_v40 = vpop.f32.mrb[11].mxu0  ;;  %v718_v41 = vsel %vm556_vm3, %v717_v37, -inf }
 0x27d   : > { %719 = vmax.xlane.f32.xlu1 %v718_v41 }
 0x28e   : > { %617 = vrot.lane.b32.xlu1 %v555_v24, %s1245_s19 }
 0x297   : > { %v606_v42 = vpop.xlane.xlu1 %605 }
 0x298   : > { %v607_v43 = vsub.f32 %v603_v31, %v606_v42 }
 0x29a   : > { %v608_v44 = vmul.f32 1.442695, %v607_v43 }
 0x29c   : > { %1156 = vpow2.f32 %v608_v44 }
 0x2a6   : > { %v1157_v45 = vpop.eup %1156 }
 0x2a7   : > { %v610_v46 = vsel %vm556_vm3, %v1157_v45, 0.0 }
 0x2a8   : > { %611 = vadd.xlane.f32.xlu0 %v610_v46 }
 0x30a   : > { %v720_v47 = vpop.xlane.xlu1 %719 }
 0x30b   : > { %v721_v48 = vsub.f32 %v717_v37, %v720_v47 }
 0x30d   : > { %v722_v49 = vmul.f32 1.442695, %v721_v48 }
 0x30e   : > { %v618_v50 = vpop.permute.xlu1 %617 }
 0x30f   : > { %1158 = vpow2.f32 %v722_v49  ;;  %1084 = vmatpush3.bf16.msra.mxu1 %v618_v50 }
 0x310   : > { %1095 = vmatprep.subr.bf16.mxu1 %v1242_v0 }
 0x319   : > { %v1159_v51 = vpop.eup %1158 }
 0x31a   : > { %v724_v52 = vsel %vm556_vm3, %v1159_v51, 0.0 }
 0x31b   : > { %725 = vadd.xlane.f32.xlu1 %v724_v52 }
 0x32c   : > { %730 = vrot.lane.b32.xlu1 %v555_v24, %s1246_s20 }
 0x335   : > { %v612_v53 = vpop.xlane.xlu0 %611 }
 0x336   : > { %1160 = vrcp.f32 %v612_v53 }
 0x340   : > { %v1161_v54 = vpop.eup %1160 }
 0x341   : > { %v614_v55 = vmul.f32 %v1161_v54, %v1157_v45 }
 0x343   : > { %v615_v56 = vpack.c.bf16 %v614_v55, %v614_v55 }
 0x345   : > { %1086 = vmatmul.mubr.msk.bf16.vlgmr.msra.gmra.mrb[4].mxu1 %vm556_vm3, %v615_v56 }
 0x346   : > { %1097 = vmatprep.mubr.msk.bf16.mxu1 %vm1243_vm0, %v1242_v0 }
 0x3a8   : > { %v726_v58 = vpop.xlane.xlu1 %725 }
 0x3a9   : > { %1162 = vrcp.f32 %v726_v58 }
 0x3ac   : > { %v731_v59 = vpop.permute.xlu1 %730 }
 0x3ad   : > { %1096 = vmatpush3.bf16.msra.mxu1 %v731_v59 }
 0x3ae   : > { %1107 = vmatprep.subr.bf16.mxu1 %v1242_v0 }
 0x3b3   : > { %v1163_v60 = vpop.eup %1162 }
 0x3b4   : > { %v728_v61 = vmul.f32 %v1163_v60, %v1159_v51 }
 0x3b6   : > { %v729_v63 = vpack.c.bf16 %v728_v61, %v728_v61 }
 0x3b8   : > { %1098 = vmatmul.mubr.msk.bf16.vlgmr.msra.gmra.mrb[8].mxu1 %vm556_vm3, %v729_v63 }
 0x3b9   : > { %1108 = vmatpush3.bf16.msra.mxu1 %v1154_v62  ;;  %1109 = vmatprep.mubr.msk.bf16.mxu1 %vm1243_vm0, %v1242_v0  ;;  %v1034_v0 = vld [vmem:[%s1485_s7] ss:$0 sm:$0xff] }
 0x418   : > { %v657_v1 = vpop.f32.mrb[4].mxu1 }
 0x419   : > { %v663_v2 = vpack.c.bf16 %v657_v1, %v657_v1  ;;  %v1087_v3 = vpop.f32.mrb[5].mxu1 }
 0x41a   : > { %v660_v4 = vpop.f32.mrb[6].mxu1 }
 0x41b   : > { %v1088_v5 = vpop.f32.mrb[7].mxu1  ;;  %1110 = vmatmul.mubr.msk.bf16.vlgmr.msra.gmra.mrb[12].mxu1 %vm556_vm3, %v663_v2 }
 0x48b   : > { %v770_v6 = vpop.f32.mrb[8].mxu1 }
 0x48c   : > { %v776_v7 = vpack.c.bf16 %v770_v6, %v770_v6  ;;  %v1099_v9 = vpop.f32.mrb[9].mxu1 }
 0x48d   : > { %v773_v10 = vpop.f32.mrb[10].mxu1 }
 0x48e   : > { %v1100_v11 = vpop.f32.mrb[11].mxu1  ;;  %1104 = vmatmul.mubr.msk.bf16.vlgmr.msra.gmra.mrb[12].mxu0 %vm556_vm3, %v776_v7 }
 0x4ee   : > { %v871_v12 = vpop.f32.mrb[12].mxu1 }
 0x4ef   : > { %v1111_v13 = vpop.f32.mrb[13].mxu1 }
 0x4f0   : > { %v874_v14 = vpop.f32.mrb[14].mxu1 }
 0x4f1   : > { %v1112_v15 = vpop.f32.mrb[15].mxu1 }
 0x561   : > { %v822_v16 = vpop.f32.mrb[12].mxu0 }
 0x562   : > { %v872_v17 = vadd.f32 %v871_v12, %v822_v16  ;;  %v1105_v18 = vpop.f32.mrb[13].mxu0 }
 0x563   : > { %v825_v19 = vpop.f32.mrb[14].mxu0 }
 0x564   : > { %v884_v20 = vadd.f32 %v1034_v0, %v872_v17  ;;  %v1106_v21 = vpop.f32.mrb[15].mxu0 }
 0x566   : > { %v885_v22 = vadd.f32 %v884_v20, %v1414_v8  ;;  %v1035_v8 = vld [vmem:[%s1486_s8] ss:$0 sm:$0xff] }
 0x568   : > { %v888_v23 = vsel %vm433_vm2, %v885_v22, 0.0 }
 0x569   : > { %889 = vadd.xlane.f32.xlu1 %v888_v23 }
 0x5f6   : > { %v890_v24 = vpop.xlane.xlu1 %889 }
 0x5f7   : > { %v892_v25 = vmul.f32 0.03125, %v890_v24 }
 0x5f9   : > { %v893_v26 = vsub.f32 %v885_v22, %v892_v25 }
 0x5fb   : > { %v894_v27 = vmul.f32 %v893_v26, %v893_v26 }
 0x5fd   : > { %v895_v28 = vsel %vm433_vm2, %v894_v27, 0.0 }
 0x5fe   : > { %896 = vadd.xlane.f32.xlu0 %v895_v28 }
 0x68b   : > { %v897_v29 = vpop.xlane.xlu0 %896 }
 0x68c   : > { %v898_v30 = vmul.f32 0.03125, %v897_v29 }
 0x68e   : > { %v899_v31 = vadd.f32 1e-05, %v898_v30 }
 0x690   : > { %1164 = vrsqrt.f32 %v899_v31 }
 0x69a   : > { %v1165_v32 = vpop.eup %1164 }
 0x69b   : > { %v901_v33 = vmul.f32 %v1165_v32, %v893_v26 }
 0x69d   : > { %v908_v35 = vmul.f32 %v1035_v8, %v901_v33 }
 0x69f   : > { %v915_v36 = vadd.f32 %v1036_v34, %v908_v35 }
 0x6a1   : > { %916 = vst.msk [vmem:[%s404_s23] sm:$0xff] %vm433_vm2, %v915_v36 }
 0x6a2 PF: > { %s22_s13 = sadd.s32 1, %s1236_s13  }
 0x6a3   : > { %p19_p5 = scmp.ge.s32.totalorder %s22_s13, 4  }
 0x6a5   :  { %21 = sbr.rel (!%p19_p5) target bundleno = 2 (0x2), region = 102 }
 0x6ac   :  { %936 = vsyncpa [#allocation3], 1 }
 0x6ad   :  { %938 = vsyncpa [#allocation3 + $0x1], 1 }
 0x6ae   :  { %939 = vsyncpa [#allocation5], 1 }

// kernel: decoder_forward.6
= control target key start
LH: loop header
LB: loop body
LE: loop exit
PB: predicated region body
PF: predicated region fallthrough
CT: control target
= control target key end

     0   :  { %12 = vsyncpa [#allocation3], 0  ;;  %s1241_s0 = inlined_call_operand.vmem [shape: f32[2,8,32], index: 0, kind: input, shape index: {}]   ;;  %s1242_s1 = inlined_call_operand.vmem [shape: bf16[32,96], index: 1, kind: input, shape index: {}]   ;;  %s1243_s2 = inlined_call_operand.hbm [shape: f32[1,96], index: 2, kind: input, shape index: {}]   ;;  %s1244_s3 = inlined_call_operand.vmem [shape: bf16[32,32], index: 3, kind: input, shape index: {}]   ;;  %s1245_s4 = inlined_call_operand.hbm [shape: f32[1,32], index: 4, kind: input, shape index: {}]   ;;  %s1246_s5 = inlined_call_operand.vmem [shape: f32[1,32], index: 5, kind: input, shape index: {}]   ;;  %s1247_s6 = inlined_call_operand.vmem [shape: f32[1,32], index: 6, kind: input, shape index: {}]   ;;  %s1248_s7 = inlined_call_operand.vmem [shape: f32[2,8,32], index: 7, kind: output, shape index: {}]  }
   0x1   :  { %13 = vsyncpa [#allocation5], 0  ;;  %s1079_s24 = smov 0  }
   0x2 LB: > { %s1085_s25 = sadd.s32 4294967295, %s1028_s24   ;;  %p823_p0 = scmp.ge.s32.totalorder %s1028_s24, 1  ;;  %s1028_s24 = sphi %s1079_s24, %s19_s24  }
   0x3   : > { %p202_p1 = scmp.lt.s32.totalorder %s1028_s24, 3  ;;  %p1249_p2 = scmp.eq.s32.totalorder %s1085_s25, 0 }
   0x4   : > { %s1030_s27 = smov [#allocation2]   ;;  %s1031_s29 = smov [#allocation4]  }
   0x5   : > { %p1090_p3 = pnand %p823_p0, %p202_p1  ;;  %s218_s28 = sshll.u32 %s1030_s27, 4  ;;  %s219_s28 = int_to_ptr.vmem [resolvable:$true] %s218_s28 }
   0x6   : > { %s232_s30 = sshll.u32 %s1031_s29, 4  ;;  %s958_s11 = scalar_lea.hbm %s1243_s2, 16  ;;  %s1102_s30 = int_to_ptr.vmem [resolvable:$true] %s232_s30 }
   0x7   : > { %s1251_s26 = scalar_select %p1090_p3, 1, 0 }
   0x8   : > { %p916_p4 = pneg %p1090_p3  ;;  %p959_p6 = scmp.ne.s32.totalorder %s1243_s2, %s958_s11 }
   0x9   : > { %p965_p10 = scmp.lt.u32.totalorder %s958_s11, %s1243_s2 }
   0xa   : > { %p1098_p5 = pnand %p1249_p2, %p916_p4 }
   0xc   : > { %p960_p7 = pneg %p1098_p5 }
   0xe   : > { %p961_p8 = pnand %p960_p7, %p959_p6 }
  0x10   : > { %p962_p9 = pneg %p961_p8 }
  0x12   : > { %p967_p11 = pnand %p965_p10, %p962_p9 }
  0x14   : > { %970 = shalt.err (!%p967_p11)
}
  0x15   : > { %s971_s16 = scalar_lea.vmem %s219_s28, 16  ;;  %s978_s17 = scalar_lea.vmem %s219_s28, 32 }
  0x16   : > { %p972_p12 = scmp.ne.s32.totalorder %s219_s28, %s971_s16  ;;  %p979_p1 = scmp.lt.s32.totalorder %s219_s28, %s219_s28 }
  0x17   : > { %p980_p4 = scmp.lt.s32.totalorder %s978_s17, %s971_s16 }
  0x18   : > { %p974_p13 = pnand %p972_p12, %p960_p7 }
  0x19   : > { %p981_p2 = por %p980_p4, %p979_p1 }
  0x1a   : > { %p975_p0 = pneg %p974_p13 }
  0x1c   : > { %p982_p3 = pnand %p981_p2, %p975_p0 }
  0x1e   : > { %985 = shalt.err (!%p982_p3)
}
  0x1f   : > { %919 = dma.hbm_to_vmem [thread:$0]  (!%p1098_p5), %s1243_s2, 16, %s219_s28, [#allocation3]  }
  0x20   : > { %s986_s22 = scalar_lea.hbm %s1245_s4, 16 }
  0x21   : > { %p987_p6 = scmp.ne.s32.totalorder %s1245_s4, %s986_s22  ;;  %p993_p3 = scmp.lt.u32.totalorder %s986_s22, %s1245_s4 }
  0x23   : > { %p989_p8 = pnand %p987_p6, %p960_p7 }
  0x25   : > { %p990_p2 = pneg %p989_p8 }
  0x27   : > { %p995_p9 = pnand %p993_p3, %p990_p2 }
  0x29   : > { %998 = shalt.err (!%p995_p9)
}
  0x2a   : > { %s999_s28 = scalar_lea.vmem %s1102_s30, 16  ;;  %s1006_s10 = scalar_lea.vmem %s1102_s30, 32 }
  0x2b   : > { %p1000_p10 = scmp.ne.s32.totalorder %s1102_s30, %s999_s28  ;;  %p1007_p13 = scmp.lt.s32.totalorder %s1102_s30, %s1102_s30 }
  0x2c   : > { %p1008_p0 = scmp.lt.s32.totalorder %s1006_s10, %s999_s28 }
  0x2d   : > { %p1002_p11 = pnand %p1000_p10, %p960_p7 }
  0x2e   : > { %p1009_p1 = por %p1008_p0, %p1007_p13 }
  0x2f   : > { %p1003_p12 = pneg %p1002_p11 }
  0x31   : > { %p1010_p4 = pnand %p1009_p1, %p1003_p12 }
  0x33   : > { %1013 = shalt.err (!%p1010_p4)
}
  0x34   : > { %922 = dma.hbm_to_vmem [thread:$0]  (!%p1098_p5), %s1245_s4, 16, %s1102_s30, [#allocation5]  }
  0x35   : > { %p1253_p6 = scmp.ne.s32.totalorder %s1251_s26, 0 }
  0x36   : > { %p1254_p7 = scmp.eq.s32.totalorder (!%p1253_p6), %s1085_s25, 0 }
  0x37   : > { %258 = sbr.rel (%p1253_p6) target bundleno = 1700 (0x6a4), region = 48 }
  0x3e   : > { %1019 = dma.done.wait (%p1254_p7), [#allocation3], 16   ;;  %p1255_p8 = pmov %p1254_p7 }
  0x3f   : > { %p1256_p2 = pmov %p1254_p7 }
  0x40   : > { %1021 = vsyncadd (%p1255_p8), [#allocation3], 4294967280 }
  0x41   : > { %1023 = dma.done.wait (%p1256_p2), [#allocation5], 16   ;;  %p1257_p3 = pmov %p1256_p2 }
  0x42   : > { %p292_p9 = scmp.lt.s32.totalorder %s1085_s25, 1  ;;  %v1032_v0 = vmov 0.0   ;;  %vm1033_vm0 = vmmov 0   ;;  %v944_v1 = vld [vmem:[%s1242_s1] sm:$0xff]   ;;  %v945_v2 = vld [vmem:[%s1242_s1 + $0x8] sm:$0xff]   ;;  %vm326_vm1 = vcmask 261120   ;;  %v370_v17 = vlaneseq }
  0x43   : > { %1025 = vsyncadd (%p1257_p3), [#allocation5], 4294967280  ;;  %864 = vmatprep.subr.bf16.mxu0 %v1032_v0  ;;  %868 = vmatprep.mubr.msk.bf16.mxu0 %vm1033_vm0, %v1032_v0  ;;  %v832_v5 = vld [vmem:[#allocation2] ss:$0 sm:$0xff]  ;;  %s1034_s18 = smov 112   ;;  %s1035_s19 = smov 96  }
  0x44   : > { %s1259_s25 = smov (!%p292_p9, %s1085_s25), 1  ;;  %872 = vmatprep.subr.bf16.mxu1 %v1032_v0  ;;  %874 = vmatprep.mubr.msk.bf16.mxu1 %vm1033_vm0, %v1032_v0  ;;  %s1036_s20 = smov 80   ;;  %vm379_vm2 = vcmask 130048   ;;  %v371_v18 = vshrl.u32 %v370_v17, 7  ;;  %v373_v19 = vand.u32 127, %v370_v17  ;;  %vm428_vm4 = vcmask 64512  }
  0x45   : > { %s830_s26 = sshll.u32 %s1259_s25, 3  ;;  %865 = vmatpush3.bf16.msra.mxu0 %v944_v1  ;;  %s1037_s21 = smov 64   ;;  %vm446_vm5 = vcmask 1043456   ;;  %v946_v56 = vld [vmem:[%s1244_s3] sm:$0xff]   ;;  %v947_v57 = vld [vmem:[%s1244_s3 + $0x8] sm:$0xff]  }
  0x46   : > { %s295_s13 = scalar_lea.vmem %s1241_s0, %s830_s26  ;;  %866 = vmatprep.subr.bf16.mxu0 %v1032_v0  ;;  %vm374_vm3 = vcmp.le.s32.totalorder %v373_v19, %v371_v18  ;;  %s1038_s22 = smov 48  }
  0x47   : > { %v1184_v3 = vld [vmem:[%s295_s13] sm:$0xff]  ;;  %s299_s13 = scalar_lea.vmem %s1248_s7, %s830_s26 }
  0x48   : > { %v302_v4 = vpack.c.bf16 %v1184_v3, %v1184_v3 }
  0x49   : > { %867 = vmatpush3.bf16.msra.mxu0 %v945_v2 }
  0x4a   : > { %878 = vmatprep.subr.bf16.mxu0 %v1032_v0 }
  0x4c   : > { %869 = vmatmul.mubr.msk.bf16.vlgmr.msra.gmra.mrb[0].mxu0 %vm326_vm1, %v302_v4 }
  0x4d   : > { %880 = vmatprep.mubr.msk.bf16.mxu0 %vm1033_vm0, %v1032_v0 }
 0x11f   : > { %v364_v6 = vpop.f32.mrb[0].mxu0 }
 0x120   : > { %v365_v7 = vadd.f32 %v832_v5, %v364_v6  ;;  %v870_v8 = vpop.f32.mrb[1].mxu0 }
 0x121   : > { %v367_v9 = vpop.f32.mrb[2].mxu0 }
 0x122   : > { %v375_v10 = vpack.c.bf16 %v365_v7, %v365_v7  ;;  %v871_v11 = vpop.f32.mrb[3].mxu0 }
 0x124   : > { %493 = vrot.lane.b32.xlu1 %v375_v10, %s1034_s18  ;;  %377 = vrot.lane.b32.xlu0 %v375_v10, %s1035_s19 }
 0x128   : > { %495 = vrot.lane.b32.xlu0 %v375_v10, %s1036_s20 }
 0x196   : > { %v378_v12 = vpop.permute.xlu0 %377  ;;  %v494_v16 = vpop.permute.xlu1 %493 }
 0x197   : > { %v384_v13 = vsel %vm379_vm2, %v378_v12, 0 }
 0x198   : > { %873 = vmatpush3.bf16.xpose.msra.mxu1 %v384_v13 }
 0x199   : > { %884 = vmatprep.subr.bf16.mxu1 %v1032_v0 }
 0x19a   : > { %v496_v14 = vpop.permute.xlu0 %495 }
 0x19b   : > { %v501_v15 = vsel %vm379_vm2, %v496_v14, 0 }
 0x19f   : > { %875 = vmatmul.mubr.msk.bf16.vlgmr.msra.gmra.mrb[0].mxu1 %vm379_vm2, %v375_v10 }
 0x1a0   : > { %885 = vmatpush3.bf16.xpose.msra.mxu1 %v501_v15  ;;  %886 = vmatprep.mubr.msk.bf16.mxu1 %vm1033_vm0, %v1032_v0 }
 0x1a1   : > { %896 = vmatprep.subr.bf16.mxu1 %v1032_v0 }
 0x1a7   : > { %887 = vmatmul.mubr.msk.bf16.vlgmr.msra.gmra.mrb[4].mxu1 %vm379_vm2, %v494_v16 }
 0x1a8   : > { %898 = vmatprep.mubr.msk.bf16.mxu1 %vm1033_vm0, %v1032_v0  ;;  %897 = vmatpush3.bf16.msra.mxu1 %v947_v57 }
 0x272   : > { %v420_v20 = vpop.f32.mrb[0].mxu1 }
 0x273   : > { %v426_v21 = vmul.f32 0.25, %v420_v20  ;;  %v876_v22 = vpop.f32.mrb[1].mxu1 }
 0x274   : > { %v423_v23 = vpop.f32.mrb[2].mxu1 }
 0x275   : > { %v877_v24 = vpop.f32.mrb[3].mxu1  ;;  %v427_v25 = vsel %vm374_vm3, %v426_v21, -1e+30 }
 0x276   : > { %v429_v26 = vsel %vm428_vm4, %v427_v25, -inf }
 0x277   : > { %430 = vmax.xlane.f32.xlu1 %v429_v26 }
 0x27a   : > { %v537_v27 = vpop.f32.mrb[4].mxu1 }
 0x27b   : > { %v543_v28 = vmul.f32 0.25, %v537_v27  ;;  %v888_v29 = vpop.f32.mrb[5].mxu1 }
 0x27c   : > { %v540_v30 = vpop.f32.mrb[6].mxu1 }
 0x27d   : > { %v889_v31 = vpop.f32.mrb[7].mxu1  ;;  %v544_v32 = vsel %vm374_vm3, %v543_v28, -1e+30  ;;  %v846_v28 = vld [vmem:[%s1247_s6] ss:$0 sm:$0xff] }
 0x27e   : > { %v545_v33 = vsel %vm428_vm4, %v544_v32, -inf }
 0x27f   : > { %546 = vmax.xlane.f32.xlu0 %v545_v33 }
 0x304   : > { %v431_v34 = vpop.xlane.xlu1 %430 }
 0x305   : > { %v432_v35 = vsub.f32 %v427_v25, %v431_v34 }
 0x307   : > { %v433_v36 = vmul.f32 1.442695, %v432_v35 }
 0x309   : > { %948 = vpow2.f32 %v433_v36 }
 0x30c   : > { %v547_v37 = vpop.xlane.xlu0 %546 }
 0x30d   : > { %v548_v38 = vsub.f32 %v544_v32, %v547_v37 }
 0x30f   : > { %v549_v39 = vmul.f32 1.442695, %v548_v38 }
 0x311   : > { %950 = vpow2.f32 %v549_v39 }
 0x313   : > { %v949_v40 = vpop.eup %948 }
 0x314   : > { %v435_v41 = vsel %vm428_vm4, %v949_v40, 0.0 }
 0x315   : > { %436 = vadd.xlane.f32.xlu0 %v435_v41 }
 0x31b   : > { %v951_v42 = vpop.eup %950 }
 0x31c   : > { %v551_v43 = vsel %vm428_vm4, %v951_v42, 0.0 }
 0x31d   : > { %552 = vadd.xlane.f32.xlu1 %v551_v43 }
 0x32b   : > { %441 = vrot.lane.b32.xlu0 %v375_v10, %s1037_s21 }
 0x32e   : > { %557 = vrot.lane.b32.xlu1 %v375_v10, %s1038_s22  ;;  %v844_v10 = vld [vmem:[#allocation4] ss:$0 sm:$0xff] }
 0x3a2   : > { %v437_v44 = vpop.xlane.xlu0 %436 }
 0x3a3   : > { %952 = vrcp.f32 %v437_v44 }
 0x3a6   : > { %v442_v45 = vpop.permute.xlu0 %441 }
 0x3a7   : > { %v448_v46 = vsel %vm446_vm5, %v442_v45, 0 }
 0x3a8   : > { %879 = vmatpush3.bf16.msra.mxu0 %v448_v46 }
 0x3a9   : > { %890 = vmatprep.subr.bf16.mxu0 %v1032_v0 }
 0x3aa   : > { %v553_v47 = vpop.xlane.xlu1 %552 }
 0x3ab   : > { %954 = vrcp.f32 %v553_v47 }
 0x3ad   : > { %v953_v48 = vpop.eup %952 }
 0x3ae   : > { %v439_v49 = vmul.f32 %v953_v48, %v949_v40  ;;  %v558_v50 = vpop.permute.xlu1 %557 }
 0x3af   : > { %v563_v52 = vsel %vm446_vm5, %v558_v50, 0 }
 0x3b0   : > { %v440_v51 = vpack.c.bf16 %v439_v49, %v439_v49 }
 0x3b2   : > { %881 = vmatmul.mubr.msk.bf16.vlgmr.msra.gmra.mrb[4].mxu0 %vm428_vm4, %v440_v51 }
 0x3b3   : > { %891 = vmatpush3.bf16.msra.mxu0 %v563_v52  ;;  %892 = vmatprep.mubr.msk.bf16.mxu0 %vm1033_vm0, %v1032_v0 }
 0x3b4   : > { %902 = vmatprep.subr.bf16.mxu0 %v1032_v0 }
 0x3b5   : > { %v955_v53 = vpop.eup %954 }
 0x3b6   : > { %v555_v54 = vmul.f32 %v955_v53, %v951_v42 }
 0x3b8   : > { %v556_v55 = vpack.c.bf16 %v555_v54, %v555_v54 }
 0x3ba   : > { %893 = vmatmul.mubr.msk.bf16.vlgmr.msra.gmra.mrb[8].mxu0 %vm428_vm4, %v556_v55 }
 0x3bb   : > { %904 = vmatprep.mubr.msk.bf16.mxu0 %vm1033_vm0, %v1032_v0  ;;  %903 = vmatpush3.bf16.msra.mxu0 %v946_v56 }
 0x485   : > { %v484_v58 = vpop.f32.mrb[4].mxu0 }
 0x486   : > { %v490_v59 = vpack.c.bf16 %v484_v58, %v484_v58  ;;  %v882_v60 = vpop.f32.mrb[5].mxu0 }
 0x487   : > { %v487_v61 = vpop.f32.mrb[6].mxu0 }
 0x488   : > { %v883_v62 = vpop.f32.mrb[7].mxu0  ;;  %905 = vmatmul.mubr.msk.bf16.vlgmr.msra.gmra.mrb[12].mxu0 %vm379_vm2, %v490_v59 }
 0x48d   : > { %v599_v63 = vpop.f32.mrb[8].mxu0 }
 0x48e   : > { %v605_v1 = vpack.c.bf16 %v599_v63, %v599_v63  ;;  %v894_v0 = vpop.f32.mrb[9].mxu0 }
 0x48f   : > { %v602_v2 = vpop.f32.mrb[10].mxu0 }
 0x490   : > { %v895_v4 = vpop.f32.mrb[11].mxu0  ;;  %899 = vmatmul.mubr.msk.bf16.vlgmr.msra.gmra.mrb[8].mxu1 %vm379_vm2, %v605_v1 }
 0x55b   : > { %v700_v5 = vpop.f32.mrb[12].mxu0 }
 0x55c   : > { %v906_v6 = vpop.f32.mrb[13].mxu0 }
 0x55d   : > { %v703_v7 = vpop.f32.mrb[14].mxu0 }
 0x55e   : > { %v907_v8 = vpop.f32.mrb[15].mxu0 }
 0x563   : > { %v651_v9 = vpop.f32.mrb[8].mxu1 }
 0x564   : > { %v701_v11 = vadd.f32 %v700_v5, %v651_v9  ;;  %v900_v12 = vpop.f32.mrb[9].mxu1 }
 0x565   : > { %v654_v13 = vpop.f32.mrb[10].mxu1 }
 0x566   : > { %v713_v14 = vadd.f32 %v844_v10, %v701_v11  ;;  %v901_v15 = vpop.f32.mrb[11].mxu1 }
 0x568   : > { %v714_v16 = vadd.f32 %v713_v14, %v1184_v3  ;;  %v845_v3 = vld [vmem:[%s1246_s5] ss:$0 sm:$0xff] }
 0x56a   : > { %v717_v17 = vsel %vm326_vm1, %v714_v16, 0.0 }
 0x56b   : > { %718 = vadd.xlane.f32.xlu1 %v717_v17 }
 0x5f8   : > { %v719_v18 = vpop.xlane.xlu1 %718 }
 0x5f9   : > { %v721_v19 = vmul.f32 0.03125, %v719_v18 }
 0x5fb   : > { %v722_v20 = vsub.f32 %v714_v16, %v721_v19 }
 0x5fd   : > { %v723_v21 = vmul.f32 %v722_v20, %v722_v20 }
 0x5ff   : > { %v724_v22 = vsel %vm326_vm1, %v723_v21, 0.0 }
 0x600   : > { %725 = vadd.xlane.f32.xlu0 %v724_v22 }
 0x68d   : > { %v726_v23 = vpop.xlane.xlu0 %725 }
 0x68e   : > { %v727_v24 = vmul.f32 0.03125, %v726_v23 }
 0x690   : > { %v728_v25 = vadd.f32 1e-05, %v727_v24 }
 0x692   : > { %956 = vrsqrt.f32 %v728_v25 }
 0x69c   : > { %v957_v26 = vpop.eup %956 }
 0x69d   : > { %v730_v27 = vmul.f32 %v957_v26, %v722_v20 }
 0x69f   : > { %v737_v29 = vmul.f32 %v845_v3, %v730_v27 }
 0x6a1   : > { %v744_v30 = vadd.f32 %v846_v28, %v737_v29 }
 0x6a3   : > { %745 = vst.msk [vmem:[%s299_s13] sm:$0xff] %vm326_vm1, %v744_v30 }
 0x6a4 PF: > { %s19_s24 = sadd.s32 1, %s1028_s24  }
 0x6a5   : > { %p16_p5 = scmp.ge.s32.totalorder %s19_s24, 4  }
 0x6a7   :  { %18 = sbr.rel (!%p16_p5) target bundleno = 2 (0x2), region = 87 }
 0x6ae   :  { %765 = vsyncpa [#allocation3], 1 }
 0x6af   :  { %767 = vsyncpa [#allocation3 + $0x1], 1 }
 0x6b0   :  { %768 = vsyncpa [#allocation5], 1 }

// kernel: decoder_forward.9
= control target key start
LH: loop header
LB: loop body
LE: loop exit
PB: predicated region body
PF: predicated region fallthrough
CT: control target
= control target key end

     0   :  { %s940_s24 = smov 0   ;;  %s1031_s0 = inlined_call_operand.vmem [shape: f32[2,8,32], index: 0, kind: input, shape index: {}]   ;;  %s1032_s1 = inlined_call_operand.vmem [shape: bf16[32,96], index: 1, kind: input, shape index: {}]   ;;  %s1033_s2 = inlined_call_operand.vmem [shape: f32[1,96], index: 2, kind: input, shape index: {}]   ;;  %s1034_s3 = inlined_call_operand.vmem [shape: bf16[32,32], index: 3, kind: input, shape index: {}]   ;;  %s1035_s4 = inlined_call_operand.vmem [shape: f32[1,32], index: 4, kind: input, shape index: {}]   ;;  %s1036_s5 = inlined_call_operand.vmem [shape: f32[1,32], index: 5, kind: input, shape index: {}]   ;;  %s1037_s6 = inlined_call_operand.vmem [shape: f32[1,32], index: 6, kind: input, shape index: {}]   ;;  %s1038_s7 = inlined_call_operand.vmem [shape: f32[2,8,32], index: 7, kind: output, shape index: {}]  }
   0x1 LB: > { %s773_s25 = sadd.s32 4294967295, %s891_s24   ;;  %p777_p0 = scmp.ge.s32.totalorder %s891_s24, 1  ;;  %s891_s24 = sphi %s940_s24, %s17_s24  }
   0x2   : > { %p236_p1 = scmp.lt.s32.totalorder %s891_s24, 3 }
   0x4   : > { %p237_p2 = pnand %p777_p0, %p236_p1 }
   0x5   : > { %v871_v0 = vld [vmem:[%s1032_s1] sm:$0xff] (!%p237_p2)   ;;  %v893_v1 = vmov (!%p237_p2), 0.0   ;;  %v872_v2 = vld [vmem:[%s1032_s1 + $0x8] sm:$0xff] (!%p237_p2)   ;;  %vm894_vm0 = vmmov (!%p237_p2), 0   ;;  %p266_p3 = scmp.lt.s32.totalorder (!%p237_p2), %s773_s25, 1  ;;  %vm300_vm1 = vcmask (!%p237_p2), 261120   ;;  %v344_v17 = vlaneseq (!%p237_p2) }
   0x6   : > { %240 = sbr.rel (%p237_p2) target bundleno = 1643 (0x66b), region = 48  ;;  %812 = vmatprep.subr.bf16.mxu0 (!%p237_p2), %v893_v1  ;;  %820 = vmatprep.subr.bf16.mxu1 (!%p237_p2), %v893_v1  ;;  %v780_v5 = vld [vmem:[%s1033_s2] ss:$0 sm:$0xff] (!%p237_p2)  ;;  %s895_s13 = smov (!%p237_p2), 112   ;;  %vm353_vm2 = vcmask (!%p237_p2), 130048   ;;  %vm402_vm4 = vcmask (!%p237_p2), 64512  }
   0x7   : > { %813 = vmatpush3.bf16.msra.mxu0 (!%p237_p2), %v871_v0  ;;  %816 = vmatprep.mubr.msk.bf16.mxu0 (!%p237_p2), %vm894_vm0, %v893_v1  ;;  %s896_s14 = smov (!%p237_p2), 96   ;;  %s897_s15 = smov (!%p237_p2), 80   ;;  %v345_v18 = vshrl.u32 (!%p237_p2), %v344_v17, 7  ;;  %v347_v19 = vand.u32 (!%p237_p2), 127, %v344_v17  ;;  %vm420_vm5 = vcmask (!%p237_p2), 1043456   ;;  %v873_v56 = vld [vmem:[%s1034_s3] sm:$0xff] (!%p237_p2)  }
   0x8   : > { %814 = vmatprep.subr.bf16.mxu0 (!%p237_p2), %v893_v1  ;;  %822 = vmatprep.mubr.msk.bf16.mxu1 (!%p237_p2), %vm894_vm0, %v893_v1  ;;  %s898_s16 = smov (!%p237_p2), 64   ;;  %s899_s17 = smov (!%p237_p2), 48   ;;  %v874_v57 = vld [vmem:[%s1034_s3 + $0x8] sm:$0xff] (!%p237_p2)  }
   0x9   : > { %vm348_vm3 = vcmp.le.s32.totalorder (!%p237_p2), %v347_v19, %v345_v18 }
   0xb   : > { %815 = vmatpush3.bf16.msra.mxu0 (!%p237_p2), %v872_v2 }
   0xc   : > { %826 = vmatprep.subr.bf16.mxu0 (!%p237_p2), %v893_v1 }
   0xd   : > { %s1040_s25 = smov (!%p266_p3, %s773_s25), 1 }
   0xe   : > { %s778_s30 = sshll.u32 %s1040_s25, 3 }
   0xf   : > { %s269_s10 = scalar_lea.vmem %s1031_s0, %s778_s30 }
  0x10   : > { %v970_v3 = vld [vmem:[%s269_s10] sm:$0xff]  ;;  %s273_s10 = scalar_lea.vmem %s1038_s7, %s778_s30 }
  0x11   : > { %v276_v4 = vpack.c.bf16 %v970_v3, %v970_v3 }
  0x13   : > { %817 = vmatmul.mubr.msk.bf16.vlgmr.msra.gmra.mrb[0].mxu0 %vm300_vm1, %v276_v4 }
  0x14   : > { %828 = vmatprep.mubr.msk.bf16.mxu0 %vm894_vm0, %v893_v1 }
  0xe6   : > { %v338_v6 = vpop.f32.mrb[0].mxu0 }
  0xe7   : > { %v339_v7 = vadd.f32 %v780_v5, %v338_v6  ;;  %v818_v8 = vpop.f32.mrb[1].mxu0 }
  0xe8   : > { %v341_v9 = vpop.f32.mrb[2].mxu0 }
  0xe9   : > { %v349_v10 = vpack.c.bf16 %v339_v7, %v339_v7  ;;  %v819_v11 = vpop.f32.mrb[3].mxu0 }
  0xeb   : > { %467 = vrot.lane.b32.xlu1 %v349_v10, %s895_s13  ;;  %351 = vrot.lane.b32.xlu0 %v349_v10, %s896_s14 }
  0xef   : > { %469 = vrot.lane.b32.xlu0 %v349_v10, %s897_s15 }
 0x15d   : > { %v352_v12 = vpop.permute.xlu0 %351  ;;  %v468_v16 = vpop.permute.xlu1 %467 }
 0x15e   : > { %v358_v13 = vsel %vm353_vm2, %v352_v12, 0 }
 0x15f   : > { %821 = vmatpush3.bf16.xpose.msra.mxu1 %v358_v13 }
 0x160   : > { %832 = vmatprep.subr.bf16.mxu1 %v893_v1 }
 0x161   : > { %v470_v14 = vpop.permute.xlu0 %469 }
 0x162   : > { %v475_v15 = vsel %vm353_vm2, %v470_v14, 0 }
 0x166   : > { %823 = vmatmul.mubr.msk.bf16.vlgmr.msra.gmra.mrb[0].mxu1 %vm353_vm2, %v349_v10 }
 0x167   : > { %833 = vmatpush3.bf16.xpose.msra.mxu1 %v475_v15  ;;  %834 = vmatprep.mubr.msk.bf16.mxu1 %vm894_vm0, %v893_v1 }
 0x168   : > { %844 = vmatprep.subr.bf16.mxu1 %v893_v1 }
 0x16e   : > { %835 = vmatmul.mubr.msk.bf16.vlgmr.msra.gmra.mrb[4].mxu1 %vm353_vm2, %v468_v16 }
 0x16f   : > { %846 = vmatprep.mubr.msk.bf16.mxu1 %vm894_vm0, %v893_v1  ;;  %845 = vmatpush3.bf16.msra.mxu1 %v874_v57 }
 0x239   : > { %v394_v20 = vpop.f32.mrb[0].mxu1 }
 0x23a   : > { %v400_v21 = vmul.f32 0.25, %v394_v20  ;;  %v824_v22 = vpop.f32.mrb[1].mxu1 }
 0x23b   : > { %v397_v23 = vpop.f32.mrb[2].mxu1 }
 0x23c   : > { %v825_v24 = vpop.f32.mrb[3].mxu1  ;;  %v401_v25 = vsel %vm348_vm3, %v400_v21, -1e+30 }
 0x23d   : > { %v403_v26 = vsel %vm402_vm4, %v401_v25, -inf }
 0x23e   : > { %404 = vmax.xlane.f32.xlu1 %v403_v26 }
 0x241   : > { %v511_v27 = vpop.f32.mrb[4].mxu1 }
 0x242   : > { %v517_v28 = vmul.f32 0.25, %v511_v27  ;;  %v836_v29 = vpop.f32.mrb[5].mxu1 }
 0x243   : > { %v514_v30 = vpop.f32.mrb[6].mxu1 }
 0x244   : > { %v837_v31 = vpop.f32.mrb[7].mxu1  ;;  %v518_v32 = vsel %vm348_vm3, %v517_v28, -1e+30  ;;  %v794_v28 = vld [vmem:[%s1037_s6] ss:$0 sm:$0xff] }
 0x245   : > { %v519_v33 = vsel %vm402_vm4, %v518_v32, -inf }
 0x246   : > { %520 = vmax.xlane.f32.xlu0 %v519_v33 }
 0x2cb   : > { %v405_v34 = vpop.xlane.xlu1 %404 }
 0x2cc   : > { %v406_v35 = vsub.f32 %v401_v25, %v405_v34 }
 0x2ce   : > { %v407_v36 = vmul.f32 1.442695, %v406_v35 }
 0x2d0   : > { %875 = vpow2.f32 %v407_v36 }
 0x2d3   : > { %v521_v37 = vpop.xlane.xlu0 %520 }
 0x2d4   : > { %v522_v38 = vsub.f32 %v518_v32, %v521_v37 }
 0x2d6   : > { %v523_v39 = vmul.f32 1.442695, %v522_v38 }
 0x2d8   : > { %877 = vpow2.f32 %v523_v39 }
 0x2da   : > { %v876_v40 = vpop.eup %875 }
 0x2db   : > { %v409_v41 = vsel %vm402_vm4, %v876_v40, 0.0 }
 0x2dc   : > { %410 = vadd.xlane.f32.xlu0 %v409_v41 }
 0x2e2   : > { %v878_v42 = vpop.eup %877 }
 0x2e3   : > { %v525_v43 = vsel %vm402_vm4, %v878_v42, 0.0 }
 0x2e4   : > { %526 = vadd.xlane.f32.xlu1 %v525_v43 }
 0x2f2   : > { %415 = vrot.lane.b32.xlu0 %v349_v10, %s898_s16 }
 0x2f5   : > { %531 = vrot.lane.b32.xlu1 %v349_v10, %s899_s17  ;;  %v792_v10 = vld [vmem:[%s1035_s4] ss:$0 sm:$0xff] }
 0x369   : > { %v411_v44 = vpop.xlane.xlu0 %410 }
 0x36a   : > { %879 = vrcp.f32 %v411_v44 }
 0x36d   : > { %v416_v45 = vpop.permute.xlu0 %415 }
 0x36e   : > { %v422_v46 = vsel %vm420_vm5, %v416_v45, 0 }
 0x36f   : > { %827 = vmatpush3.bf16.msra.mxu0 %v422_v46 }
 0x370   : > { %838 = vmatprep.subr.bf16.mxu0 %v893_v1 }
 0x371   : > { %v527_v47 = vpop.xlane.xlu1 %526 }
 0x372   : > { %881 = vrcp.f32 %v527_v47 }
 0x374   : > { %v880_v48 = vpop.eup %879 }
 0x375   : > { %v413_v49 = vmul.f32 %v880_v48, %v876_v40  ;;  %v532_v50 = vpop.permute.xlu1 %531 }
 0x376   : > { %v537_v52 = vsel %vm420_vm5, %v532_v50, 0 }
 0x377   : > { %v414_v51 = vpack.c.bf16 %v413_v49, %v413_v49 }
 0x379   : > { %829 = vmatmul.mubr.msk.bf16.vlgmr.msra.gmra.mrb[4].mxu0 %vm402_vm4, %v414_v51 }
 0x37a   : > { %839 = vmatpush3.bf16.msra.mxu0 %v537_v52  ;;  %840 = vmatprep.mubr.msk.bf16.mxu0 %vm894_vm0, %v893_v1 }
 0x37b   : > { %850 = vmatprep.subr.bf16.mxu0 %v893_v1 }
 0x37c   : > { %v882_v53 = vpop.eup %881 }
 0x37d   : > { %v529_v54 = vmul.f32 %v882_v53, %v878_v42 }
 0x37f   : > { %v530_v55 = vpack.c.bf16 %v529_v54, %v529_v54 }
 0x381   : > { %841 = vmatmul.mubr.msk.bf16.vlgmr.msra.gmra.mrb[8].mxu0 %vm402_vm4, %v530_v55 }
 0x382   : > { %852 = vmatprep.mubr.msk.bf16.mxu0 %vm894_vm0, %v893_v1  ;;  %851 = vmatpush3.bf16.msra.mxu0 %v873_v56 }
 0x44c   : > { %v458_v58 = vpop.f32.mrb[4].mxu0 }
 0x44d   : > { %v464_v59 = vpack.c.bf16 %v458_v58, %v458_v58  ;;  %v830_v60 = vpop.f32.mrb[5].mxu0 }
 0x44e   : > { %v461_v61 = vpop.f32.mrb[6].mxu0 }
 0x44f   : > { %v831_v62 = vpop.f32.mrb[7].mxu0  ;;  %853 = vmatmul.mubr.msk.bf16.vlgmr.msra.gmra.mrb[12].mxu0 %vm353_vm2, %v464_v59 }
 0x454   : > { %v573_v63 = vpop.f32.mrb[8].mxu0 }
 0x455   : > { %v579_v0 = vpack.c.bf16 %v573_v63, %v573_v63  ;;  %v842_v1 = vpop.f32.mrb[9].mxu0 }
 0x456   : > { %v576_v2 = vpop.f32.mrb[10].mxu0 }
 0x457   : > { %v843_v4 = vpop.f32.mrb[11].mxu0  ;;  %847 = vmatmul.mubr.msk.bf16.vlgmr.msra.gmra.mrb[8].mxu1 %vm353_vm2, %v579_v0 }
 0x522   : > { %v674_v5 = vpop.f32.mrb[12].mxu0 }
 0x523   : > { %v854_v6 = vpop.f32.mrb[13].mxu0 }
 0x524   : > { %v677_v7 = vpop.f32.mrb[14].mxu0 }
 0x525   : > { %v855_v8 = vpop.f32.mrb[15].mxu0 }
 0x52a   : > { %v625_v9 = vpop.f32.mrb[8].mxu1 }
 0x52b   : > { %v675_v11 = vadd.f32 %v674_v5, %v625_v9  ;;  %v848_v12 = vpop.f32.mrb[9].mxu1 }
 0x52c   : > { %v628_v13 = vpop.f32.mrb[10].mxu1 }
 0x52d   : > { %v687_v14 = vadd.f32 %v792_v10, %v675_v11  ;;  %v849_v15 = vpop.f32.mrb[11].mxu1 }
 0x52f   : > { %v688_v16 = vadd.f32 %v687_v14, %v970_v3  ;;  %v793_v3 = vld [vmem:[%s1036_s5] ss:$0 sm:$0xff] }
 0x531   : > { %v691_v17 = vsel %vm300_vm1, %v688_v16, 0.0 }
 0x532   : > { %692 = vadd.xlane.f32.xlu1 %v691_v17 }
 0x5bf   : > { %v693_v18 = vpop.xlane.xlu1 %692 }
 0x5c0   : > { %v695_v19 = vmul.f32 0.03125, %v693_v18 }
 0x5c2   : > { %v696_v20 = vsub.f32 %v688_v16, %v695_v19 }
 0x5c4   : > { %v697_v21 = vmul.f32 %v696_v20, %v696_v20 }
 0x5c6   : > { %v698_v22 = vsel %vm300_vm1, %v697_v21, 0.0 }
 0x5c7   : > { %699 = vadd.xlane.f32.xlu0 %v698_v22 }
 0x654   : > { %v700_v23 = vpop.xlane.xlu0 %699 }
 0x655   : > { %v701_v24 = vmul.f32 0.03125, %v700_v23 }
 0x657   : > { %v702_v25 = vadd.f32 1e-05, %v701_v24 }
 0x659   : > { %883 = vrsqrt.f32 %v702_v25 }
 0x663   : > { %v884_v26 = vpop.eup %883 }
 0x664   : > { %v704_v27 = vmul.f32 %v884_v26, %v696_v20 }
 0x666   : > { %v711_v29 = vmul.f32 %v793_v3, %v704_v27 }
 0x668   : > { %v718_v30 = vadd.f32 %v794_v28, %v711_v29 }
 0x66a   : > { %719 = vst.msk [vmem:[%s273_s10] sm:$0xff] %vm300_vm1, %v718_v30 }
 0x66b PF: > { %s17_s24 = sadd.s32 1, %s891_s24  }
 0x66c   : > { %p14_p4 = scmp.ge.s32.totalorder %s17_s24, 4  }
 0x66e   :  { %16 = sbr.rel (!%p14_p4) target bundleno = 1 (0x1), region = 78 }

// kernel: decoder_forward.11
= control target key start
LH: loop header
LB: loop body
LE: loop exit
PB: predicated region body
PF: predicated region fallthrough
CT: control target
= control target key end

     0   :  { %12 = vsyncpa [#allocation3], 0  ;;  %s874_s0 = inlined_call_operand.vmem [shape: f32[2,8,32], index: 0, kind: input, shape index: {}]   ;;  %s875_s1 = inlined_call_operand.vmem [shape: bf16[32,64], index: 1, kind: input, shape index: {}]   ;;  %s876_s2 = inlined_call_operand.vmem [shape: f32[1,64], index: 2, kind: input, shape index: {}]   ;;  %s877_s3 = inlined_call_operand.vmem [shape: bf16[64,32], index: 3, kind: input, shape index: {}]   ;;  %s878_s4 = inlined_call_operand.vmem [shape: f32[1,32], index: 4, kind: input, shape index: {}]   ;;  %s879_s5 = inlined_call_operand.vmem [shape: f32[1,32], index: 5, kind: input, shape index: {}]   ;;  %s880_s6 = inlined_call_operand.vmem [shape: f32[1,32], index: 6, kind: input, shape index: {}]   ;;  %s881_s7 = inlined_call_operand.hbm [shape: f32[2,8,32], index: 7, kind: output, shape index: {}]  }
   0x1   :  { %14 = vsyncpa [#allocation3 + $0x1], 0  ;;  %s740_s24 = smov 0   ;;  %s742_s25 = smov 0  }
   0x2   :  { %s744_s26 = smov 0   ;;  %s746_s27 = smov 0  }
   0x3 LB: > { %s761_s28 = sadd.s32 4294967295, %s695_s27   ;;  %s534_s29 = sadd.s32 4294967294, %s695_s27   ;;  %s695_s27 = sphi %s746_s27, %s887_s27   ;;  %s691_s26 = sphi %s744_s26, %s886_s26   ;;  %s687_s25 = sphi %s742_s25, %s885_s25   ;;  %s683_s24 = sphi %s740_s24, %s884_s24  }
   0x4   : > { %s765_s30 = sadd.s32 1, %s695_s27   ;;  %s179_s8 = sadd.s32 1, %s691_s26 }
   0x5   : > { %s176_s9 = ssub.s32 %s695_s27, %s765_s30  ;;  %p189_p0 = scmp.ne.s32.totalorder %s691_s26, %s687_s25 }
   0x6   : > { %p177_p1 = scmp.eq.s32.totalorder %s176_s9, 0  ;;  %p190_p2 = scmp.eq.s32.totalorder %s761_s28, 1 }
   0x7   : > { %p195_p3 = scmp.ne.s32.totalorder %s687_s25, %s683_s24  ;;  %p196_p4 = scmp.eq.s32.totalorder %s534_s29, 1 }
   0x8   : > { %s776_s10 = scalar_select %p177_p1, %s691_s26, %s179_s8  }
   0x9   : > { %p778_p5 = por %p190_p2, %p189_p0  ;;  %p782_p6 = por %p196_p4, %p195_p3 }
   0xa   : > { %p537_p7 = scmp.ge.s32.totalorder %s695_s27, 1  ;;  %p239_p8 = scmp.lt.s32.totalorder %s695_s27, 3 }
   0xc   : > { %p240_p9 = pnand %p537_p7, %p239_p8 }
   0xd   : > { %v625_v0 = vld [vmem:[%s875_s1] sm:$0xff] (!%p240_p9)   ;;  %v697_v1 = vmov (!%p240_p9), 0.0   ;;  %v626_v2 = vld [vmem:[%s875_s1 + $0x8] sm:$0xff] (!%p240_p9)   ;;  %vm698_vm0 = vmmov (!%p240_p9), 0   ;;  %p270_p10 = scmp.lt.s32.totalorder (!%p240_p9), %s761_s28, 1  ;;  %vm300_vm1 = vcmask (!%p240_p9), 261120  }
   0xe   : > { %243 = sbr.rel (%p240_p9) target bundleno = 789 (0x315), region = 48  ;;  %564 = vmatprep.subr.bf16.mxu0 (!%p240_p9), %v697_v1  ;;  %572 = vmatprep.subr.bf16.mxu1 (!%p240_p9), %v697_v1  ;;  %v627_v3 = vld [vmem:[%s877_s3] sm:$0xff] (!%p240_p9)   ;;  %v628_v4 = vld [vmem:[%s877_s3 + $0x8] sm:$0xff] (!%p240_p9)   ;;  %v629_v7 = vld [vmem:[%s877_s3 + $0x10] sm:$0xff] (!%p240_p9)   ;;  %vm385_vm2 = vcmask (!%p240_p9), 523264   ;;  %s267_s20 = sand.u32 (!%p240_p9), 1, %s687_s25  }
   0xf   : > { %565 = vmatpush3.bf16.msra.mxu0 (!%p240_p9), %v625_v0  ;;  %568 = vmatprep.mubr.msk.bf16.mxu0 (!%p240_p9), %vm698_vm0, %v697_v1  ;;  %v630_v8 = vld [vmem:[%s877_s3 + $0x18] sm:$0xff] (!%p240_p9)   ;;  %v540_v9 = vld [vmem:[%s876_s2] ss:$0 sm:$0xff] (!%p240_p9)  ;;  %s538_s21 = sshll.u32 (!%p240_p9), %s267_s20, 3  ;;  %s553_s9 = sshll.u32 (!%p240_p9), %s761_s28, 7 }
  0x10   : > { %566 = vmatprep.subr.bf16.mxu0 (!%p240_p9), %v697_v1  ;;  %580 = vmatprep.mubr.msk.bf16.mxu1 (!%p240_p9), %vm698_vm0, %v697_v1  ;;  %v544_v17 = vld [vmem:[%s878_s4] ss:$0 sm:$0xff] (!%p240_p9)  ;;  %s269_s13 = scalar_lea.vmem (!%p240_p9), [#allocation2], %s538_s21  ;;  %s831_s17 = scalar_lea.hbm (!%p240_p9), %s881_s7, %s553_s9 }
  0x11   : > { %573 = vmatpush3.bf16.msra.mxu1 (!%p240_p9), %v627_v3  ;;  %v550_v34 = vld [vmem:[%s879_s5] ss:$0 sm:$0xff] (!%p240_p9)  ;;  %s475_s14 = sshll.u32 (!%p240_p9), %s269_s13, 4  ;;  %s462_s18 = scalar_lea.sflag (!%p240_p9), [#allocation3], %s267_s20  ;;  %s833_s14 = int_to_ptr.vmem [resolvable:$true] %s475_s14 }
  0x12   : > { %574 = vmatprep.subr.bf16.mxu1 (!%p240_p9), %v697_v1  ;;  %v551_v36 = vld [vmem:[%s880_s6] ss:$0 sm:$0xff] (!%p240_p9) }
  0x13   : > { %567 = vmatpush3.bf16.msra.mxu0 (!%p240_p9), %v626_v2 }
  0x15   : > { %s271_s19 = scalar_select %p270_p10, %s761_s28, 1  ;;  %575 = vmatpush3.bf16.msra.mxu1 %v628_v4 }
  0x16   : > { %576 = vmatprep.subr.bf16.mxu1 %v697_v1  ;;  %s699_s28 = smov [#allocation2]  }
  0x17   : > { %s539_s22 = sshll.u32 %s271_s19, 3  ;;  %s633_s19 = scalar_lea.vmem %s833_s14, 128 }
  0x18   : > { %s273_s8 = scalar_lea.vmem %s874_s0, %s539_s22  ;;  %p634_p11 = scmp.ne.s32.totalorder %s833_s14, %s633_s19 }
  0x19   : > { %v275_v5 = vld [vmem:[%s273_s8] sm:$0xff]  ;;  %577 = vmatpush3.bf16.msra.mxu1 %v629_v7  ;;  %s637_s21 = sshll.u32 %s699_s28, 4  ;;  %s638_s21 = int_to_ptr.vmem [resolvable:$false] %s637_s21 }
  0x1a   : > { %v276_v6 = vpack.c.bf16 %v275_v5, %v275_v5  ;;  %578 = vmatprep.subr.bf16.mxu1 %v697_v1  ;;  %p635_p12 = pnand %p634_p11, %p778_p5  ;;  %s639_s22 = scalar_lea.vmem %s638_s21, 256 }
  0x1b   : > { %p640_p0 = scmp.lt.s32.totalorder %s833_s14, %s638_s21  ;;  %p641_p1 = scmp.lt.s32.totalorder %s639_s22, %s633_s19 }
  0x1c   : > { %569 = vmatmul.mubr.msk.bf16.vlgmr.msra.gmra.mrb[0].mxu0 %vm300_vm1, %v276_v6  ;;  %p636_p13 = pneg %p635_p12 }
  0x1d   : > { %579 = vmatpush3.bf16.msra.mxu1 %v630_v8  ;;  %p642_p2 = por %p641_p1, %p640_p0 }
  0x1f   : > { %p643_p3 = pnand %p642_p2, %p636_p13 }
  0xef   : > { %v338_v10 = vpop.f32.mrb[0].mxu0 }
  0xf0   : > { %v339_v11 = vadd.f32 %v540_v9, %v338_v10  ;;  %v570_v12 = vpop.f32.mrb[1].mxu0 }
  0xf1   : > { %v341_v13 = vpop.f32.mrb[2].mxu0 }
  0xf2   : > { %v344_v14 = vmax.f32 %v339_v11, 0.0  ;;  %v571_v15 = vpop.f32.mrb[3].mxu0 }
  0xf4   : > { %v345_v16 = vpack.c.bf16 %v344_v14, %v344_v14 }
  0xf6   : > { %581 = vmatmul.mubr.msk.bf16.vlgmr.msra.gmra.mrb[0].mxu1 %vm385_vm2, %v345_v16 }
 0x1c9   : > { %v423_v18 = vpop.f32.mrb[0].mxu1 }
 0x1ca   : > { %v424_v19 = vadd.f32 %v544_v17, %v423_v18  ;;  %v582_v20 = vpop.f32.mrb[1].mxu1 }
 0x1cb   : > { %v426_v21 = vpop.f32.mrb[2].mxu1 }
 0x1cc   : > { %v583_v22 = vpop.f32.mrb[3].mxu1  ;;  %v429_v23 = vadd.f32 %v424_v19, %v275_v5 }
 0x1ce   : > { %v432_v24 = vsel %vm300_vm1, %v429_v23, 0.0 }
 0x1cf   : > { %433 = vadd.xlane.f32.xlu0 %v432_v24 }
 0x25c   : > { %v434_v25 = vpop.xlane.xlu0 %433 }
 0x25d   : > { %v436_v26 = vmul.f32 0.03125, %v434_v25 }
 0x25f   : > { %v437_v27 = vsub.f32 %v429_v23, %v436_v26 }
 0x261   : > { %v438_v28 = vmul.f32 %v437_v27, %v437_v27 }
 0x263   : > { %v439_v29 = vsel %vm300_vm1, %v438_v28, 0.0 }
 0x264   : > { %440 = vadd.xlane.f32.xlu0 %v439_v29 }
 0x2f1   : > { %v441_v30 = vpop.xlane.xlu0 %440 }
 0x2f2   : > { %v442_v31 = vmul.f32 0.03125, %v441_v30 }
 0x2f4   : > { %v443_v32 = vadd.f32 1e-05, %v442_v31 }
 0x2f6   : > { %631 = vrsqrt.f32 %v443_v32 }
 0x300   : > { %v632_v33 = vpop.eup %631 }
 0x301   : > { %v445_v35 = vmul.f32 %v632_v33, %v437_v27 }
 0x303   : > { %v452_v37 = vmul.f32 %v550_v34, %v445_v35 }
 0x305   : > { %v459_v38 = vadd.f32 %v551_v36, %v452_v37 }
 0x307   : > { %460 = vst.msk [vmem:[%s269_s13] sm:$0xff] %vm300_vm1, %v459_v38 }
 0x308   : > { %646 = shalt.err (!%p643_p3)
}
 0x309   : > { %s647_s20 = scalar_lea.hbm %s831_s17, 128  ;;  %s651_s8 = scalar_lea.hbm %s881_s7, 256 }
 0x30a   : > { %p648_p4 = scmp.ne.s32.totalorder %s831_s17, %s647_s20  ;;  %p652_p9 = scmp.lt.u32.totalorder %s831_s17, %s881_s7 }
 0x30b   : > { %p653_p10 = scmp.lt.u32.totalorder %s651_s8, %s647_s20  ;;  %p655_p12 = scmp.lt.u32.totalorder %s647_s20, %s831_s17 }
 0x30c   : > { %p649_p7 = pnand %p648_p4, %p778_p5 }
 0x30d   : > { %p654_p11 = por %p653_p10, %p652_p9 }
 0x30e   : > { %p650_p8 = pneg %p649_p7 }
 0x30f   : > { %p656_p13 = por %p655_p12, %p654_p11 }
 0x311   : > { %p657_p0 = pnand %p656_p13, %p650_p8 }
 0x313   : > { %660 = shalt.err (!%p657_p0)
}
 0x314   : > { %584 = dma.vmem_to_hbm [thread:$0]  (%p778_p5), %s833_s14, 128, %s831_s17, %s462_s18  }
 0x315 PF: > { %p590_p1 = scmp.ge.s32.totalorder %s695_s27, 2  ;;  %s487_s15 = sand.u32 1, %s683_s24  }
 0x316   : > { %s488_s16 = scalar_lea.sflag [#allocation3], %s487_s15 }
 0x317   : > { %p587_p2 = pnand %p590_p1, %p782_p6 }
 0x319   : > { %678 = dma.done.wait (!%p587_p2), %s488_s16, 128  }
 0x31a   : > { %680 = vsyncadd (!%p587_p2), %s488_s16, 4294967168  ;;  %p17_p3 = scmp.ge.s32.totalorder %s765_s30, 4   ;;  %s884_s24 = smov %s687_s25 }
 0x31b   : > { %s885_s25 = smov %s691_s26  ;;  %s886_s26 = smov %s776_s10 }
 0x31c   : > { %s887_s27 = smov %s765_s30  ;;  %19 = sbr.rel (!%p17_p3) target bundleno = 3 (0x3), region = 83 }
 0x323   :  { %493 = vsyncpa [#allocation3], 1 }
 0x324   :  { %495 = vsyncpa [#allocation3 + $0x1], 1 }

// kernel: decoder_forward.10
= control target key start
LH: loop header
LB: loop body
LE: loop exit
PB: predicated region body
PF: predicated region fallthrough
CT: control target
= control target key end

     0   :  { %s1155_s13 = smov 0   ;;  %s1267_s0 = inlined_call_operand.vmem [shape: f32[2,8,32], index: 0, kind: input, shape index: {}]   ;;  %s1268_s1 = inlined_call_operand.vmem [shape: f32[2,16,48], index: 1, kind: input, shape index: {}]   ;;  %s1269_s2 = inlined_call_operand.vmem [shape: bf16[32,32], index: 2, kind: input, shape index: {}]   ;;  %s1270_s3 = inlined_call_operand.vmem [shape: f32[1,32], index: 3, kind: input, shape index: {}]   ;;  %s1271_s4 = inlined_call_operand.vmem [shape: bf16[48,64], index: 4, kind: input, shape index: {}]   ;;  %s1272_s5 = inlined_call_operand.vmem [shape: f32[1,64], index: 5, kind: input, shape index: {}]   ;;  %s1273_s6 = inlined_call_operand.vmem [shape: bf16[32,32], index: 6, kind: input, shape index: {}]   ;;  %s1274_s7 = inlined_call_operand.vmem [shape: f32[1,32], index: 7, kind: input, shape index: {}]   ;;  %s1275_s8 = inlined_call_operand.vmem [shape: f32[1,32], index: 8, kind: input, shape index: {}]   ;;  %s1276_s9 = inlined_call_operand.vmem [shape: f32[1,32], index: 9, kind: input, shape index: {}]   ;;  %s1277_s10 = inlined_call_operand.vmem [shape: f32[2,8,32], index: 10, kind: output, shape index: {}]  }
   0x1 LB: > { %s952_s14 = sadd.s32 4294967295, %s1093_s13   ;;  %p956_p0 = scmp.ge.s32.totalorder %s1093_s13, 1  ;;  %s1093_s13 = sphi %s1155_s13, %s20_s13  }
   0x2   : > { %p321_p1 = scmp.lt.s32.totalorder %s1093_s13, 3 }
   0x4   : > { %p322_p2 = pnand %p956_p0, %p321_p1 }
   0x5   : > { %v1070_v0 = vld [vmem:[%s1271_s4] sm:$0xff] (!%p322_p2)   ;;  %v1095_v1 = vmov (!%p322_p2), 0.0   ;;  %v1071_v2 = vld [vmem:[%s1271_s4 + $0x8] sm:$0xff] (!%p322_p2)   ;;  %vm1096_vm0 = vmmov (!%p322_p2), 0   ;;  %p362_p3 = scmp.lt.s32.totalorder (!%p322_p2), %s952_s14, 1  ;;  %v1072_v4 = vld [vmem:[%s1271_s4 + $0x10] sm:$0xff] (!%p322_p2)  }
   0x6   : > { %325 = sbr.rel (%p322_p2) target bundleno = 1636 (0x664), region = 60  ;;  %1011 = vmatprep.subr.bf16.mxu1 (!%p322_p2), %v1095_v1  ;;  %1003 = vmatprep.subr.bf16.mxu0 (!%p322_p2), %v1095_v1  ;;  %v1073_v3 = vld [vmem:[%s1269_s2] sm:$0xff] (!%p322_p2)   ;;  %v1074_v5 = vld [vmem:[%s1269_s2 + $0x8] sm:$0xff] (!%p322_p2)   ;;  %vm403_vm1 = vcmask (!%p322_p2), 261120   ;;  %vm479_vm2 = vcmask (!%p322_p2), 392192   ;;  %vm526_vm3 = vcmask (!%p322_p2), 130048  }
   0x7   : > { %1012 = vmatpush3.bf16.msra.mxu1 (!%p322_p2), %v1070_v0  ;;  %1017 = vmatprep.mubr.msk.bf16.mxu1 (!%p322_p2), %vm1096_vm0, %v1095_v1  ;;  %v965_v12 = vld [vmem:[%s1272_s5] ss:$0 sm:$0xff] (!%p322_p2)  ;;  %s1097_s19 = smov (!%p322_p2), 112   ;;  %s1098_s20 = smov (!%p322_p2), 96   ;;  %v1076_v57 = vld [vmem:[%s1273_s6 + $0x8] sm:$0xff] (!%p322_p2)  }
   0x8   : > { %1013 = vmatprep.subr.bf16.mxu1 (!%p322_p2), %v1095_v1  ;;  %1007 = vmatprep.mubr.msk.bf16.mxu0 (!%p322_p2), %vm1096_vm0, %v1095_v1  ;;  %v961_v14 = vld [vmem:[%s1270_s3] ss:$0 sm:$0xff] (!%p322_p2)  ;;  %s1099_s21 = smov (!%p322_p2), 80  }
   0x9   : > { %1004 = vmatpush3.bf16.msra.mxu0 (!%p322_p2), %v1073_v3  ;;  %v1075_v62 = vld [vmem:[%s1273_s6] sm:$0xff] (!%p322_p2)  }
   0xa   : > { %1005 = vmatprep.subr.bf16.mxu0 (!%p322_p2), %v1095_v1 }
   0xb   : > { %1014 = vmatpush3.bf16.msra.mxu1 (!%p322_p2), %v1071_v2 }
   0xc   : > { %1015 = vmatprep.subr.bf16.mxu1 (!%p322_p2), %v1095_v1 }
   0xd   : > { %s1279_s14 = smov (!%p362_p3, %s952_s14), 1  ;;  %1006 = vmatpush3.bf16.msra.mxu0 %v1074_v5 }
   0xe   : > { %s983_s25 = sshll.u32 %s1279_s14, 4  ;;  %s957_s26 = sshll.u32 %s1279_s14, 3  ;;  %1021 = vmatprep.subr.bf16.mxu0 %v1095_v1 }
   0xf   : > { %s370_s29 = scalar_lea.vmem %s1268_s1, %s983_s25  ;;  %s365_s12 = scalar_lea.vmem %s1267_s0, %s957_s26  ;;  %1016 = vmatpush3.bf16.msra.mxu1 %v1072_v4 }
  0x10   : > { %v377_v6 = vld [vmem:[%s370_s29] sm:$0xff]  ;;  %v378_v7 = vld [vmem:[%s370_s29 + $0x8] sm:$0xff]  ;;  %1027 = vmatprep.subr.bf16.mxu1 %v1095_v1  ;;  %s374_s17 = scalar_lea.vmem %s1277_s10, %s957_s26 }
  0x11   : > { %v1199_v8 = vld [vmem:[%s365_s12] sm:$0xff]  ;;  %v447_v9 = vpack.c.bf16 %v378_v7, %v377_v6 }
  0x12   : > { %v379_v10 = vpack.c.bf16 %v1199_v8, %v1199_v8 }
  0x13   : > { %1018 = vmatmul.mubr.msk.bf16.vlgmr.msra.gmra.mrb[0].mxu1 %vm479_vm2, %v447_v9 }
  0x14   : > { %1008 = vmatmul.mubr.msk.bf16.vlgmr.msra.gmra.mrb[0].mxu0 %vm403_vm1, %v379_v10  ;;  %1029 = vmatprep.mubr.msk.bf16.mxu1 %vm1096_vm0, %v1095_v1 }
  0x15   : > { %1023 = vmatprep.mubr.msk.bf16.mxu0 %vm1096_vm0, %v1095_v1 }
  0xe6   : > { %v517_v13 = vpop.f32.mrb[0].mxu1 }
  0xe7   : > { %v441_v11 = vpop.f32.mrb[0].mxu0  ;;  %v1019_v16 = vpop.f32.mrb[1].mxu1  ;;  %v518_v20 = vadd.f32 %v965_v12, %v517_v13 }
  0xe8   : > { %v1009_v15 = vpop.f32.mrb[1].mxu0  ;;  %v520_v18 = vpop.f32.mrb[2].mxu1  ;;  %v442_v23 = vadd.f32 %v961_v14, %v441_v11 }
  0xe9   : > { %v444_v17 = vpop.f32.mrb[2].mxu0  ;;  %v521_v21 = vadd.f32 %v965_v12, %v520_v18  ;;  %v1020_v22 = vpop.f32.mrb[3].mxu1 }
  0xea   : > { %v1010_v19 = vpop.f32.mrb[3].mxu0  ;;  %v524_v25 = vpack.c.bf16 %v442_v23, %v442_v23 }
  0xeb   : > { %v525_v24 = vpack.c.bf16 %v521_v21, %v518_v20 }
  0xed   : > { %639 = vrot.lane.b32.xlu0 %v525_v24, %s1097_s19  ;;  %v531_v26 = vsel %vm526_vm3, %v525_v24, 0 }
  0xee   : > { %1022 = vmatpush3.bf16.xpose.msra.mxu0 %v531_v26 }
  0xef   : > { %1033 = vmatprep.subr.bf16.mxu0 %v1095_v1 }
  0xf1   : > { %637 = vrot.lane.b32.xlu0 %v524_v25, %s1097_s19 }
  0xf5   : > { %1024 = vmatmul.mubr.msk.bf16.vlgmr.msra.gmra.mrb[4].mxu0 %vm526_vm3, %v524_v25 }
  0xf6   : > { %1035 = vmatprep.mubr.msk.bf16.mxu0 %vm1096_vm0, %v1095_v1 }
 0x15f   : > { %v640_v27 = vpop.permute.xlu0 %639 }
 0x160   : > { %v645_v28 = vsel %vm526_vm3, %v640_v27, 0 }
 0x161   : > { %1034 = vmatpush3.bf16.xpose.msra.mxu0 %v645_v28 }
 0x162   : > { %1045 = vmatprep.subr.bf16.mxu0 %v1095_v1 }
 0x163   : > { %v638_v29 = vpop.permute.xlu0 %637 }
 0x168   : > { %1036 = vmatmul.mubr.msk.bf16.vlgmr.msra.gmra.mrb[8].mxu0 %vm526_vm3, %v638_v29 }
 0x169   : > { %1047 = vmatprep.mubr.msk.bf16.mxu0 %vm1096_vm0, %v1095_v1  ;;  %1046 = vmatpush3.bf16.msra.mxu0 %v1076_v57 }
 0x1c8   : > { %v567_v30 = vpop.f32.mrb[4].mxu0 }
 0x1c9   : > { %v573_v31 = vmul.f32 0.25, %v567_v30  ;;  %v1025_v32 = vpop.f32.mrb[5].mxu0 }
 0x1ca   : > { %v570_v33 = vpop.f32.mrb[6].mxu0 }
 0x1cb   : > { %v1026_v34 = vpop.f32.mrb[7].mxu0  ;;  %v574_v35 = vsel %vm526_vm3, %v573_v31, -inf }
 0x1cc   : > { %575 = vmax.xlane.f32.xlu1 %v574_v35  ;;  %v980_v34 = vld [vmem:[%s1276_s9] ss:$0 sm:$0xff] }
 0x23b   : > { %v681_v36 = vpop.f32.mrb[8].mxu0 }
 0x23c   : > { %v687_v37 = vmul.f32 0.25, %v681_v36  ;;  %v1037_v38 = vpop.f32.mrb[9].mxu0 }
 0x23d   : > { %v684_v39 = vpop.f32.mrb[10].mxu0 }
 0x23e   : > { %v1038_v40 = vpop.f32.mrb[11].mxu0  ;;  %v688_v41 = vsel %vm526_vm3, %v687_v37, -inf }
 0x23f   : > { %689 = vmax.xlane.f32.xlu1 %v688_v41 }
 0x250   : > { %587 = vrot.lane.b32.xlu1 %v525_v24, %s1098_s20 }
 0x259   : > { %v576_v42 = vpop.xlane.xlu1 %575 }
 0x25a   : > { %v577_v43 = vsub.f32 %v573_v31, %v576_v42 }
 0x25c   : > { %v578_v44 = vmul.f32 1.442695, %v577_v43 }
 0x25e   : > { %1077 = vpow2.f32 %v578_v44 }
 0x268   : > { %v1078_v45 = vpop.eup %1077 }
 0x269   : > { %v580_v46 = vsel %vm526_vm3, %v1078_v45, 0.0 }
 0x26a   : > { %581 = vadd.xlane.f32.xlu0 %v580_v46 }
 0x2cc   : > { %v690_v47 = vpop.xlane.xlu1 %689 }
 0x2cd   : > { %v691_v48 = vsub.f32 %v687_v37, %v690_v47 }
 0x2cf   : > { %v692_v49 = vmul.f32 1.442695, %v691_v48 }
 0x2d0   : > { %v588_v50 = vpop.permute.xlu1 %587 }
 0x2d1   : > { %1079 = vpow2.f32 %v692_v49  ;;  %1028 = vmatpush3.bf16.msra.mxu1 %v588_v50 }
 0x2d2   : > { %1039 = vmatprep.subr.bf16.mxu1 %v1095_v1 }
 0x2db   : > { %v1080_v51 = vpop.eup %1079 }
 0x2dc   : > { %v694_v52 = vsel %vm526_vm3, %v1080_v51, 0.0 }
 0x2dd   : > { %695 = vadd.xlane.f32.xlu1 %v694_v52 }
 0x2ee   : > { %700 = vrot.lane.b32.xlu1 %v525_v24, %s1099_s21 }
 0x2f7   : > { %v582_v53 = vpop.xlane.xlu0 %581 }
 0x2f8   : > { %1081 = vrcp.f32 %v582_v53 }
 0x302   : > { %v1082_v54 = vpop.eup %1081 }
 0x303   : > { %v584_v55 = vmul.f32 %v1082_v54, %v1078_v45 }
 0x305   : > { %v585_v56 = vpack.c.bf16 %v584_v55, %v584_v55 }
 0x307   : > { %1030 = vmatmul.mubr.msk.bf16.vlgmr.msra.gmra.mrb[4].mxu1 %vm526_vm3, %v585_v56 }
 0x308   : > { %1041 = vmatprep.mubr.msk.bf16.mxu1 %vm1096_vm0, %v1095_v1 }
 0x36a   : > { %v696_v58 = vpop.xlane.xlu1 %695 }
 0x36b   : > { %1083 = vrcp.f32 %v696_v58 }
 0x36e   : > { %v701_v59 = vpop.permute.xlu1 %700 }
 0x36f   : > { %1040 = vmatpush3.bf16.msra.mxu1 %v701_v59 }
 0x370   : > { %1051 = vmatprep.subr.bf16.mxu1 %v1095_v1 }
 0x375   : > { %v1084_v60 = vpop.eup %1083 }
 0x376   : > { %v698_v61 = vmul.f32 %v1084_v60, %v1080_v51 }
 0x378   : > { %v699_v63 = vpack.c.bf16 %v698_v61, %v698_v61 }
 0x37a   : > { %1042 = vmatmul.mubr.msk.bf16.vlgmr.msra.gmra.mrb[8].mxu1 %vm526_vm3, %v699_v63 }
 0x37b   : > { %1052 = vmatpush3.bf16.msra.mxu1 %v1075_v62  ;;  %1053 = vmatprep.mubr.msk.bf16.mxu1 %vm1096_vm0, %v1095_v1  ;;  %v978_v1 = vld [vmem:[%s1274_s7] ss:$0 sm:$0xff] }
 0x3da   : > { %v627_v0 = vpop.f32.mrb[4].mxu1 }
 0x3db   : > { %v633_v2 = vpack.c.bf16 %v627_v0, %v627_v0  ;;  %v1031_v3 = vpop.f32.mrb[5].mxu1 }
 0x3dc   : > { %v630_v4 = vpop.f32.mrb[6].mxu1 }
 0x3dd   : > { %v1032_v5 = vpop.f32.mrb[7].mxu1  ;;  %1054 = vmatmul.mubr.msk.bf16.vlgmr.msra.gmra.mrb[12].mxu1 %vm526_vm3, %v633_v2 }
 0x44d   : > { %v740_v6 = vpop.f32.mrb[8].mxu1 }
 0x44e   : > { %v746_v7 = vpack.c.bf16 %v740_v6, %v740_v6  ;;  %v1043_v9 = vpop.f32.mrb[9].mxu1 }
 0x44f   : > { %v743_v10 = vpop.f32.mrb[10].mxu1 }
 0x450   : > { %v1044_v11 = vpop.f32.mrb[11].mxu1  ;;  %1048 = vmatmul.mubr.msk.bf16.vlgmr.msra.gmra.mrb[12].mxu0 %vm526_vm3, %v746_v7 }
 0x4b0   : > { %v841_v12 = vpop.f32.mrb[12].mxu1 }
 0x4b1   : > { %v1055_v13 = vpop.f32.mrb[13].mxu1 }
 0x4b2   : > { %v844_v14 = vpop.f32.mrb[14].mxu1 }
 0x4b3   : > { %v1056_v15 = vpop.f32.mrb[15].mxu1 }
 0x523   : > { %v792_v16 = vpop.f32.mrb[12].mxu0 }
 0x524   : > { %v842_v17 = vadd.f32 %v841_v12, %v792_v16  ;;  %v1049_v18 = vpop.f32.mrb[13].mxu0 }
 0x525   : > { %v795_v19 = vpop.f32.mrb[14].mxu0 }
 0x526   : > { %v854_v20 = vadd.f32 %v978_v1, %v842_v17  ;;  %v1050_v21 = vpop.f32.mrb[15].mxu0 }
 0x528   : > { %v855_v22 = vadd.f32 %v854_v20, %v1199_v8  ;;  %v979_v8 = vld [vmem:[%s1275_s8] ss:$0 sm:$0xff] }
 0x52a   : > { %v858_v23 = vsel %vm403_vm1, %v855_v22, 0.0 }
 0x52b   : > { %859 = vadd.xlane.f32.xlu1 %v858_v23 }
 0x5b8   : > { %v860_v24 = vpop.xlane.xlu1 %859 }
 0x5b9   : > { %v862_v25 = vmul.f32 0.03125, %v860_v24 }
 0x5bb   : > { %v863_v26 = vsub.f32 %v855_v22, %v862_v25 }
 0x5bd   : > { %v864_v27 = vmul.f32 %v863_v26, %v863_v26 }
 0x5bf   : > { %v865_v28 = vsel %vm403_vm1, %v864_v27, 0.0 }
 0x5c0   : > { %866 = vadd.xlane.f32.xlu0 %v865_v28 }
 0x64d   : > { %v867_v29 = vpop.xlane.xlu0 %866 }
 0x64e   : > { %v868_v30 = vmul.f32 0.03125, %v867_v29 }
 0x650   : > { %v869_v31 = vadd.f32 1e-05, %v868_v30 }
 0x652   : > { %1085 = vrsqrt.f32 %v869_v31 }
 0x65c   : > { %v1086_v32 = vpop.eup %1085 }
 0x65d   : > { %v871_v33 = vmul.f32 %v1086_v32, %v863_v26 }
 0x65f   : > { %v878_v35 = vmul.f32 %v979_v8, %v871_v33 }
 0x661   : > { %v885_v36 = vadd.f32 %v980_v34, %v878_v35 }
 0x663   : > { %886 = vst.msk [vmem:[%s374_s17] sm:$0xff] %vm403_vm1, %v885_v36 }
 0x664 PF: > { %s20_s13 = sadd.s32 1, %s1093_s13  }
 0x665   : > { %p17_p4 = scmp.ge.s32.totalorder %s20_s13, 4  }
 0x667   :  { %19 = sbr.rel (!%p17_p4) target bundleno = 1 (0x1), region = 93 }

</bundles_post_ra>
